<compile_context>
chip_gen: v5e
topology: v5e:2x2
jax: 0.10.0
libtpu: 0.0.40
codegen_flags: <defaults>
</compile_context>

<pallas_src>
import math
from math import ceil

import jax
import jax.numpy as jnp
from jax import lax
from jax.experimental import pallas as pl
from jax.experimental.pallas import tpu as pltpu


# ----------------------------------------------------------------------------
# Pallas kernel: the whole forward pass for one block of BG graphs.
# ----------------------------------------------------------------------------
def model_kernel(
    x_ref, adj_ref, e_ref,
    wq_ref, bq_ref, wk_ref, bk_ref, wv_ref, bv_ref, we_ref, wsk_ref, bsk_ref,
    g1_ref, be1_ref,
    wm1_ref, bm1_ref,
    wrel2_ref, brel2_ref, wroot2_ref,
    g2_ref, be2_ref,
    wm2_ref, bm2_ref,
    wrel3_ref, brel3_ref, wroot3_ref,
    g3_ref, be3_ref,
    wl1_ref, bl1_ref,
    wro_ref, bro_ref,
    out_ref,
):
    f32 = jnp.float32
    BG, N, _ = adj_ref.shape
    De = we_ref.shape[0]
    H = wq_ref.shape[1]

    def mm(a, b):                      # flat 2-D matmul on the MXU
        return jnp.dot(a, b, preferred_element_type=f32)

    def bmm(a, b):                     # batched a @ b
        return jnp.einsum('bij,bjk->bik', a, b, preferred_element_type=f32)

    def bmm_tn(a, b):                  # batched a^T @ b  (contract first mat dim)
        return jnp.einsum('bji,bjk->bik', a, b, preferred_element_type=f32)

    def bmm_nt(a, b):                  # batched a @ b^T  (contract last dims)
        return jnp.einsum('bij,bkj->bik', a, b, preferred_element_type=f32)

    def layernorm(h, g, b):
        mu = jnp.mean(h, axis=-1, keepdims=True)
        d = h - mu
        var = jnp.mean(d * d, axis=-1, keepdims=True)
        return d * lax.rsqrt(var + 1e-5) * g + b

    def softmax_last(z):               # softmax over the lane axis
        zm = jnp.max(z, axis=-1, keepdims=True)
        e = jnp.exp(z - zm)
        return e * pl.reciprocal(jnp.sum(e, axis=-1, keepdims=True), approx=True)

    def mincut_pool(xin, ain, s_logits):
        # dense_mincut_pool; mincut/ortho losses never reach the model output.
        s = softmax_last(s_logits)                        # (BG, n, k)
        xp = bmm_tn(s, xin)                               # (BG, k, h)   s^T x
        ap = bmm(bmm_tn(s, ain), s)                       # (BG, k, k)   s^T A s
        k = ap.shape[-1]
        r = lax.broadcasted_iota(jnp.int32, (k, k), 0)
        c = lax.broadcasted_iota(jnp.int32, (k, k), 1)
        ap = jnp.where(r == c, 0.0, ap)                   # zero diagonal
        # Symmetric renormalisation d^-1/2 A d^-1/2 using row sums (torch ref).
        deg_row = jnp.sum(ap, axis=-1, keepdims=True)     # (BG, k, 1)
        ones_row = jnp.ones((BG, 1, k), f32)
        deg_col = bmm_nt(ones_row, ap)                    # same sums, lane layout
        dd_r = jnp.sqrt(deg_row) + 1e-15
        dd_c = jnp.sqrt(deg_col) + 1e-15
        ap = ap / (dd_r * dd_c)
        return xp, ap

    Xf = x_ref[...]                    # (BG*N, Cin)  f32, nodes of the block
    A = adj_ref[...].astype(f32)       # bf16 in HBM -> f32 ONCE (v5e: no bf16 VALU)
    E = e_ref[...].astype(f32)         # (BG, De, N, N) edge attrs [d, src, dst]

    # ---------------- TransformerConv (heads=1), batched over the block --------
    Qf = mm(Xf, wq_ref[...]) + bq_ref[...]              # (BG*N, H)
    Kf = mm(Xf, wk_ref[...]) + bk_ref[...]
    Vf = mm(Xf, wv_ref[...]) + bv_ref[...]
    SKf = mm(Xf, wsk_ref[...]) + bsk_ref[...]

    Q = Qf.reshape(BG, N, H)
    K = Kf.reshape(BG, N, H)
    V = Vf.reshape(BG, N, H)

    # q_i . lin_edge(e_ij) term of the logits, [src, dst] orientation.
    #   QWeT[b, d, i] = Q_i . We[d, :]     (one batched MXU matmul)
    web = jnp.broadcast_to(we_ref[...], (BG, De, H))    # (BG, De, H)
    QWeT = bmm_nt(web, Q)                               # (BG, De, N_dst)
    # Static length-De accumulation: each step is a sublane-row slice of QWeT
    # broadcast down the src axis + FMA on the (src, dst) tile.
    qe_t = jnp.zeros((BG, N, N), f32)
    for d in range(De):
        qe_t = qe_t + QWeT[:, d:d + 1, :] * E[:, d]     # (BG, src, dst)

    scale = 1.0 / math.sqrt(float(H))
    logits_t = (bmm_nt(K, Q) + qe_t) * scale            # (BG, src, dst)
    has_edge = A > 0.0                                  # mask straight from adj
    logits_t = jnp.where(has_edge, logits_t, jnp.full_like(logits_t, -1e30))
    m = jnp.max(logits_t, axis=1, keepdims=True)        # softmax over src axis
    p = jnp.where(has_edge, jnp.exp(logits_t - m), 0.0)
    den = jnp.sum(p, axis=1, keepdims=True)
    alpha_t = p * pl.reciprocal(jnp.maximum(den, 1e-30), approx=True)
    # (attention dropout skipped: eval / inference mode)

    attn = bmm_tn(alpha_t, V)                           # (BG, dst, H) = sum_j a_ij v_j

    # Edge message sum_j a_ij * lin_edge(e_ij):  build M^T[b,d,i] then contract
    # with We in ONE small MXU matmul (avoids De lane->sublane relayouts; the
    # kernel is HBM-bound so this K=5 matmul is free filler).
    m_rows = [jnp.sum(alpha_t * E[:, d], axis=1, keepdims=True)   # (BG, 1, dst)
              for d in range(De)]
    MT = jnp.concatenate(m_rows, axis=1)                # (BG, De, dst)
    attn = attn + bmm_tn(MT, web)                       # + sum_d M[:,d] We[d,:]

    # root skip + ln1 + relu (flat over all nodes in the block)
    x1f = attn.reshape(BG * N, H) + SKf
    x1f = jnp.maximum(layernorm(x1f, g1_ref[...], be1_ref[...]), 0.0)

    # ---------------- pool 1 ----------------
    K1 = wm1_ref.shape[1]
    s1 = (mm(x1f, wm1_ref[...]) + bm1_ref[...]).reshape(BG, N, K1)
    x1 = x1f.reshape(BG, N, H)
    xp1, ap1 = mincut_pool(x1, A, s1)                   # (BG,K1,H), (BG,K1,K1)

    # ---------------- DenseGraphConv 2 + ln2 + relu ----------------
    ax1 = bmm(ap1, xp1).reshape(BG * K1, H)
    xp1f = xp1.reshape(BG * K1, H)
    h2 = mm(ax1, wrel2_ref[...]) + brel2_ref[...] + mm(xp1f, wroot2_ref[...])
    x2f = jnp.maximum(layernorm(h2, g2_ref[...], be2_ref[...]), 0.0)

    # ---------------- pool 2 ----------------
    K2 = wm2_ref.shape[1]
    s2 = (mm(x2f, wm2_ref[...]) + bm2_ref[...]).reshape(BG, K1, K2)
    x2 = x2f.reshape(BG, K1, H)
    xp2, ap2 = mincut_pool(x2, ap1, s2)                 # (BG,K2,H), (BG,K2,K2)

    # ---------------- DenseGraphConv 3 + ln3 + relu (flat 2-D matmuls) --------
    ax2f = bmm(ap2, xp2).reshape(BG * K2, H)
    xp2f = xp2.reshape(BG * K2, H)
    h3 = mm(ax2f, wrel3_ref[...]) + brel3_ref[...] + mm(xp2f, wroot3_ref[...])
    x3f = jnp.maximum(layernorm(h3, g3_ref[...], be3_ref[...]), 0.0)

    # ---------------- lin1 + relu, readout, mean over nodes, sigmoid ----------
    x4f = jnp.maximum(mm(x3f, wl1_ref[...]) + bl1_ref[...], 0.0)
    yf = mm(x4f, wro_ref[...]) + bro_ref[...]           # (BG*K2, Cout)
    Cout = yf.shape[-1]
    y = yf.reshape(BG, K2, Cout)
    ymean = jnp.mean(y, axis=1, keepdims=True)          # (BG, 1, Cout)
    out_ref[...] = 1.0 / (1.0 + jnp.exp(-ymean))        # exact sigmoid (tiny op)


# ----------------------------------------------------------------------------
# Wrapper
# ----------------------------------------------------------------------------
def _pick_graphs_per_block(B, N, De, Cin):
    """Largest block that (a) keeps >=2 grid steps when B>=2 so DMA pipelines
    and v7x's two TensorCores both get work, (b) stays under a ~8 MiB per-step
    input budget (fits v7x's 64 MiB VMEM with double buffering)."""
    per_graph = 2 * (N * N + De * N * N) + 4 * N * Cin          # bf16 adj/eden + f32 x
    bg = max(1, min(B, (8 << 20) // max(per_graph, 1)))
    if B >= 2:
        bg = min(bg, B // 2)                                    # >= 2 grid steps
    bg = max(bg, 1)
    while B % bg:                                               # exact grid
        bg -= 1
    return bg


def _cost_estimate(B, N, Cin, H, De, K1, K2, Cout, param_bytes):
    mm2 = lambda m, k, n: 2 * m * k * n
    fl = 0
    fl += 4 * mm2(B * N, Cin, H)                                 # Q/K/V/skip
    fl += mm2(B * De, H, N) + 2 * De * B * N * N                 # edge logits
    fl += mm2(B * N, H, N) + 10 * B * N * N                      # KQ^T + softmax
    fl += mm2(B * N, N, H)                                       # alpha^T V
    fl += 3 * De * B * N * N + mm2(B * N, De, H)                 # edge message
    fl += 12 * B * N * H + mm2(B * N, H, K1)                     # ln1 + mlp1
    fl += mm2(B * K1, N, H) + mm2(B * K1, N, K1) + mm2(B * K1, K1, K1)   # pool1
    fl += mm2(B * K1, K1, H) + 2 * mm2(B * K1, H, H) + 12 * B * K1 * H   # conv2+ln2
    fl += mm2(B * K1, H, K2)                                     # mlp2
    fl += mm2(B * K2, K1, H) + mm2(B * K2, K1, K2) + mm2(B * K2, K2, K2) # pool2
    fl += mm2(B * K2, K2, H) + 2 * mm2(B * K2, H, H) + 12 * B * K2 * H   # conv3+ln3
    fl += mm2(B * K2, H, H) + mm2(B * K2, H, Cout)               # lin1 + readout
    trans = B * N * N + B * N * K1 + B * K1 * K2 + B * Cout      # exp / sigmoid
    byts = (B * N * Cin * 4 + B * N * N * 2 + B * De * N * N * 2
            + param_bytes + B * Cout * 4)
    return pl.CostEstimate(flops=int(fl), transcendentals=int(trans),
                           bytes_accessed=int(byts))


def run_model(x_flat, adj, eden, params, *, graphs_per_block=None):
    B, N, _ = adj.shape
    Cin = x_flat.shape[1]
    De = eden.shape[1]
    H = params[0].shape[1]
    K1 = params[12].shape[1]
    K2 = params[19].shape[1]
    Cout = params[-1].shape[1]

    BG = (_pick_graphs_per_block(B, N, De, Cin)
          if graphs_per_block is None else graphs_per_block)
    assert B % BG == 0
    num_blocks = B // BG

    # HBM-side bf16 for the bandwidth-dominant dense tensors (kernel upcasts once).
    adj_b = adj.astype(jnp.bfloat16)
    eden_b = eden.astype(jnp.bfloat16)

    data_specs = [
        pl.BlockSpec((BG * N, Cin), lambda g: (g, 0)),
        pl.BlockSpec((BG, N, N), lambda g: (g, 0, 0)),
        pl.BlockSpec((BG, De, N, N), lambda g: (g, 0, 0, 0)),
    ]
    w_specs = [pl.BlockSpec(p.shape, lambda g, nd=p.ndim: (0,) * nd) for p in params]
    param_bytes = sum(int(p.size) * p.dtype.itemsize for p in params)

    # TODO(synk): for the real N=330 config, add a second grid axis that tiles
    # the dst (lane) axis of the attention in 128-lane tiles (pad 330->384);
    # the softmax is over src so no online-softmax carry is needed.
    out = pl.pallas_call(
        model_kernel,
        out_shape=jax.ShapeDtypeStruct((B, 1, Cout), jnp.float32),
        grid=(num_blocks,),
        in_specs=data_specs + w_specs,
        out_specs=pl.BlockSpec((BG, 1, Cout), lambda g: (g, 0, 0)),
        compiler_params=pltpu.CompilerParams(
            dimension_semantics=("parallel",),
            vmem_limit_bytes=48 << 20),
        cost_estimate=_cost_estimate(B, N, Cin, H, De, K1, K2, Cout, param_bytes),
    )(x_flat, adj_b, eden_b, *params)

    res = out.reshape(B, Cout)
    return res.squeeze(-1) if Cout == 1 else res        # mirrors .squeeze(-1)


def make_params(key, cin, hidden, cout, edge_dim, k1, k2):
    ks = iter(jax.random.split(key, 32))

    def W(fi, fo):
        return jax.random.normal(next(ks), (fi, fo), jnp.float32) / math.sqrt(fi)

    def Bv(fo):
        return jax.random.normal(next(ks), (1, fo), jnp.float32) * 0.02

    ones = lambda d: jnp.ones((1, d), jnp.float32)
    zeros = lambda d: jnp.zeros((1, d), jnp.float32)

    return [
        W(cin, hidden), Bv(hidden),                 # TransformerConv lin_query
        W(cin, hidden), Bv(hidden),                 # lin_key
        W(cin, hidden), Bv(hidden),                 # lin_value
        W(edge_dim, hidden),                        # lin_edge (no bias)
        W(cin, hidden), Bv(hidden),                 # lin_skip (root)
        ones(hidden), zeros(hidden),                # ln1
        W(hidden, k1), Bv(k1),                      # mlp1
        W(hidden, hidden), Bv(hidden), W(hidden, hidden),   # conv2: rel(+b), root
        ones(hidden), zeros(hidden),                # ln2
        W(hidden, k2), Bv(k2),                      # mlp2
        W(hidden, hidden), Bv(hidden), W(hidden, hidden),   # conv3: rel(+b), root
        ones(hidden), zeros(hidden),                # ln3
        W(hidden, hidden), Bv(hidden),              # lin1
        W(hidden, cout), Bv(cout),                  # readout1
    ]
    # TODO(synk): mlp3 is defined in the torch module but unused in forward.


if __name__ == "__main__":
    # config analog: average_nodes = nodes-per-graph = 16 (torch code hard-codes 330)
    B, NODES, Cin, HIDDEN, EDGE_DIM, Cout = 2, 16, 8, 32, 5, 1
    K1 = ceil(0.5 * NODES)      # 8
    K2 = ceil(0.5 * K1)         # 4

    key = jax.random.PRNGKey(0)
    kx, ke, kp = jax.random.split(key, 3)

    # sparse-style inputs (as the torch module would receive them)
    x = jax.random.normal(kx, (B * NODES, Cin), jnp.float32)
    srcs, dsts = [], []
    for b in range(B):                               # bidirectional ring per graph
        for i in range(NODES):
            srcs += [b * NODES + i, b * NODES + (i + 1) % NODES]
            dsts += [b * NODES + (i + 1) % NODES, b * NODES + i]
    edge_index = jnp.array([srcs, dsts], dtype=jnp.int32)
    E = edge_index.shape[1]
    edge_attr = jax.random.normal(ke, (E, EDGE_DIM), jnp.float32)
    batch = jnp.repeat(jnp.arange(B, dtype=jnp.int32), NODES)   # graph id per node

    # ---- glue: densify (to_dense_batch / to_dense_adj / dense edge attrs) ----
    gb = edge_index[0] // NODES
    src_l = edge_index[0] % NODES
    dst_l = edge_index[1] % NODES
    adj = jnp.zeros((B, NODES, NODES), jnp.float32).at[gb, src_l, dst_l].add(1.0)
    eden = jnp.zeros((B, EDGE_DIM, NODES, NODES), jnp.float32)
    eden = eden.at[gb, :, src_l, dst_l].add(edge_attr)   # [b, d, src, dst]

    params = make_params(kp, Cin, HIDDEN, Cout, EDGE_DIM, K1, K2)

    out = run_model(x, adj, eden, params)
    out = jax.block_until_ready(out)
    assert out.shape == (B,), out.shape
    assert bool(jnp.all(jnp.isfinite(out)))
    assert bool(jnp.all((out > 0.0) & (out < 1.0)))
    print("KERNEL_OK")
</pallas_src>

<mosaic_0001>
module attributes {stable_mosaic.version = 11 : i64} {
  func.func @model_kernel(%arg0: i32, %arg1: memref<16x8xf32, #tpu.memory_space<vmem>>, %arg2: memref<1x16x16xbf16, #tpu.memory_space<vmem>>, %arg3: memref<1x5x16x16xbf16, #tpu.memory_space<vmem>>, %arg4: memref<8x32xf32, #tpu.memory_space<vmem>>, %arg5: memref<1x32xf32, #tpu.memory_space<vmem>>, %arg6: memref<8x32xf32, #tpu.memory_space<vmem>>, %arg7: memref<1x32xf32, #tpu.memory_space<vmem>>, %arg8: memref<8x32xf32, #tpu.memory_space<vmem>>, %arg9: memref<1x32xf32, #tpu.memory_space<vmem>>, %arg10: memref<5x32xf32, #tpu.memory_space<vmem>>, %arg11: memref<8x32xf32, #tpu.memory_space<vmem>>, %arg12: memref<1x32xf32, #tpu.memory_space<vmem>>, %arg13: memref<1x32xf32, #tpu.memory_space<vmem>>, %arg14: memref<1x32xf32, #tpu.memory_space<vmem>>, %arg15: memref<32x8xf32, #tpu.memory_space<vmem>>, %arg16: memref<1x8xf32, #tpu.memory_space<vmem>>, %arg17: memref<32x32xf32, #tpu.memory_space<vmem>>, %arg18: memref<1x32xf32, #tpu.memory_space<vmem>>, %arg19: memref<32x32xf32, #tpu.memory_space<vmem>>, %arg20: memref<1x32xf32, #tpu.memory_space<vmem>>, %arg21: memref<1x32xf32, #tpu.memory_space<vmem>>, %arg22: memref<32x4xf32, #tpu.memory_space<vmem>>, %arg23: memref<1x4xf32, #tpu.memory_space<vmem>>, %arg24: memref<32x32xf32, #tpu.memory_space<vmem>>, %arg25: memref<1x32xf32, #tpu.memory_space<vmem>>, %arg26: memref<32x32xf32, #tpu.memory_space<vmem>>, %arg27: memref<1x32xf32, #tpu.memory_space<vmem>>, %arg28: memref<1x32xf32, #tpu.memory_space<vmem>>, %arg29: memref<32x32xf32, #tpu.memory_space<vmem>>, %arg30: memref<1x32xf32, #tpu.memory_space<vmem>>, %arg31: memref<32x1xf32, #tpu.memory_space<vmem>>, %arg32: memref<1x1xf32, #tpu.memory_space<vmem>>, %arg33: memref<1x1x1xf32, #tpu.memory_space<vmem>>) attributes {dimension_semantics = [#tpu.dimension_semantics<parallel>], iteration_bounds = array<i64: 2>, scalar_prefetch = 0 : i64, scratch_operands = 0 : i64, tpu.core_type = #tpu.core_type<tc>, window_params = [{transform_indices = @transform_0, window_bounds = array<i64: 16, 8>}, {transform_indices = @transform_1, window_bounds = array<i64: 1, 16, 16>}, {transform_indices = @transform_2, window_bounds = array<i64: 1, 5, 16, 16>}, {pipeline_mode = #tpu.pipeline_mode<synchronous>, transform_indices = @transform_3, window_bounds = array<i64: 8, 32>}, {pipeline_mode = #tpu.pipeline_mode<synchronous>, transform_indices = @transform_4, window_bounds = array<i64: 1, 32>}, {pipeline_mode = #tpu.pipeline_mode<synchronous>, transform_indices = @transform_5, window_bounds = array<i64: 8, 32>}, {pipeline_mode = #tpu.pipeline_mode<synchronous>, transform_indices = @transform_6, window_bounds = array<i64: 1, 32>}, {pipeline_mode = #tpu.pipeline_mode<synchronous>, transform_indices = @transform_7, window_bounds = array<i64: 8, 32>}, {pipeline_mode = #tpu.pipeline_mode<synchronous>, transform_indices = @transform_8, window_bounds = array<i64: 1, 32>}, {pipeline_mode = #tpu.pipeline_mode<synchronous>, transform_indices = @transform_9, window_bounds = array<i64: 5, 32>}, {pipeline_mode = #tpu.pipeline_mode<synchronous>, transform_indices = @transform_10, window_bounds = array<i64: 8, 32>}, {pipeline_mode = #tpu.pipeline_mode<synchronous>, transform_indices = @transform_11, window_bounds = array<i64: 1, 32>}, {pipeline_mode = #tpu.pipeline_mode<synchronous>, transform_indices = @transform_12, window_bounds = array<i64: 1, 32>}, {pipeline_mode = #tpu.pipeline_mode<synchronous>, transform_indices = @transform_13, window_bounds = array<i64: 1, 32>}, {pipeline_mode = #tpu.pipeline_mode<synchronous>, transform_indices = @transform_14, window_bounds = array<i64: 32, 8>}, {pipeline_mode = #tpu.pipeline_mode<synchronous>, transform_indices = @transform_15, window_bounds = array<i64: 1, 8>}, {pipeline_mode = #tpu.pipeline_mode<synchronous>, transform_indices = @transform_16, window_bounds = array<i64: 32, 32>}, {pipeline_mode = #tpu.pipeline_mode<synchronous>, transform_indices = @transform_17, window_bounds = array<i64: 1, 32>}, {pipeline_mode = #tpu.pipeline_mode<synchronous>, transform_indices = @transform_18, window_bounds = array<i64: 32, 32>}, {pipeline_mode = #tpu.pipeline_mode<synchronous>, transform_indices = @transform_19, window_bounds = array<i64: 1, 32>}, {pipeline_mode = #tpu.pipeline_mode<synchronous>, transform_indices = @transform_20, window_bounds = array<i64: 1, 32>}, {pipeline_mode = #tpu.pipeline_mode<synchronous>, transform_indices = @transform_21, window_bounds = array<i64: 32, 4>}, {pipeline_mode = #tpu.pipeline_mode<synchronous>, transform_indices = @transform_22, window_bounds = array<i64: 1, 4>}, {pipeline_mode = #tpu.pipeline_mode<synchronous>, transform_indices = @transform_23, window_bounds = array<i64: 32, 32>}, {pipeline_mode = #tpu.pipeline_mode<synchronous>, transform_indices = @transform_24, window_bounds = array<i64: 1, 32>}, {pipeline_mode = #tpu.pipeline_mode<synchronous>, transform_indices = @transform_25, window_bounds = array<i64: 32, 32>}, {pipeline_mode = #tpu.pipeline_mode<synchronous>, transform_indices = @transform_26, window_bounds = array<i64: 1, 32>}, {pipeline_mode = #tpu.pipeline_mode<synchronous>, transform_indices = @transform_27, window_bounds = array<i64: 1, 32>}, {pipeline_mode = #tpu.pipeline_mode<synchronous>, transform_indices = @transform_28, window_bounds = array<i64: 32, 32>}, {pipeline_mode = #tpu.pipeline_mode<synchronous>, transform_indices = @transform_29, window_bounds = array<i64: 1, 32>}, {pipeline_mode = #tpu.pipeline_mode<synchronous>, transform_indices = @transform_30, window_bounds = array<i64: 32, 1>}, {pipeline_mode = #tpu.pipeline_mode<synchronous>, transform_indices = @transform_31, window_bounds = array<i64: 1, 1>}, {transform_indices = @transform_32, window_bounds = array<i64: 1, 1, 1>}]} {
    %c0 = arith.constant 0 : index
    %c0_0 = arith.constant 0 : index
    %0 = vector.load %arg1[%c0, %c0_0] : memref<16x8xf32, #tpu.memory_space<vmem>>, vector<16x8xf32>
    %c0_1 = arith.constant 0 : index
    %c0_2 = arith.constant 0 : index
    %c0_3 = arith.constant 0 : index
    %1 = vector.load %arg2[%c0_1, %c0_2, %c0_3] : memref<1x16x16xbf16, #tpu.memory_space<vmem>>, vector<1x16x16xbf16>
    %2 = arith.extf %1 : vector<1x16x16xbf16> to vector<1x16x16xf32>
    %c0_4 = arith.constant 0 : index
    %c0_5 = arith.constant 0 : index
    %c0_6 = arith.constant 0 : index
    %c0_7 = arith.constant 0 : index
    %3 = vector.load %arg3[%c0_4, %c0_5, %c0_6, %c0_7] : memref<1x5x16x16xbf16, #tpu.memory_space<vmem>>, vector<1x5x16x16xbf16>
    %4 = arith.extf %3 : vector<1x5x16x16xbf16> to vector<1x5x16x16xf32>
    %c0_8 = arith.constant 0 : index
    %c0_9 = arith.constant 0 : index
    %5 = vector.load %arg4[%c0_8, %c0_9] : memref<8x32xf32, #tpu.memory_space<vmem>>, vector<8x32xf32>
    %cst = arith.constant dense<0.000000e+00> : vector<16x32xf32>
    %6 = tpu.matmul %0, %5, %cst {dimension_numbers = #tpu.dot_dimension_numbers<[1], [0], [0], [1], [0, 0, 1, 1], [], []>} : vector<16x8xf32>, vector<8x32xf32>, vector<16x32xf32> -> vector<16x32xf32>
    %c0_10 = arith.constant 0 : index
    %c0_11 = arith.constant 0 : index
    %7 = vector.load %arg5[%c0_10, %c0_11] : memref<1x32xf32, #tpu.memory_space<vmem>>, vector<1x32xf32>
    %8 = vector.broadcast %7 : vector<1x32xf32> to vector<16x32xf32>
    %9 = arith.addf %6, %8 : vector<16x32xf32>
    %c0_12 = arith.constant 0 : index
    %c0_13 = arith.constant 0 : index
    %10 = vector.load %arg6[%c0_12, %c0_13] : memref<8x32xf32, #tpu.memory_space<vmem>>, vector<8x32xf32>
    %cst_14 = arith.constant dense<0.000000e+00> : vector<16x32xf32>
    %11 = tpu.matmul %0, %10, %cst_14 {dimension_numbers = #tpu.dot_dimension_numbers<[1], [0], [0], [1], [0, 0, 1, 1], [], []>} : vector<16x8xf32>, vector<8x32xf32>, vector<16x32xf32> -> vector<16x32xf32>
    %c0_15 = arith.constant 0 : index
    %c0_16 = arith.constant 0 : index
    %12 = vector.load %arg7[%c0_15, %c0_16] : memref<1x32xf32, #tpu.memory_space<vmem>>, vector<1x32xf32>
    %13 = vector.broadcast %12 : vector<1x32xf32> to vector<16x32xf32>
    %14 = arith.addf %11, %13 : vector<16x32xf32>
    %c0_17 = arith.constant 0 : index
    %c0_18 = arith.constant 0 : index
    %15 = vector.load %arg8[%c0_17, %c0_18] : memref<8x32xf32, #tpu.memory_space<vmem>>, vector<8x32xf32>
    %cst_19 = arith.constant dense<0.000000e+00> : vector<16x32xf32>
    %16 = tpu.matmul %0, %15, %cst_19 {dimension_numbers = #tpu.dot_dimension_numbers<[1], [0], [0], [1], [0, 0, 1, 1], [], []>} : vector<16x8xf32>, vector<8x32xf32>, vector<16x32xf32> -> vector<16x32xf32>
    %c0_20 = arith.constant 0 : index
    %c0_21 = arith.constant 0 : index
    %17 = vector.load %arg9[%c0_20, %c0_21] : memref<1x32xf32, #tpu.memory_space<vmem>>, vector<1x32xf32>
    %18 = vector.broadcast %17 : vector<1x32xf32> to vector<16x32xf32>
    %19 = arith.addf %16, %18 : vector<16x32xf32>
    %c0_22 = arith.constant 0 : index
    %c0_23 = arith.constant 0 : index
    %20 = vector.load %arg11[%c0_22, %c0_23] : memref<8x32xf32, #tpu.memory_space<vmem>>, vector<8x32xf32>
    %cst_24 = arith.constant dense<0.000000e+00> : vector<16x32xf32>
    %21 = tpu.matmul %0, %20, %cst_24 {dimension_numbers = #tpu.dot_dimension_numbers<[1], [0], [0], [1], [0, 0, 1, 1], [], []>} : vector<16x8xf32>, vector<8x32xf32>, vector<16x32xf32> -> vector<16x32xf32>
    %c0_25 = arith.constant 0 : index
    %c0_26 = arith.constant 0 : index
    %22 = vector.load %arg12[%c0_25, %c0_26] : memref<1x32xf32, #tpu.memory_space<vmem>>, vector<1x32xf32>
    %23 = vector.broadcast %22 : vector<1x32xf32> to vector<16x32xf32>
    %24 = arith.addf %21, %23 : vector<16x32xf32>
    %25 = vector.shape_cast %9 : vector<16x32xf32> to vector<1x16x32xf32>
    %26 = vector.shape_cast %14 : vector<16x32xf32> to vector<1x16x32xf32>
    %27 = vector.shape_cast %19 : vector<16x32xf32> to vector<1x16x32xf32>
    %c0_27 = arith.constant 0 : index
    %c0_28 = arith.constant 0 : index
    %28 = vector.load %arg10[%c0_27, %c0_28] : memref<5x32xf32, #tpu.memory_space<vmem>>, vector<5x32xf32>
    %29 = vector.shape_cast %28 : vector<5x32xf32> to vector<1x5x32xf32>
    "tpu.trace_start"() <{level = 10 : i32, message = "bij,bkj->bik"}> : () -> ()
    %cst_29 = arith.constant dense<0.000000e+00> : vector<1x5x16xf32>
    %30 = tpu.matmul %29, %25, %cst_29 {dimension_numbers = #tpu.dot_dimension_numbers<[2], [2], [1], [1], [0, 0, 0, 1, 1, 1], [0], [0]>} : vector<1x5x32xf32>, vector<1x16x32xf32>, vector<1x5x16xf32> -> vector<1x5x16xf32>
    %cst_30 = arith.constant 0.000000e+00 : f32
    "tpu.trace_stop"() : () -> ()
    %31 = vector.broadcast %cst_30 : f32 to vector<1x16x16xf32>
    %32 = vector.extract_strided_slice %30 {offsets = [0, 0, 0], sizes = [1, 1, 16], strides = [1, 1, 1]} : vector<1x5x16xf32> to vector<1x1x16xf32>
    %33 = vector.extract_strided_slice %4 {offsets = [0, 0, 0, 0], sizes = [1, 1, 16, 16], strides = [1, 1, 1, 1]} : vector<1x5x16x16xf32> to vector<1x1x16x16xf32>
    %34 = vector.shape_cast %33 : vector<1x1x16x16xf32> to vector<1x16x16xf32>
    %35 = vector.broadcast %32 : vector<1x1x16xf32> to vector<1x16x16xf32>
    %36 = arith.mulf %35, %34 : vector<1x16x16xf32>
    %37 = arith.addf %31, %36 : vector<1x16x16xf32>
    %38 = vector.extract_strided_slice %30 {offsets = [0, 1, 0], sizes = [1, 1, 16], strides = [1, 1, 1]} : vector<1x5x16xf32> to vector<1x1x16xf32>
    %39 = vector.extract_strided_slice %4 {offsets = [0, 1, 0, 0], sizes = [1, 1, 16, 16], strides = [1, 1, 1, 1]} : vector<1x5x16x16xf32> to vector<1x1x16x16xf32>
    %40 = vector.shape_cast %39 : vector<1x1x16x16xf32> to vector<1x16x16xf32>
    %41 = vector.broadcast %38 : vector<1x1x16xf32> to vector<1x16x16xf32>
    %42 = arith.mulf %41, %40 : vector<1x16x16xf32>
    %43 = arith.addf %37, %42 : vector<1x16x16xf32>
    %44 = vector.extract_strided_slice %30 {offsets = [0, 2, 0], sizes = [1, 1, 16], strides = [1, 1, 1]} : vector<1x5x16xf32> to vector<1x1x16xf32>
    %45 = vector.extract_strided_slice %4 {offsets = [0, 2, 0, 0], sizes = [1, 1, 16, 16], strides = [1, 1, 1, 1]} : vector<1x5x16x16xf32> to vector<1x1x16x16xf32>
    %46 = vector.shape_cast %45 : vector<1x1x16x16xf32> to vector<1x16x16xf32>
    %47 = vector.broadcast %44 : vector<1x1x16xf32> to vector<1x16x16xf32>
    %48 = arith.mulf %47, %46 : vector<1x16x16xf32>
    %49 = arith.addf %43, %48 : vector<1x16x16xf32>
    %50 = vector.extract_strided_slice %30 {offsets = [0, 3, 0], sizes = [1, 1, 16], strides = [1, 1, 1]} : vector<1x5x16xf32> to vector<1x1x16xf32>
    %51 = vector.extract_strided_slice %4 {offsets = [0, 3, 0, 0], sizes = [1, 1, 16, 16], strides = [1, 1, 1, 1]} : vector<1x5x16x16xf32> to vector<1x1x16x16xf32>
    %52 = vector.shape_cast %51 : vector<1x1x16x16xf32> to vector<1x16x16xf32>
    %53 = vector.broadcast %50 : vector<1x1x16xf32> to vector<1x16x16xf32>
    %54 = arith.mulf %53, %52 : vector<1x16x16xf32>
    %55 = arith.addf %49, %54 : vector<1x16x16xf32>
    %56 = vector.extract_strided_slice %30 {offsets = [0, 4, 0], sizes = [1, 1, 16], strides = [1, 1, 1]} : vector<1x5x16xf32> to vector<1x1x16xf32>
    %57 = vector.extract_strided_slice %4 {offsets = [0, 4, 0, 0], sizes = [1, 1, 16, 16], strides = [1, 1, 1, 1]} : vector<1x5x16x16xf32> to vector<1x1x16x16xf32>
    %58 = vector.shape_cast %57 : vector<1x1x16x16xf32> to vector<1x16x16xf32>
    %59 = vector.broadcast %56 : vector<1x1x16xf32> to vector<1x16x16xf32>
    %60 = arith.mulf %59, %58 : vector<1x16x16xf32>
    %61 = arith.addf %55, %60 : vector<1x16x16xf32>
    "tpu.trace_start"() <{level = 10 : i32, message = "bij,bkj->bik"}> : () -> ()
    %cst_31 = arith.constant dense<0.000000e+00> : vector<1x16x16xf32>
    %62 = tpu.matmul %26, %25, %cst_31 {dimension_numbers = #tpu.dot_dimension_numbers<[2], [2], [1], [1], [0, 0, 0, 1, 1, 1], [0], [0]>} : vector<1x16x32xf32>, vector<1x16x32xf32>, vector<1x16x16xf32> -> vector<1x16x16xf32>
    "tpu.trace_stop"() : () -> ()
    %63 = arith.addf %62, %61 : vector<1x16x16xf32>
    %cst_32 = arith.constant 0.176776692 : f32
    %64 = vector.broadcast %cst_32 : f32 to vector<1x16x16xf32>
    %65 = arith.mulf %63, %64 : vector<1x16x16xf32>
    %cst_33 = arith.constant 0.000000e+00 : f32
    %66 = vector.broadcast %cst_33 : f32 to vector<1x16x16xf32>
    %67 = arith.cmpf ogt, %2, %66 : vector<1x16x16xf32>
    %cst_34 = arith.constant -1.000000e+30 : f32
    %68 = vector.broadcast %cst_34 : f32 to vector<1x16x16xf32>
    %69 = arith.select %67, %65, %68 : vector<1x16x16xi1>, vector<1x16x16xf32>
    %cst_35 = arith.constant dense<0xFF800000> : vector<1x16xf32>
    %70 = vector.multi_reduction <maximumf>, %69, %cst_35 [1] : vector<1x16x16xf32> to vector<1x16xf32>
    %71 = vector.shape_cast %70 : vector<1x16xf32> to vector<1x1x16xf32>
    %72 = vector.broadcast %71 : vector<1x1x16xf32> to vector<1x16x16xf32>
    %73 = arith.subf %69, %72 : vector<1x16x16xf32>
    %74 = math.exp %73 : vector<1x16x16xf32>
    %cst_36 = arith.constant 0.000000e+00 : f32
    %75 = vector.broadcast %cst_36 : f32 to vector<1x16x16xf32>
    %76 = arith.select %67, %74, %75 : vector<1x16x16xi1>, vector<1x16x16xf32>
    %cst_37 = arith.constant dense<0.000000e+00> : vector<1x16xf32>
    %77 = vector.multi_reduction <add>, %76, %cst_37 [1] : vector<1x16x16xf32> to vector<1x16xf32>
    %78 = vector.shape_cast %77 : vector<1x16xf32> to vector<1x1x16xf32>
    %cst_38 = arith.constant 1.000000e-30 : f32
    %79 = vector.broadcast %cst_38 : f32 to vector<1x1x16xf32>
    %80 = arith.maximumf %78, %79 : vector<1x1x16xf32>
    %81 = tpu.reciprocal %80 {approx = true} : vector<1x1x16xf32> -> vector<1x1x16xf32>
    %82 = vector.broadcast %81 : vector<1x1x16xf32> to vector<1x16x16xf32>
    %83 = arith.mulf %76, %82 : vector<1x16x16xf32>
    "tpu.trace_start"() <{level = 10 : i32, message = "bji,bjk->bik"}> : () -> ()
    %cst_39 = arith.constant dense<0.000000e+00> : vector<1x16x32xf32>
    %84 = tpu.matmul %83, %27, %cst_39 {dimension_numbers = #tpu.dot_dimension_numbers<[1], [1], [2], [2], [0, 0, 0, 2, 1, 2], [0], [0]>} : vector<1x16x16xf32>, vector<1x16x32xf32>, vector<1x16x32xf32> -> vector<1x16x32xf32>
    "tpu.trace_stop"() : () -> ()
    %85 = vector.extract_strided_slice %4 {offsets = [0, 0, 0, 0], sizes = [1, 1, 16, 16], strides = [1, 1, 1, 1]} : vector<1x5x16x16xf32> to vector<1x1x16x16xf32>
    %86 = vector.shape_cast %85 : vector<1x1x16x16xf32> to vector<1x16x16xf32>
    %87 = arith.mulf %83, %86 : vector<1x16x16xf32>
    %cst_40 = arith.constant dense<0.000000e+00> : vector<1x16xf32>
    %88 = vector.multi_reduction <add>, %87, %cst_40 [1] : vector<1x16x16xf32> to vector<1x16xf32>
    %89 = vector.shape_cast %88 : vector<1x16xf32> to vector<1x1x16xf32>
    %90 = vector.extract_strided_slice %4 {offsets = [0, 1, 0, 0], sizes = [1, 1, 16, 16], strides = [1, 1, 1, 1]} : vector<1x5x16x16xf32> to vector<1x1x16x16xf32>
    %91 = vector.shape_cast %90 : vector<1x1x16x16xf32> to vector<1x16x16xf32>
    %92 = arith.mulf %83, %91 : vector<1x16x16xf32>
    %cst_41 = arith.constant dense<0.000000e+00> : vector<1x16xf32>
    %93 = vector.multi_reduction <add>, %92, %cst_41 [1] : vector<1x16x16xf32> to vector<1x16xf32>
    %94 = vector.shape_cast %93 : vector<1x16xf32> to vector<1x1x16xf32>
    %95 = vector.extract_strided_slice %4 {offsets = [0, 2, 0, 0], sizes = [1, 1, 16, 16], strides = [1, 1, 1, 1]} : vector<1x5x16x16xf32> to vector<1x1x16x16xf32>
    %96 = vector.shape_cast %95 : vector<1x1x16x16xf32> to vector<1x16x16xf32>
    %97 = arith.mulf %83, %96 : vector<1x16x16xf32>
    %cst_42 = arith.constant dense<0.000000e+00> : vector<1x16xf32>
    %98 = vector.multi_reduction <add>, %97, %cst_42 [1] : vector<1x16x16xf32> to vector<1x16xf32>
    %99 = vector.shape_cast %98 : vector<1x16xf32> to vector<1x1x16xf32>
    %100 = vector.extract_strided_slice %4 {offsets = [0, 3, 0, 0], sizes = [1, 1, 16, 16], strides = [1, 1, 1, 1]} : vector<1x5x16x16xf32> to vector<1x1x16x16xf32>
    %101 = vector.shape_cast %100 : vector<1x1x16x16xf32> to vector<1x16x16xf32>
    %102 = arith.mulf %83, %101 : vector<1x16x16xf32>
    %cst_43 = arith.constant dense<0.000000e+00> : vector<1x16xf32>
    %103 = vector.multi_reduction <add>, %102, %cst_43 [1] : vector<1x16x16xf32> to vector<1x16xf32>
    %104 = vector.shape_cast %103 : vector<1x16xf32> to vector<1x1x16xf32>
    %105 = vector.extract_strided_slice %4 {offsets = [0, 4, 0, 0], sizes = [1, 1, 16, 16], strides = [1, 1, 1, 1]} : vector<1x5x16x16xf32> to vector<1x1x16x16xf32>
    %106 = vector.shape_cast %105 : vector<1x1x16x16xf32> to vector<1x16x16xf32>
    %107 = arith.mulf %83, %106 : vector<1x16x16xf32>
    %cst_44 = arith.constant dense<0.000000e+00> : vector<1x16xf32>
    %108 = vector.multi_reduction <add>, %107, %cst_44 [1] : vector<1x16x16xf32> to vector<1x16xf32>
    %109 = vector.shape_cast %108 : vector<1x16xf32> to vector<1x1x16xf32>
    %110 = tpu.concatenate %89, %94, %99, %104, %109 in 1 : vector<1x1x16xf32>, vector<1x1x16xf32>, vector<1x1x16xf32>, vector<1x1x16xf32>, vector<1x1x16xf32> -> vector<1x5x16xf32>
    "tpu.trace_start"() <{level = 10 : i32, message = "bji,bjk->bik"}> : () -> ()
    %cst_45 = arith.constant dense<0.000000e+00> : vector<1x16x32xf32>
    %111 = tpu.matmul %110, %29, %cst_45 {dimension_numbers = #tpu.dot_dimension_numbers<[1], [1], [2], [2], [0, 0, 0, 2, 1, 2], [0], [0]>} : vector<1x5x16xf32>, vector<1x5x32xf32>, vector<1x16x32xf32> -> vector<1x16x32xf32>
    "tpu.trace_stop"() : () -> ()
    %112 = arith.addf %84, %111 : vector<1x16x32xf32>
    %113 = vector.shape_cast %112 : vector<1x16x32xf32> to vector<16x32xf32>
    %114 = arith.addf %113, %24 : vector<16x32xf32>
    %c0_46 = arith.constant 0 : index
    %c0_47 = arith.constant 0 : index
    %115 = vector.load %arg13[%c0_46, %c0_47] : memref<1x32xf32, #tpu.memory_space<vmem>>, vector<1x32xf32>
    %c0_48 = arith.constant 0 : index
    %c0_49 = arith.constant 0 : index
    %116 = vector.load %arg14[%c0_48, %c0_49] : memref<1x32xf32, #tpu.memory_space<vmem>>, vector<1x32xf32>
    %cst_50 = arith.constant dense<0.000000e+00> : vector<16xf32>
    %117 = vector.multi_reduction <add>, %114, %cst_50 [1] : vector<16x32xf32> to vector<16xf32>
    %118 = vector.shape_cast %117 : vector<16xf32> to vector<16x1xf32>
    %cst_51 = arith.constant 3.200000e+01 : f32
    %119 = vector.broadcast %cst_51 : f32 to vector<16x1xf32>
    %120 = arith.divf %118, %119 : vector<16x1xf32>
    %121 = vector.broadcast %120 : vector<16x1xf32> to vector<16x32xf32>
    %122 = arith.subf %114, %121 : vector<16x32xf32>
    %123 = arith.mulf %122, %122 : vector<16x32xf32>
    %cst_52 = arith.constant dense<0.000000e+00> : vector<16xf32>
    %124 = vector.multi_reduction <add>, %123, %cst_52 [1] : vector<16x32xf32> to vector<16xf32>
    %125 = vector.shape_cast %124 : vector<16xf32> to vector<16x1xf32>
    %cst_53 = arith.constant 3.200000e+01 : f32
    %126 = vector.broadcast %cst_53 : f32 to vector<16x1xf32>
    %127 = arith.divf %125, %126 : vector<16x1xf32>
    %cst_54 = arith.constant 9.99999974E-6 : f32
    %128 = vector.broadcast %cst_54 : f32 to vector<16x1xf32>
    %129 = arith.addf %127, %128 : vector<16x1xf32>
    %130 = math.rsqrt %129 : vector<16x1xf32>
    %131 = vector.broadcast %130 : vector<16x1xf32> to vector<16x32xf32>
    %132 = arith.mulf %122, %131 : vector<16x32xf32>
    %133 = vector.broadcast %115 : vector<1x32xf32> to vector<16x32xf32>
    %134 = arith.mulf %132, %133 : vector<16x32xf32>
    %135 = vector.broadcast %116 : vector<1x32xf32> to vector<16x32xf32>
    %136 = arith.addf %134, %135 : vector<16x32xf32>
    %cst_55 = arith.constant 0.000000e+00 : f32
    %137 = vector.broadcast %cst_55 : f32 to vector<16x32xf32>
    %138 = arith.maximumf %136, %137 : vector<16x32xf32>
    %c0_56 = arith.constant 0 : index
    %c0_57 = arith.constant 0 : index
    %139 = vector.load %arg15[%c0_56, %c0_57] : memref<32x8xf32, #tpu.memory_space<vmem>>, vector<32x8xf32>
    %cst_58 = arith.constant dense<0.000000e+00> : vector<16x8xf32>
    %140 = tpu.matmul %138, %139, %cst_58 {dimension_numbers = #tpu.dot_dimension_numbers<[1], [0], [0], [1], [0, 0, 1, 1], [], []>} : vector<16x32xf32>, vector<32x8xf32>, vector<16x8xf32> -> vector<16x8xf32>
    %c0_59 = arith.constant 0 : index
    %c0_60 = arith.constant 0 : index
    %141 = vector.load %arg16[%c0_59, %c0_60] : memref<1x8xf32, #tpu.memory_space<vmem>>, vector<1x8xf32>
    %142 = vector.broadcast %141 : vector<1x8xf32> to vector<16x8xf32>
    %143 = arith.addf %140, %142 : vector<16x8xf32>
    %144 = vector.shape_cast %143 : vector<16x8xf32> to vector<1x16x8xf32>
    %145 = vector.shape_cast %138 : vector<16x32xf32> to vector<1x16x32xf32>
    %cst_61 = arith.constant dense<0xFF800000> : vector<1x16xf32>
    %146 = vector.multi_reduction <maximumf>, %144, %cst_61 [2] : vector<1x16x8xf32> to vector<1x16xf32>
    %147 = vector.shape_cast %146 : vector<1x16xf32> to vector<1x16x1xf32>
    %148 = vector.broadcast %147 : vector<1x16x1xf32> to vector<1x16x8xf32>
    %149 = arith.subf %144, %148 : vector<1x16x8xf32>
    %150 = math.exp %149 : vector<1x16x8xf32>
    %cst_62 = arith.constant dense<0.000000e+00> : vector<1x16xf32>
    %151 = vector.multi_reduction <add>, %150, %cst_62 [2] : vector<1x16x8xf32> to vector<1x16xf32>
    %152 = vector.shape_cast %151 : vector<1x16xf32> to vector<1x16x1xf32>
    %153 = tpu.reciprocal %152 {approx = true} : vector<1x16x1xf32> -> vector<1x16x1xf32>
    %154 = vector.broadcast %153 : vector<1x16x1xf32> to vector<1x16x8xf32>
    %155 = arith.mulf %150, %154 : vector<1x16x8xf32>
    "tpu.trace_start"() <{level = 10 : i32, message = "bji,bjk->bik"}> : () -> ()
    %cst_63 = arith.constant dense<0.000000e+00> : vector<1x8x32xf32>
    %156 = tpu.matmul %155, %145, %cst_63 {dimension_numbers = #tpu.dot_dimension_numbers<[1], [1], [2], [2], [0, 0, 0, 2, 1, 2], [0], [0]>} : vector<1x16x8xf32>, vector<1x16x32xf32>, vector<1x8x32xf32> -> vector<1x8x32xf32>
    %cst_64 = arith.constant dense<0.000000e+00> : vector<1x8x16xf32>
    %157 = tpu.matmul %155, %2, %cst_64 {dimension_numbers = #tpu.dot_dimension_numbers<[1], [1], [2], [2], [0, 0, 0, 2, 1, 2], [0], [0]>} : vector<1x16x8xf32>, vector<1x16x16xf32>, vector<1x8x16xf32> -> vector<1x8x16xf32>
    "tpu.trace_stop"() : () -> ()
    "tpu.trace_start"() <{level = 10 : i32, message = "bij,bjk->bik"}> : () -> ()
    %cst_65 = arith.constant dense<0.000000e+00> : vector<1x8x8xf32>
    %158 = tpu.matmul %157, %155, %cst_65 {dimension_numbers = #tpu.dot_dimension_numbers<[2], [1], [1], [2], [0, 0, 0, 1, 1, 2], [0], [0]>} : vector<1x8x16xf32>, vector<1x16x8xf32>, vector<1x8x8xf32> -> vector<1x8x8xf32>
    "tpu.trace_stop"() : () -> ()
    %159 = tpu.iota {dimensions = array<i32: 0>} : vector<8x8xi32>
    %160 = tpu.iota {dimensions = array<i32: 1>} : vector<8x8xi32>
    %161 = arith.cmpi eq, %159, %160 : vector<8x8xi32>
    %cst_66 = arith.constant 0.000000e+00 : f32
    %162 = vector.shape_cast %161 : vector<8x8xi1> to vector<1x8x8xi1>
    %163 = vector.broadcast %cst_66 : f32 to vector<1x8x8xf32>
    %164 = arith.select %162, %163, %158 : vector<1x8x8xi1>, vector<1x8x8xf32>
    %cst_67 = arith.constant dense<0.000000e+00> : vector<1x8xf32>
    %165 = vector.multi_reduction <add>, %164, %cst_67 [2] : vector<1x8x8xf32> to vector<1x8xf32>
    %166 = vector.shape_cast %165 : vector<1x8xf32> to vector<1x8x1xf32>
    %cst_68 = arith.constant 1.000000e+00 : f32
    %167 = vector.broadcast %cst_68 : f32 to vector<1x1x8xf32>
    "tpu.trace_start"() <{level = 10 : i32, message = "bij,bkj->bik"}> : () -> ()
    %cst_69 = arith.constant dense<0.000000e+00> : vector<1x1x8xf32>
    %168 = tpu.matmul %167, %164, %cst_69 {dimension_numbers = #tpu.dot_dimension_numbers<[2], [2], [1], [1], [0, 0, 0, 1, 1, 1], [0], [0]>} : vector<1x1x8xf32>, vector<1x8x8xf32>, vector<1x1x8xf32> -> vector<1x1x8xf32>
    "tpu.trace_stop"() : () -> ()
    %169 = math.sqrt %166 : vector<1x8x1xf32>
    %cst_70 = arith.constant 1.000000e-15 : f32
    %170 = vector.broadcast %cst_70 : f32 to vector<1x8x1xf32>
    %171 = arith.addf %169, %170 : vector<1x8x1xf32>
    %172 = math.sqrt %168 : vector<1x1x8xf32>
    %cst_71 = arith.constant 1.000000e-15 : f32
    %173 = vector.broadcast %cst_71 : f32 to vector<1x1x8xf32>
    %174 = arith.addf %172, %173 : vector<1x1x8xf32>
    %175 = vector.broadcast %171 : vector<1x8x1xf32> to vector<1x8x8xf32>
    %176 = vector.broadcast %174 : vector<1x1x8xf32> to vector<1x8x8xf32>
    %177 = arith.mulf %175, %176 : vector<1x8x8xf32>
    %178 = arith.divf %164, %177 : vector<1x8x8xf32>
    "tpu.trace_start"() <{level = 10 : i32, message = "bij,bjk->bik"}> : () -> ()
    %cst_72 = arith.constant dense<0.000000e+00> : vector<1x8x32xf32>
    %179 = tpu.matmul %178, %156, %cst_72 {dimension_numbers = #tpu.dot_dimension_numbers<[2], [1], [1], [2], [0, 0, 0, 1, 1, 2], [0], [0]>} : vector<1x8x8xf32>, vector<1x8x32xf32>, vector<1x8x32xf32> -> vector<1x8x32xf32>
    "tpu.trace_stop"() : () -> ()
    %180 = vector.shape_cast %179 : vector<1x8x32xf32> to vector<8x32xf32>
    %181 = vector.shape_cast %156 : vector<1x8x32xf32> to vector<8x32xf32>
    %c0_73 = arith.constant 0 : index
    %c0_74 = arith.constant 0 : index
    %182 = vector.load %arg17[%c0_73, %c0_74] : memref<32x32xf32, #tpu.memory_space<vmem>>, vector<32x32xf32>
    %cst_75 = arith.constant dense<0.000000e+00> : vector<8x32xf32>
    %183 = tpu.matmul %180, %182, %cst_75 {dimension_numbers = #tpu.dot_dimension_numbers<[1], [0], [0], [1], [0, 0, 1, 1], [], []>} : vector<8x32xf32>, vector<32x32xf32>, vector<8x32xf32> -> vector<8x32xf32>
    %c0_76 = arith.constant 0 : index
    %c0_77 = arith.constant 0 : index
    %184 = vector.load %arg18[%c0_76, %c0_77] : memref<1x32xf32, #tpu.memory_space<vmem>>, vector<1x32xf32>
    %185 = vector.broadcast %184 : vector<1x32xf32> to vector<8x32xf32>
    %186 = arith.addf %183, %185 : vector<8x32xf32>
    %c0_78 = arith.constant 0 : index
    %c0_79 = arith.constant 0 : index
    %187 = vector.load %arg19[%c0_78, %c0_79] : memref<32x32xf32, #tpu.memory_space<vmem>>, vector<32x32xf32>
    %cst_80 = arith.constant dense<0.000000e+00> : vector<8x32xf32>
    %188 = tpu.matmul %181, %187, %cst_80 {dimension_numbers = #tpu.dot_dimension_numbers<[1], [0], [0], [1], [0, 0, 1, 1], [], []>} : vector<8x32xf32>, vector<32x32xf32>, vector<8x32xf32> -> vector<8x32xf32>
    %189 = arith.addf %186, %188 : vector<8x32xf32>
    %c0_81 = arith.constant 0 : index
    %c0_82 = arith.constant 0 : index
    %190 = vector.load %arg20[%c0_81, %c0_82] : memref<1x32xf32, #tpu.memory_space<vmem>>, vector<1x32xf32>
    %c0_83 = arith.constant 0 : index
    %c0_84 = arith.constant 0 : index
    %191 = vector.load %arg21[%c0_83, %c0_84] : memref<1x32xf32, #tpu.memory_space<vmem>>, vector<1x32xf32>
    %cst_85 = arith.constant dense<0.000000e+00> : vector<8xf32>
    %192 = vector.multi_reduction <add>, %189, %cst_85 [1] : vector<8x32xf32> to vector<8xf32>
    %193 = vector.shape_cast %192 : vector<8xf32> to vector<8x1xf32>
    %cst_86 = arith.constant 3.200000e+01 : f32
    %194 = vector.broadcast %cst_86 : f32 to vector<8x1xf32>
    %195 = arith.divf %193, %194 : vector<8x1xf32>
    %196 = vector.broadcast %195 : vector<8x1xf32> to vector<8x32xf32>
    %197 = arith.subf %189, %196 : vector<8x32xf32>
    %198 = arith.mulf %197, %197 : vector<8x32xf32>
    %cst_87 = arith.constant dense<0.000000e+00> : vector<8xf32>
    %199 = vector.multi_reduction <add>, %198, %cst_87 [1] : vector<8x32xf32> to vector<8xf32>
    %200 = vector.shape_cast %199 : vector<8xf32> to vector<8x1xf32>
    %cst_88 = arith.constant 3.200000e+01 : f32
    %201 = vector.broadcast %cst_88 : f32 to vector<8x1xf32>
    %202 = arith.divf %200, %201 : vector<8x1xf32>
    %cst_89 = arith.constant 9.99999974E-6 : f32
    %203 = vector.broadcast %cst_89 : f32 to vector<8x1xf32>
    %204 = arith.addf %202, %203 : vector<8x1xf32>
    %205 = math.rsqrt %204 : vector<8x1xf32>
    %206 = vector.broadcast %205 : vector<8x1xf32> to vector<8x32xf32>
    %207 = arith.mulf %197, %206 : vector<8x32xf32>
    %208 = vector.broadcast %190 : vector<1x32xf32> to vector<8x32xf32>
    %209 = arith.mulf %207, %208 : vector<8x32xf32>
    %210 = vector.broadcast %191 : vector<1x32xf32> to vector<8x32xf32>
    %211 = arith.addf %209, %210 : vector<8x32xf32>
    %cst_90 = arith.constant 0.000000e+00 : f32
    %212 = vector.broadcast %cst_90 : f32 to vector<8x32xf32>
    %213 = arith.maximumf %211, %212 : vector<8x32xf32>
    %c0_91 = arith.constant 0 : index
    %c0_92 = arith.constant 0 : index
    %214 = vector.load %arg22[%c0_91, %c0_92] : memref<32x4xf32, #tpu.memory_space<vmem>>, vector<32x4xf32>
    %cst_93 = arith.constant dense<0.000000e+00> : vector<8x4xf32>
    %215 = tpu.matmul %213, %214, %cst_93 {dimension_numbers = #tpu.dot_dimension_numbers<[1], [0], [0], [1], [0, 0, 1, 1], [], []>} : vector<8x32xf32>, vector<32x4xf32>, vector<8x4xf32> -> vector<8x4xf32>
    %c0_94 = arith.constant 0 : index
    %c0_95 = arith.constant 0 : index
    %216 = vector.load %arg23[%c0_94, %c0_95] : memref<1x4xf32, #tpu.memory_space<vmem>>, vector<1x4xf32>
    %217 = vector.broadcast %216 : vector<1x4xf32> to vector<8x4xf32>
    %218 = arith.addf %215, %217 : vector<8x4xf32>
    %219 = vector.shape_cast %218 : vector<8x4xf32> to vector<1x8x4xf32>
    %220 = vector.shape_cast %213 : vector<8x32xf32> to vector<1x8x32xf32>
    %cst_96 = arith.constant dense<0xFF800000> : vector<1x8xf32>
    %221 = vector.multi_reduction <maximumf>, %219, %cst_96 [2] : vector<1x8x4xf32> to vector<1x8xf32>
    %222 = vector.shape_cast %221 : vector<1x8xf32> to vector<1x8x1xf32>
    %223 = vector.broadcast %222 : vector<1x8x1xf32> to vector<1x8x4xf32>
    %224 = arith.subf %219, %223 : vector<1x8x4xf32>
    %225 = math.exp %224 : vector<1x8x4xf32>
    %cst_97 = arith.constant dense<0.000000e+00> : vector<1x8xf32>
    %226 = vector.multi_reduction <add>, %225, %cst_97 [2] : vector<1x8x4xf32> to vector<1x8xf32>
    %227 = vector.shape_cast %226 : vector<1x8xf32> to vector<1x8x1xf32>
    %228 = tpu.reciprocal %227 {approx = true} : vector<1x8x1xf32> -> vector<1x8x1xf32>
    %229 = vector.broadcast %228 : vector<1x8x1xf32> to vector<1x8x4xf32>
    %230 = arith.mulf %225, %229 : vector<1x8x4xf32>
    "tpu.trace_start"() <{level = 10 : i32, message = "bji,bjk->bik"}> : () -> ()
    %cst_98 = arith.constant dense<0.000000e+00> : vector<1x4x32xf32>
    %231 = tpu.matmul %230, %220, %cst_98 {dimension_numbers = #tpu.dot_dimension_numbers<[1], [1], [2], [2], [0, 0, 0, 2, 1, 2], [0], [0]>} : vector<1x8x4xf32>, vector<1x8x32xf32>, vector<1x4x32xf32> -> vector<1x4x32xf32>
    %cst_99 = arith.constant dense<0.000000e+00> : vector<1x4x8xf32>
    %232 = tpu.matmul %230, %178, %cst_99 {dimension_numbers = #tpu.dot_dimension_numbers<[1], [1], [2], [2], [0, 0, 0, 2, 1, 2], [0], [0]>} : vector<1x8x4xf32>, vector<1x8x8xf32>, vector<1x4x8xf32> -> vector<1x4x8xf32>
    "tpu.trace_stop"() : () -> ()
    "tpu.trace_start"() <{level = 10 : i32, message = "bij,bjk->bik"}> : () -> ()
    %cst_100 = arith.constant dense<0.000000e+00> : vector<1x4x4xf32>
    %233 = tpu.matmul %232, %230, %cst_100 {dimension_numbers = #tpu.dot_dimension_numbers<[2], [1], [1], [2], [0, 0, 0, 1, 1, 2], [0], [0]>} : vector<1x4x8xf32>, vector<1x8x4xf32>, vector<1x4x4xf32> -> vector<1x4x4xf32>
    "tpu.trace_stop"() : () -> ()
    %234 = tpu.iota {dimensions = array<i32: 0>} : vector<4x4xi32>
    %235 = tpu.iota {dimensions = array<i32: 1>} : vector<4x4xi32>
    %236 = arith.cmpi eq, %234, %235 : vector<4x4xi32>
    %cst_101 = arith.constant 0.000000e+00 : f32
    %237 = vector.shape_cast %236 : vector<4x4xi1> to vector<1x4x4xi1>
    %238 = vector.broadcast %cst_101 : f32 to vector<1x4x4xf32>
    %239 = arith.select %237, %238, %233 : vector<1x4x4xi1>, vector<1x4x4xf32>
    %cst_102 = arith.constant dense<0.000000e+00> : vector<1x4xf32>
    %240 = vector.multi_reduction <add>, %239, %cst_102 [2] : vector<1x4x4xf32> to vector<1x4xf32>
    %241 = vector.shape_cast %240 : vector<1x4xf32> to vector<1x4x1xf32>
    %cst_103 = arith.constant 1.000000e+00 : f32
    %242 = vector.broadcast %cst_103 : f32 to vector<1x1x4xf32>
    "tpu.trace_start"() <{level = 10 : i32, message = "bij,bkj->bik"}> : () -> ()
    %cst_104 = arith.constant dense<0.000000e+00> : vector<1x1x4xf32>
    %243 = tpu.matmul %242, %239, %cst_104 {dimension_numbers = #tpu.dot_dimension_numbers<[2], [2], [1], [1], [0, 0, 0, 1, 1, 1], [0], [0]>} : vector<1x1x4xf32>, vector<1x4x4xf32>, vector<1x1x4xf32> -> vector<1x1x4xf32>
    "tpu.trace_stop"() : () -> ()
    %244 = math.sqrt %241 : vector<1x4x1xf32>
    %cst_105 = arith.constant 1.000000e-15 : f32
    %245 = vector.broadcast %cst_105 : f32 to vector<1x4x1xf32>
    %246 = arith.addf %244, %245 : vector<1x4x1xf32>
    %247 = math.sqrt %243 : vector<1x1x4xf32>
    %cst_106 = arith.constant 1.000000e-15 : f32
    %248 = vector.broadcast %cst_106 : f32 to vector<1x1x4xf32>
    %249 = arith.addf %247, %248 : vector<1x1x4xf32>
    %250 = vector.broadcast %246 : vector<1x4x1xf32> to vector<1x4x4xf32>
    %251 = vector.broadcast %249 : vector<1x1x4xf32> to vector<1x4x4xf32>
    %252 = arith.mulf %250, %251 : vector<1x4x4xf32>
    %253 = arith.divf %239, %252 : vector<1x4x4xf32>
    "tpu.trace_start"() <{level = 10 : i32, message = "bij,bjk->bik"}> : () -> ()
    %cst_107 = arith.constant dense<0.000000e+00> : vector<1x4x32xf32>
    %254 = tpu.matmul %253, %231, %cst_107 {dimension_numbers = #tpu.dot_dimension_numbers<[2], [1], [1], [2], [0, 0, 0, 1, 1, 2], [0], [0]>} : vector<1x4x4xf32>, vector<1x4x32xf32>, vector<1x4x32xf32> -> vector<1x4x32xf32>
    "tpu.trace_stop"() : () -> ()
    %255 = vector.shape_cast %254 : vector<1x4x32xf32> to vector<4x32xf32>
    %256 = vector.shape_cast %231 : vector<1x4x32xf32> to vector<4x32xf32>
    %c0_108 = arith.constant 0 : index
    %c0_109 = arith.constant 0 : index
    %257 = vector.load %arg24[%c0_108, %c0_109] : memref<32x32xf32, #tpu.memory_space<vmem>>, vector<32x32xf32>
    %cst_110 = arith.constant dense<0.000000e+00> : vector<4x32xf32>
    %258 = tpu.matmul %255, %257, %cst_110 {dimension_numbers = #tpu.dot_dimension_numbers<[1], [0], [0], [1], [0, 0, 1, 1], [], []>} : vector<4x32xf32>, vector<32x32xf32>, vector<4x32xf32> -> vector<4x32xf32>
    %c0_111 = arith.constant 0 : index
    %c0_112 = arith.constant 0 : index
    %259 = vector.load %arg25[%c0_111, %c0_112] : memref<1x32xf32, #tpu.memory_space<vmem>>, vector<1x32xf32>
    %260 = vector.broadcast %259 : vector<1x32xf32> to vector<4x32xf32>
    %261 = arith.addf %258, %260 : vector<4x32xf32>
    %c0_113 = arith.constant 0 : index
    %c0_114 = arith.constant 0 : index
    %262 = vector.load %arg26[%c0_113, %c0_114] : memref<32x32xf32, #tpu.memory_space<vmem>>, vector<32x32xf32>
    %cst_115 = arith.constant dense<0.000000e+00> : vector<4x32xf32>
    %263 = tpu.matmul %256, %262, %cst_115 {dimension_numbers = #tpu.dot_dimension_numbers<[1], [0], [0], [1], [0, 0, 1, 1], [], []>} : vector<4x32xf32>, vector<32x32xf32>, vector<4x32xf32> -> vector<4x32xf32>
    %264 = arith.addf %261, %263 : vector<4x32xf32>
    %c0_116 = arith.constant 0 : index
    %c0_117 = arith.constant 0 : index
    %265 = vector.load %arg27[%c0_116, %c0_117] : memref<1x32xf32, #tpu.memory_space<vmem>>, vector<1x32xf32>
    %c0_118 = arith.constant 0 : index
    %c0_119 = arith.constant 0 : index
    %266 = vector.load %arg28[%c0_118, %c0_119] : memref<1x32xf32, #tpu.memory_space<vmem>>, vector<1x32xf32>
    %cst_120 = arith.constant dense<0.000000e+00> : vector<4xf32>
    %267 = vector.multi_reduction <add>, %264, %cst_120 [1] : vector<4x32xf32> to vector<4xf32>
    %268 = vector.shape_cast %267 : vector<4xf32> to vector<4x1xf32>
    %cst_121 = arith.constant 3.200000e+01 : f32
    %269 = vector.broadcast %cst_121 : f32 to vector<4x1xf32>
    %270 = arith.divf %268, %269 : vector<4x1xf32>
    %271 = vector.broadcast %270 : vector<4x1xf32> to vector<4x32xf32>
    %272 = arith.subf %264, %271 : vector<4x32xf32>
    %273 = arith.mulf %272, %272 : vector<4x32xf32>
    %cst_122 = arith.constant dense<0.000000e+00> : vector<4xf32>
    %274 = vector.multi_reduction <add>, %273, %cst_122 [1] : vector<4x32xf32> to vector<4xf32>
    %275 = vector.shape_cast %274 : vector<4xf32> to vector<4x1xf32>
    %cst_123 = arith.constant 3.200000e+01 : f32
    %276 = vector.broadcast %cst_123 : f32 to vector<4x1xf32>
    %277 = arith.divf %275, %276 : vector<4x1xf32>
    %cst_124 = arith.constant 9.99999974E-6 : f32
    %278 = vector.broadcast %cst_124 : f32 to vector<4x1xf32>
    %279 = arith.addf %277, %278 : vector<4x1xf32>
    %280 = math.rsqrt %279 : vector<4x1xf32>
    %281 = vector.broadcast %280 : vector<4x1xf32> to vector<4x32xf32>
    %282 = arith.mulf %272, %281 : vector<4x32xf32>
    %283 = vector.broadcast %265 : vector<1x32xf32> to vector<4x32xf32>
    %284 = arith.mulf %282, %283 : vector<4x32xf32>
    %285 = vector.broadcast %266 : vector<1x32xf32> to vector<4x32xf32>
    %286 = arith.addf %284, %285 : vector<4x32xf32>
    %cst_125 = arith.constant 0.000000e+00 : f32
    %287 = vector.broadcast %cst_125 : f32 to vector<4x32xf32>
    %288 = arith.maximumf %286, %287 : vector<4x32xf32>
    %c0_126 = arith.constant 0 : index
    %c0_127 = arith.constant 0 : index
    %289 = vector.load %arg29[%c0_126, %c0_127] : memref<32x32xf32, #tpu.memory_space<vmem>>, vector<32x32xf32>
    %cst_128 = arith.constant dense<0.000000e+00> : vector<4x32xf32>
    %290 = tpu.matmul %288, %289, %cst_128 {dimension_numbers = #tpu.dot_dimension_numbers<[1], [0], [0], [1], [0, 0, 1, 1], [], []>} : vector<4x32xf32>, vector<32x32xf32>, vector<4x32xf32> -> vector<4x32xf32>
    %c0_129 = arith.constant 0 : index
    %c0_130 = arith.constant 0 : index
    %291 = vector.load %arg30[%c0_129, %c0_130] : memref<1x32xf32, #tpu.memory_space<vmem>>, vector<1x32xf32>
    %292 = vector.broadcast %291 : vector<1x32xf32> to vector<4x32xf32>
    %293 = arith.addf %290, %292 : vector<4x32xf32>
    %cst_131 = arith.constant 0.000000e+00 : f32
    %294 = vector.broadcast %cst_131 : f32 to vector<4x32xf32>
    %295 = arith.maximumf %293, %294 : vector<4x32xf32>
    %c0_132 = arith.constant 0 : index
    %c0_133 = arith.constant 0 : index
    %296 = vector.load %arg31[%c0_132, %c0_133] : memref<32x1xf32, #tpu.memory_space<vmem>>, vector<32x1xf32>
    %cst_134 = arith.constant dense<0.000000e+00> : vector<4x1xf32>
    %297 = tpu.matmul %295, %296, %cst_134 {dimension_numbers = #tpu.dot_dimension_numbers<[1], [0], [0], [1], [0, 0, 1, 1], [], []>} : vector<4x32xf32>, vector<32x1xf32>, vector<4x1xf32> -> vector<4x1xf32>
    %c0_135 = arith.constant 0 : index
    %c0_136 = arith.constant 0 : index
    %298 = vector.load %arg32[%c0_135, %c0_136] : memref<1x1xf32, #tpu.memory_space<vmem>>, vector<1x1xf32>
    %299 = vector.broadcast %298 : vector<1x1xf32> to vector<4x1xf32>
    %300 = arith.addf %297, %299 : vector<4x1xf32>
    %301 = vector.shape_cast %300 : vector<4x1xf32> to vector<1x4x1xf32>
    %cst_137 = arith.constant dense<0.000000e+00> : vector<1x1xf32>
    %302 = vector.multi_reduction <add>, %301, %cst_137 [1] : vector<1x4x1xf32> to vector<1x1xf32>
    %303 = vector.shape_cast %302 : vector<1x1xf32> to vector<1x1x1xf32>
    %cst_138 = arith.constant 4.000000e+00 : f32
    %304 = vector.broadcast %cst_138 : f32 to vector<1x1x1xf32>
    %305 = arith.divf %303, %304 : vector<1x1x1xf32>
    %cst_139 = arith.constant 0.000000e+00 : f32
    %306 = vector.broadcast %cst_139 : f32 to vector<1x1x1xf32>
    %307 = arith.subf %306, %305 : vector<1x1x1xf32>
    %308 = math.exp %307 : vector<1x1x1xf32>
    %cst_140 = arith.constant 1.000000e+00 : f32
    %309 = vector.broadcast %cst_140 : f32 to vector<1x1x1xf32>
    %310 = arith.addf %309, %308 : vector<1x1x1xf32>
    %cst_141 = arith.constant 1.000000e+00 : f32
    %311 = vector.broadcast %cst_141 : f32 to vector<1x1x1xf32>
    %312 = arith.divf %311, %310 : vector<1x1x1xf32>
    %c0_142 = arith.constant 0 : index
    %c0_143 = arith.constant 0 : index
    %c0_144 = arith.constant 0 : index
    %313 = vector.load %arg33[%c0_142, %c0_143, %c0_144] : memref<1x1x1xf32, #tpu.memory_space<vmem>>, vector<1x1x1xf32>
    tpu.vector_store %arg33[%c0_142, %c0_143, %c0_144], %312 {strides = array<i32>} : memref<1x1x1xf32, #tpu.memory_space<vmem>>, vector<1x1x1xf32>,
    return
  }
  func.func @transform_0(%arg0: i32) -> (i32, i32) {
    %c0_i32 = arith.constant 0 : i32
    %c0_i32_0 = arith.constant 0 : i32
    return %arg0, %c0_i32 : i32, i32
  }
  func.func @transform_1(%arg0: i32) -> (i32, i32, i32) {
    %c0_i32 = arith.constant 0 : i32
    %c0_i32_0 = arith.constant 0 : i32
    %c0_i32_1 = arith.constant 0 : i32
    return %arg0, %c0_i32, %c0_i32_0 : i32, i32, i32
  }
  func.func @transform_2(%arg0: i32) -> (i32, i32, i32, i32) {
    %c0_i32 = arith.constant 0 : i32
    %c0_i32_0 = arith.constant 0 : i32
    %c0_i32_1 = arith.constant 0 : i32
    %c0_i32_2 = arith.constant 0 : i32
    return %arg0, %c0_i32, %c0_i32_0, %c0_i32_1 : i32, i32, i32, i32
  }
  func.func @transform_3(%arg0: i32) -> (i32, i32) {
    %c0_i32 = arith.constant 0 : i32
    %c0_i32_0 = arith.constant 0 : i32
    %c0_i32_1 = arith.constant 0 : i32
    return %c0_i32, %c0_i32_0 : i32, i32
  }
  func.func @transform_4(%arg0: i32) -> (i32, i32) {
    %c0_i32 = arith.constant 0 : i32
    %c0_i32_0 = arith.constant 0 : i32
    %c0_i32_1 = arith.constant 0 : i32
    return %c0_i32, %c0_i32_0 : i32, i32
  }
  func.func @transform_5(%arg0: i32) -> (i32, i32) {
    %c0_i32 = arith.constant 0 : i32
    %c0_i32_0 = arith.constant 0 : i32
    %c0_i32_1 = arith.constant 0 : i32
    return %c0_i32, %c0_i32_0 : i32, i32
  }
  func.func @transform_6(%arg0: i32) -> (i32, i32) {
    %c0_i32 = arith.constant 0 : i32
    %c0_i32_0 = arith.constant 0 : i32
    %c0_i32_1 = arith.constant 0 : i32
    return %c0_i32, %c0_i32_0 : i32, i32
  }
  func.func @transform_7(%arg0: i32) -> (i32, i32) {
    %c0_i32 = arith.constant 0 : i32
    %c0_i32_0 = arith.constant 0 : i32
    %c0_i32_1 = arith.constant 0 : i32
    return %c0_i32, %c0_i32_0 : i32, i32
  }
  func.func @transform_8(%arg0: i32) -> (i32, i32) {
    %c0_i32 = arith.constant 0 : i32
    %c0_i32_0 = arith.constant 0 : i32
    %c0_i32_1 = arith.constant 0 : i32
    return %c0_i32, %c0_i32_0 : i32, i32
  }
  func.func @transform_9(%arg0: i32) -> (i32, i32) {
    %c0_i32 = arith.constant 0 : i32
    %c0_i32_0 = arith.constant 0 : i32
    %c0_i32_1 = arith.constant 0 : i32
    return %c0_i32, %c0_i32_0 : i32, i32
  }
  func.func @transform_10(%arg0: i32) -> (i32, i32) {
    %c0_i32 = arith.constant 0 : i32
    %c0_i32_0 = arith.constant 0 : i32
    %c0_i32_1 = arith.constant 0 : i32
    return %c0_i32, %c0_i32_0 : i32, i32
  }
  func.func @transform_11(%arg0: i32) -> (i32, i32) {
    %c0_i32 = arith.constant 0 : i32
    %c0_i32_0 = arith.constant 0 : i32
    %c0_i32_1 = arith.constant 0 : i32
    return %c0_i32, %c0_i32_0 : i32, i32
  }
  func.func @transform_12(%arg0: i32) -> (i32, i32) {
    %c0_i32 = arith.constant 0 : i32
    %c0_i32_0 = arith.constant 0 : i32
    %c0_i32_1 = arith.constant 0 : i32
    return %c0_i32, %c0_i32_0 : i32, i32
  }
  func.func @transform_13(%arg0: i32) -> (i32, i32) {
    %c0_i32 = arith.constant 0 : i32
    %c0_i32_0 = arith.constant 0 : i32
    %c0_i32_1 = arith.constant 0 : i32
    return %c0_i32, %c0_i32_0 : i32, i32
  }
  func.func @transform_14(%arg0: i32) -> (i32, i32) {
    %c0_i32 = arith.constant 0 : i32
    %c0_i32_0 = arith.constant 0 : i32
    %c0_i32_1 = arith.constant 0 : i32
    return %c0_i32, %c0_i32_0 : i32, i32
  }
  func.func @transform_15(%arg0: i32) -> (i32, i32) {
    %c0_i32 = arith.constant 0 : i32
    %c0_i32_0 = arith.constant 0 : i32
    %c0_i32_1 = arith.constant 0 : i32
    return %c0_i32, %c0_i32_0 : i32, i32
  }
  func.func @transform_16(%arg0: i32) -> (i32, i32) {
    %c0_i32 = arith.constant 0 : i32
    %c0_i32_0 = arith.constant 0 : i32
    %c0_i32_1 = arith.constant 0 : i32
    return %c0_i32, %c0_i32_0 : i32, i32
  }
  func.func @transform_17(%arg0: i32) -> (i32, i32) {
    %c0_i32 = arith.constant 0 : i32
    %c0_i32_0 = arith.constant 0 : i32
    %c0_i32_1 = arith.constant 0 : i32
    return %c0_i32, %c0_i32_0 : i32, i32
  }
  func.func @transform_18(%arg0: i32) -> (i32, i32) {
    %c0_i32 = arith.constant 0 : i32
    %c0_i32_0 = arith.constant 0 : i32
    %c0_i32_1 = arith.constant 0 : i32
    return %c0_i32, %c0_i32_0 : i32, i32
  }
  func.func @transform_19(%arg0: i32) -> (i32, i32) {
    %c0_i32 = arith.constant 0 : i32
    %c0_i32_0 = arith.constant 0 : i32
    %c0_i32_1 = arith.constant 0 : i32
    return %c0_i32, %c0_i32_0 : i32, i32
  }
  func.func @transform_20(%arg0: i32) -> (i32, i32) {
    %c0_i32 = arith.constant 0 : i32
    %c0_i32_0 = arith.constant 0 : i32
    %c0_i32_1 = arith.constant 0 : i32
    return %c0_i32, %c0_i32_0 : i32, i32
  }
  func.func @transform_21(%arg0: i32) -> (i32, i32) {
    %c0_i32 = arith.constant 0 : i32
    %c0_i32_0 = arith.constant 0 : i32
    %c0_i32_1 = arith.constant 0 : i32
    return %c0_i32, %c0_i32_0 : i32, i32
  }
  func.func @transform_22(%arg0: i32) -> (i32, i32) {
    %c0_i32 = arith.constant 0 : i32
    %c0_i32_0 = arith.constant 0 : i32
    %c0_i32_1 = arith.constant 0 : i32
    return %c0_i32, %c0_i32_0 : i32, i32
  }
  func.func @transform_23(%arg0: i32) -> (i32, i32) {
    %c0_i32 = arith.constant 0 : i32
    %c0_i32_0 = arith.constant 0 : i32
    %c0_i32_1 = arith.constant 0 : i32
    return %c0_i32, %c0_i32_0 : i32, i32
  }
  func.func @transform_24(%arg0: i32) -> (i32, i32) {
    %c0_i32 = arith.constant 0 : i32
    %c0_i32_0 = arith.constant 0 : i32
    %c0_i32_1 = arith.constant 0 : i32
    return %c0_i32, %c0_i32_0 : i32, i32
  }
  func.func @transform_25(%arg0: i32) -> (i32, i32) {
    %c0_i32 = arith.constant 0 : i32
    %c0_i32_0 = arith.constant 0 : i32
    %c0_i32_1 = arith.constant 0 : i32
    return %c0_i32, %c0_i32_0 : i32, i32
  }
  func.func @transform_26(%arg0: i32) -> (i32, i32) {
    %c0_i32 = arith.constant 0 : i32
    %c0_i32_0 = arith.constant 0 : i32
    %c0_i32_1 = arith.constant 0 : i32
    return %c0_i32, %c0_i32_0 : i32, i32
  }
  func.func @transform_27(%arg0: i32) -> (i32, i32) {
    %c0_i32 = arith.constant 0 : i32
    %c0_i32_0 = arith.constant 0 : i32
    %c0_i32_1 = arith.constant 0 : i32
    return %c0_i32, %c0_i32_0 : i32, i32
  }
  func.func @transform_28(%arg0: i32) -> (i32, i32) {
    %c0_i32 = arith.constant 0 : i32
    %c0_i32_0 = arith.constant 0 : i32
    %c0_i32_1 = arith.constant 0 : i32
    return %c0_i32, %c0_i32_0 : i32, i32
  }
  func.func @transform_29(%arg0: i32) -> (i32, i32) {
    %c0_i32 = arith.constant 0 : i32
    %c0_i32_0 = arith.constant 0 : i32
    %c0_i32_1 = arith.constant 0 : i32
    return %c0_i32, %c0_i32_0 : i32, i32
  }
  func.func @transform_30(%arg0: i32) -> (i32, i32) {
    %c0_i32 = arith.constant 0 : i32
    %c0_i32_0 = arith.constant 0 : i32
    %c0_i32_1 = arith.constant 0 : i32
    return %c0_i32, %c0_i32_0 : i32, i32
  }
  func.func @transform_31(%arg0: i32) -> (i32, i32) {
    %c0_i32 = arith.constant 0 : i32
    %c0_i32_0 = arith.constant 0 : i32
    %c0_i32_1 = arith.constant 0 : i32
    return %c0_i32, %c0_i32_0 : i32, i32
  }
  func.func @transform_32(%arg0: i32) -> (i32, i32, i32) {
    %c0_i32 = arith.constant 0 : i32
    %c0_i32_0 = arith.constant 0 : i32
    %c0_i32_1 = arith.constant 0 : i32
    return %arg0, %c0_i32, %c0_i32_0 : i32, i32, i32
  }
}

</mosaic_0001>

<bundles_post_ra>
// kernel: tpu_custom_call.1
= control target key start
LH: loop header
LB: loop body
LE: loop exit
PB: predicated region body
PF: predicated region fallthrough
CT: control target
= control target key end

     0   :  { %s4151_s6 = smov 1   ;;  %s4152_s10 = smov 2   ;;  %s4989_s0 = inlined_call_operand.smem [shape: u32[33], index: -1, kind: input, shape index: {}] }
   0x1   :  { %s4220_s5 = sld [smem:[%s4989_s0]]   ;;  %s4153_s14 = smov 3  }
   0x2   :  { %s4225_s9 = sld [smem:[%s4989_s0 + %s4151_s6]]   ;;  %s4154_s18 = smov 4  }
   0x3   :  { %s4230_s13 = sld [smem:[%s4989_s0 + %s4152_s10]]   ;;  %s4155_s22 = smov 5  }
   0x4   :  { %s4235_s17 = sld [smem:[%s4989_s0 + %s4153_s14]]   ;;  %s4156_s26 = smov 6  }
   0x5   :  { %s4240_s21 = sld [smem:[%s4989_s0 + %s4154_s18]]   ;;  %s4157_s30 = smov 7  }
   0x6   :  { %s4245_s25 = sld [smem:[%s4989_s0 + %s4155_s22]]   ;;  %s4158_s4 = smov 8  }
   0x7   :  { %5017 = sst [smem:[#allocation50_spill]] %s4220_s5  ;;  %s4159_s10 = smov 9  }
   0x8   :  { %5018 = sst [smem:[#allocation51_spill]] %s4225_s9  ;;  %s4160_s15 = smov 10  }
   0x9   :  { %5019 = sst [smem:[#allocation52_spill]] %s4230_s13  ;;  %s4161_s20 = smov 11  }
   0xa   :  { %s4250_s29 = sld [smem:[%s4989_s0 + %s4156_s26]]   ;;  %s4162_s26 = smov 12  }
   0xb   :  { %s4255_s3 = sld [smem:[%s4989_s0 + %s4157_s30]]   ;;  %s4163_s1 = smov 13  }
   0xc   :  { %s4260_s8 = sld [smem:[%s4989_s0 + %s4158_s4]]   ;;  %s4164_s7 = smov 14  }
   0xd   :  { %s4265_s14 = sld [smem:[%s4989_s0 + %s4159_s10]]   ;;  %s4166_s22 = smov 16  }
   0xe   :  { %s4270_s19 = sld [smem:[%s4989_s0 + %s4160_s15]]   ;;  %s4165_s15 = smov 15  }
   0xf   :  { %s4275_s24 = sld [smem:[%s4989_s0 + %s4161_s20]]   ;;  %s4167_s28 = smov 17  }
  0x10   :  { %s4280_s30 = sld [smem:[%s4989_s0 + %s4162_s26]]   ;;  %s4182_s23 = smov 32  }
  0x11   :  { %5020 = sst [smem:[#allocation53_spill]] %s4255_s3 }
  0x12   :  { %5021 = sst [smem:[#allocation54_spill]] %s4260_s8 }
  0x13   :  { %s4285_s6 = sld [smem:[%s4989_s0 + %s4163_s1]]  }
  0x14   :  { %5022 = sst [smem:[#allocation55_spill]] %s4270_s19 }
  0x15   :  { %s4290_s12 = sld [smem:[%s4989_s0 + %s4164_s7]]   ;;  %s4168_s7 = smov 18  }
  0x16   :  { %5023 = sst [smem:[#allocation56_spill]] %s4280_s30 }
  0x17   :  { %s4295_s20 = sld [smem:[%s4989_s0 + %s4165_s15]]   ;;  %s4169_s15 = smov 19  }
  0x18   :  { %s4300_s27 = sld [smem:[%s4989_s0 + %s4166_s22]]   ;;  %s4170_s22 = smov 20  }
  0x19   :  { %5024 = sst [smem:[#allocation57_spill]] %s4285_s6 }
  0x1a   :  { %s4305_s4 = sld [smem:[%s4989_s0 + %s4167_s28]]   ;;  %s4171_s28 = smov 21  }
  0x1b   :  { %5025 = sst [smem:[#allocation58_spill]] %s4290_s12 }
  0x1c   :  { %s4310_s12 = sld [smem:[%s4989_s0 + %s4168_s7]]   ;;  %s4172_s7 = smov 22  }
  0x1d   :  { %5026 = sst [smem:[#allocation59_spill]] %s4295_s20 }
  0x1e   :  { %5027 = sst [smem:[#allocation60_spill]] %s4300_s27 }
  0x1f   :  { %s4315_s13 = sld [smem:[%s4989_s0 + %s4169_s15]]   ;;  %s4173_s15 = smov 23  }
  0x20   :  { %5028 = sst [smem:[#allocation61_spill]] %s4305_s4 }
  0x21   :  { %s4320_s27 = sld [smem:[%s4989_s0 + %s4170_s22]]   ;;  %s4174_s22 = smov 24  }
  0x22   :  { %5029 = sst [smem:[#allocation62_spill]] %s4310_s12 }
  0x23   :  { %s4325_s5 = sld [smem:[%s4989_s0 + %s4171_s28]]   ;;  %s4175_s28 = smov 25  }
  0x24   :  { %s4330_s12 = sld [smem:[%s4989_s0 + %s4172_s7]]   ;;  %s4176_s7 = smov 26  }
  0x25   :  { %5030 = sst [smem:[#allocation63_spill]] %s4315_s13 }
  0x26   :  { %s4335_s9 = sld [smem:[%s4989_s0 + %s4173_s15]]   ;;  %s4177_s15 = smov 27  }
  0x27   :  { %s4340_s13 = sld [smem:[%s4989_s0 + %s4174_s22]]   ;;  %s4178_s22 = smov 28  }
  0x28   :  { %s4355_s20 = sld [smem:[%s4989_s0 + %s4177_s15]]   ;;  %s4181_s15 = smov 31  }
  0x29   :  { %5031 = sst [smem:[#allocation64_spill]] %s4325_s5 }
  0x2a   :  { %5032 = sst [smem:[#allocation65_spill]] %s4330_s12 }
  0x2b   :  { %s4345_s5 = sld [smem:[%s4989_s0 + %s4175_s28]]   ;;  %s4179_s28 = smov 29  }
  0x2c   :  { %5033 = sst [smem:[#allocation66_spill]] %s4335_s9 }
  0x2d   :  { %5034 = sst [smem:[#allocation67_spill]] %s4340_s13 }
  0x2e   :  { %s4350_s12 = sld [smem:[%s4989_s0 + %s4176_s7]]   ;;  %s4180_s7 = smov 30  }
  0x2f   :  { %s4360_s13 = sld [smem:[%s4989_s0 + %s4178_s22]]  }
  0x30   :  { %s4365_s30 = sld [smem:[%s4989_s0 + %s4179_s28]]  }
  0x31   :  { %5035 = sst [smem:[#allocation68_spill]] %s4345_s5 }
  0x32   :  { %s2998_s19 = sld [smem:[%s4989_s0 + %s4181_s15]]  }
  0x34   :  { %5036 = sst [smem:[#allocation69_spill]] %s4350_s12 }
  0x35   :  { %5037 = sst [smem:[#allocation70_spill]] %s4360_s13 }
  0x36   :  { %s4370_s12 = sld [smem:[%s4989_s0 + %s4180_s7]]  }
  0x37   :  { %s4378_s13 = sld [smem:[%s4989_s0 + %s4182_s23]]  }
  0x38   :  { %v70_v0 = vstv %s2998_s19 }
  0x39   :  { %71 = vst [vmem:[#allocation2] sm:$0x1] %v70_v0 }
  0x3c   :  { %5038 = sst [smem:[#allocation71_spill]] %s4370_s12 }
  0x3d   :  { %5039 = sst [smem:[#allocation72_spill]] %s4378_s13 }
  0x3e   :  { %72 = vsyncpa [#allocation4], 0 }
  0x3f   :  { %74 = vsyncpa [#allocation4 + $0x1], 0 }
  0x40   :  { %75 = vsyncpa [#allocation6], 0 }
  0x41   :  { %76 = vsyncpa [#allocation9], 0 }
  0x42   :  { %77 = vsyncpa [#allocation12], 0 }
  0x43   :  { %78 = vsyncpa [#allocation15], 0 }
  0x44   :  { %79 = vsyncpa [#allocation18], 0 }
  0x45   :  { %80 = vsyncpa [#allocation21], 0 }
  0x46   :  { %81 = vsyncpa [#allocation24], 0 }
  0x47   :  { %82 = vsyncpa [#allocation27], 0 }
  0x48   :  { %83 = vsyncpa [#allocation30], 0 }
  0x49   :  { %84 = vsyncpa [#allocation33], 0 }
  0x4a   :  { %85 = vsyncpa [#allocation36], 0  ;;  %s4380_s28 = smov 0   ;;  %s4382_s1 = smov 0  }
  0x4b   :  { %s4384_s0 = smov 0   ;;  %s4386_s19 = smov 0  }
  0x4c LB: > { %s5040_s9 = sld [smem:[#allocation66_spill]]  ;;  %s4399_s2 = sadd.s32 4294967295, %s4149_s19   ;;  %s4141_s1 = sphi %s4382_s1, %s5079_s1   ;;  %s4137_s28 = sphi %s4380_s28, %s5078_s28   ;;  %s4149_s19 = sphi %s4386_s19, %s5076_s19   ;;  %s4145_s0 = sphi %s4384_s0, %s5080_s0  }
  0x4d   : > { %s5041_s8 = sld [smem:[#allocation54_spill]]  ;;  %s4402_s7 = sadd.s32 1, %s4149_s19  }
  0x4e   : > { %s5042_s6 = sld [smem:[#allocation57_spill]]  ;;  %s121_s10 = ssub.s32 %s4149_s19, %s4402_s7 }
  0x4f   : > { %s5043_s5 = sld [smem:[#allocation68_spill]]  ;;  %s124_s11 = sadd.s32 1, %s4145_s0 }
  0x50   : > { %s5044_s4 = sld [smem:[#allocation61_spill]]  ;;  %p122_p0 = scmp.eq.s32.totalorder %s121_s10, 0 }
  0x51   : > { %s5045_s3 = sld [smem:[#allocation53_spill]]  ;;  %p131_p1 = scmp.ne.s32.totalorder %s4145_s0, %s4141_s1 }
  0x52   : > { %5046 = sst [smem:[#allocation73_spill]] %s4402_s7  ;;  %p132_p2 = scmp.eq.s32.totalorder %s4149_s19, 0 }
  0x53   : > { %p137_p3 = scmp.ne.s32.totalorder %s4141_s1, %s4137_s28  ;;  %p138_p5 = scmp.eq.s32.totalorder %s4399_s2, 0 }
  0x54   : > { %s4412_s15 = scalar_select %p122_p0, %s4145_s0, %s124_s11  }
  0x55   : > { %p4414_p4 = por %p132_p2, %p131_p1  ;;  %p3002_p6 = scmp.ge.s32.totalorder %s4149_s19, 1 }
  0x56   : > { %5047 = sst [smem:[#allocation74_spill]] %s4412_s15  ;;  %p809_p7 = scmp.lt.s32.totalorder %s4149_s19, 3 }
  0x57   : > { %p4423_p8 = por %p138_p5, %p137_p3 }
  0x58   : > { %p4427_p9 = pnand %p3002_p6, %p809_p7 }
  0x59   : > { %s5049_s18 = scalar_select %p4423_p8, 1, 0 }
  0x5a   : > { %813 = sbr.rel (%p4427_p9) target bundleno = 378 (0x17a), region = 12  ;;  %s821_s22 = sshll.u32 (!%p4427_p9), %s4235_s17, 4  ;;  %s822_s22 = int_to_ptr.hbm [resolvable:$true] %s821_s22 }
  0x5b   : > { %5050 = sst [smem:[#allocation75_spill]] %s5049_s18  ;;  %s4183_s26 = smov (!%p4427_p9), [#allocation5]  }
  0x5c   : > { %s823_s28 = sshll.u32 (!%p4427_p9), %s4183_s26, 4  ;;  %s845_s10 = sshll.u32 (!%p4427_p9), %s4245_s25, 4  ;;  %s824_s28 = int_to_ptr.vmem [resolvable:$true] %s823_s28  ;;  %s4435_s10 = int_to_ptr.hbm [resolvable:$true] %s845_s10 }
  0x5d   : > { %s3425_s11 = sshra.s32 (!%p4427_p9), %s822_s22, 4  ;;  %s3431_s7 = scalar_lea.hbm (!%p4427_p9), %s4235_s17, 8  ;;  %s3426_s11 = int_to_ptr.hbm [resolvable:$true] %s3425_s11 }
  0x5e   : > { %s3427_s15 = scalar_lea.hbm (!%p4427_p9), %s3426_s11, 8  ;;  %p3432_p13 = scmp.lt.s32.totalorder (!%p4427_p9), %s3426_s11, %s4235_s17 }
  0x5f   : > { %p3428_p10 = scmp.ne.s32.totalorder %s3426_s11, %s3427_s15  ;;  %p3433_p0 = scmp.lt.s32.totalorder %s3431_s7, %s3427_s15 }
  0x61   : > { %p3429_p11 = pnand %p3428_p10, %p138_p5  ;;  %p3434_p1 = por %p3433_p0, %p3432_p13 }
  0x63   : > { %p3430_p12 = pneg %p3429_p11 }
  0x65   : > { %p3435_p2 = pnand %p3434_p1, %p3430_p12 }
  0x67   : > { %3438 = shalt.err (!%p3435_p2)
}
  0x68   : > { %3131 = dma.hbm_to_vmem [thread:$0]  (%p138_p5), %s822_s22, 128, %s824_s28, [#allocation6]  }
  0x69   : > { %s869_s26 = sshll.u32 %s5045_s3, 4  ;;  %s4184_s13 = smov [#allocation8]   ;;  %s4444_s26 = int_to_ptr.hbm [resolvable:$true] %s869_s26 }
  0x6a   : > { %s847_s12 = sshll.u32 %s4184_s13, 4  ;;  %s3453_s18 = sshra.s32 %s4435_s10, 4  ;;  %s848_s12 = int_to_ptr.vmem [resolvable:$true] %s847_s12  ;;  %s3454_s18 = int_to_ptr.hbm [resolvable:$true] %s3453_s18 }
  0x6b   : > { %s3455_s7 = scalar_lea.hbm %s3454_s18, 8  ;;  %s3459_s15 = scalar_lea.hbm %s4245_s25, 8 }
  0x6c   : > { %p3456_p3 = scmp.ne.s32.totalorder %s3454_s18, %s3455_s7  ;;  %p3460_p10 = scmp.lt.s32.totalorder %s3454_s18, %s4245_s25 }
  0x6d   : > { %p3461_p11 = scmp.lt.s32.totalorder %s3459_s15, %s3455_s7 }
  0x6e   : > { %p3457_p6 = pnand %p3456_p3, %p138_p5 }
  0x6f   : > { %p3462_p12 = por %p3461_p11, %p3460_p10 }
  0x70   : > { %p3458_p7 = pneg %p3457_p6 }
  0x72   : > { %p3463_p13 = pnand %p3462_p12, %p3458_p7 }
  0x74   : > { %3466 = shalt.err (!%p3463_p13)
}
  0x75   : > { %3135 = dma.hbm_to_vmem [thread:$0]  (%p138_p5), %s4435_s10, 128, %s848_s12, [#allocation9]  }
  0x76   : > { %s4185_s13 = smov [#allocation11]   ;;  %s893_s28 = sshll.u32 %s4265_s14, 4  ;;  %s4455_s28 = int_to_ptr.hbm [resolvable:$true] %s893_s28 }
  0x77   : > { %s871_s22 = sshll.u32 %s4185_s13, 4  ;;  %s3481_s18 = sshra.s32 %s4444_s26, 4  ;;  %s872_s22 = int_to_ptr.vmem [resolvable:$true] %s871_s22  ;;  %s3482_s18 = int_to_ptr.hbm [resolvable:$true] %s3481_s18 }
  0x78   : > { %s3483_s11 = scalar_lea.hbm %s3482_s18, 8  ;;  %s3487_s7 = scalar_lea.hbm %s5045_s3, 8 }
  0x79   : > { %p3484_p0 = scmp.ne.s32.totalorder %s3482_s18, %s3483_s11  ;;  %p3488_p3 = scmp.lt.s32.totalorder %s3482_s18, %s5045_s3 }
  0x7a   : > { %p3489_p6 = scmp.lt.s32.totalorder %s3487_s7, %s3483_s11 }
  0x7b   : > { %p3485_p1 = pnand %p3484_p0, %p138_p5 }
  0x7c   : > { %p3490_p7 = por %p3489_p6, %p3488_p3 }
  0x7d   : > { %p3486_p2 = pneg %p3485_p1 }
  0x7f   : > { %p3491_p10 = pnand %p3490_p7, %p3486_p2 }
  0x81   : > { %3494 = shalt.err (!%p3491_p10)
}
  0x82   : > { %3139 = dma.hbm_to_vmem [thread:$0]  (%p138_p5), %s4444_s26, 128, %s872_s22, [#allocation12]  }
  0x83   : > { %s917_s12 = sshll.u32 %s4275_s24, 4  ;;  %s4186_s10 = smov [#allocation14]   ;;  %s4466_s12 = int_to_ptr.hbm [resolvable:$true] %s917_s12 }
  0x84   : > { %s895_s15 = sshll.u32 %s4186_s10, 4  ;;  %s3509_s13 = sshra.s32 %s4455_s28, 4  ;;  %s896_s15 = int_to_ptr.vmem [resolvable:$true] %s895_s15  ;;  %s3510_s13 = int_to_ptr.hbm [resolvable:$true] %s3509_s13 }
  0x85   : > { %s3511_s18 = scalar_lea.hbm %s3510_s13, 8  ;;  %s3515_s11 = scalar_lea.hbm %s4265_s14, 8 }
  0x86   : > { %p3512_p11 = scmp.ne.s32.totalorder %s3510_s13, %s3511_s18  ;;  %p3516_p0 = scmp.lt.s32.totalorder %s3510_s13, %s4265_s14 }
  0x87   : > { %p3517_p1 = scmp.lt.s32.totalorder %s3515_s11, %s3511_s18 }
  0x88   : > { %p3513_p12 = pnand %p3512_p11, %p138_p5 }
  0x89   : > { %p3518_p2 = por %p3517_p1, %p3516_p0 }
  0x8a   : > { %p3514_p13 = pneg %p3513_p12 }
  0x8c   : > { %p3519_p3 = pnand %p3518_p2, %p3514_p13 }
  0x8e   : > { %3522 = shalt.err (!%p3519_p3)
}
  0x8f   : > { %3143 = dma.hbm_to_vmem [thread:$0]  (%p138_p5), %s4455_s28, 128, %s896_s15, [#allocation15]  }
  0x90   : > { %s4187_s26 = smov [#allocation17]   ;;  %s941_s7 = sshll.u32 %s5042_s6, 4  ;;  %s4477_s7 = int_to_ptr.hbm [resolvable:$true] %s941_s7 }
  0x91   : > { %s919_s22 = sshll.u32 %s4187_s26, 4  ;;  %s3537_s10 = sshra.s32 %s4466_s12, 4  ;;  %s920_s22 = int_to_ptr.vmem [resolvable:$true] %s919_s22  ;;  %s3538_s10 = int_to_ptr.hbm [resolvable:$true] %s3537_s10 }
  0x92   : > { %s3539_s13 = scalar_lea.hbm %s3538_s10, 1  ;;  %s3543_s18 = scalar_lea.hbm %s4275_s24, 1 }
  0x93   : > { %p3540_p6 = scmp.ne.s32.totalorder %s3538_s10, %s3539_s13  ;;  %p3544_p11 = scmp.lt.s32.totalorder %s3538_s10, %s4275_s24 }
  0x94   : > { %p3545_p12 = scmp.lt.s32.totalorder %s3543_s18, %s3539_s13 }
  0x95   : > { %p3541_p7 = pnand %p3540_p6, %p138_p5 }
  0x96   : > { %p3546_p13 = por %p3545_p12, %p3544_p11 }
  0x97   : > { %p3542_p10 = pneg %p3541_p7 }
  0x99   : > { %p3547_p0 = pnand %p3546_p13, %p3542_p10 }
  0x9b   : > { %3550 = shalt.err (!%p3547_p0)
}
  0x9c   : > { %3147 = dma.hbm_to_vmem [thread:$0]  (%p138_p5), %s4466_s12, 16, %s920_s22, [#allocation18]  }
  0x9d   : > { %s971_s28 = sshll.u32 %s5044_s4, 4  ;;  %s4188_s15 = smov [#allocation20]   ;;  %s4488_s28 = int_to_ptr.hbm [resolvable:$true] %s971_s28 }
  0x9e   : > { %s943_s11 = sshll.u32 %s4188_s15, 4  ;;  %s3565_s26 = sshra.s32 %s4477_s7, 4  ;;  %s944_s11 = int_to_ptr.vmem [resolvable:$true] %s943_s11  ;;  %s3566_s26 = int_to_ptr.hbm [resolvable:$true] %s3565_s26 }
  0x9f   : > { %s3567_s10 = scalar_lea.hbm %s3566_s26, 1  ;;  %s3571_s13 = scalar_lea.hbm %s5042_s6, 1 }
  0xa0   : > { %p3568_p1 = scmp.ne.s32.totalorder %s3566_s26, %s3567_s10  ;;  %p3572_p6 = scmp.lt.s32.totalorder %s3566_s26, %s5042_s6 }
  0xa1   : > { %p3573_p7 = scmp.lt.s32.totalorder %s3571_s13, %s3567_s10 }
  0xa2   : > { %p3569_p2 = pnand %p3568_p1, %p138_p5 }
  0xa3   : > { %p3574_p10 = por %p3573_p7, %p3572_p6 }
  0xa4   : > { %p3570_p3 = pneg %p3569_p2 }
  0xa6   : > { %p3575_p11 = pnand %p3574_p10, %p3570_p3 }
  0xa8   : > { %3578 = shalt.err (!%p3575_p11)
}
  0xa9   : > { %3151 = dma.hbm_to_vmem [thread:$0]  (%p138_p5), %s4477_s7, 16, %s944_s11, [#allocation21]  }
  0xaa   : > { %s4189_s12 = smov [#allocation23]   ;;  %s998_s18 = sshll.u32 %s4320_s27, 4  ;;  %s4499_s18 = int_to_ptr.hbm [resolvable:$true] %s998_s18 }
  0xab   : > { %s973_s22 = sshll.u32 %s4189_s12, 4  ;;  %s3593_s15 = sshra.s32 %s4488_s28, 4  ;;  %s974_s22 = int_to_ptr.vmem [resolvable:$true] %s973_s22  ;;  %s3594_s15 = int_to_ptr.hbm [resolvable:$true] %s3593_s15 }
  0xac   : > { %s3595_s26 = scalar_lea.hbm %s3594_s15, 1  ;;  %s3599_s10 = scalar_lea.hbm %s5044_s4, 1 }
  0xad   : > { %p3596_p12 = scmp.ne.s32.totalorder %s3594_s15, %s3595_s26  ;;  %p3600_p1 = scmp.lt.s32.totalorder %s3594_s15, %s5044_s4 }
  0xae   : > { %p3601_p2 = scmp.lt.s32.totalorder %s3599_s10, %s3595_s26 }
  0xaf   : > { %p3597_p13 = pnand %p3596_p12, %p138_p5 }
  0xb0   : > { %p3602_p3 = por %p3601_p2, %p3600_p1 }
  0xb1   : > { %p3598_p0 = pneg %p3597_p13 }
  0xb3   : > { %p3603_p6 = pnand %p3602_p3, %p3598_p0 }
  0xb5   : > { %3606 = shalt.err (!%p3603_p6)
}
  0xb6   : > { %3155 = dma.hbm_to_vmem [thread:$0]  (%p138_p5), %s4488_s28, 16, %s974_s22, [#allocation24]  }
  0xb7   : > { %s1024_s7 = sshll.u32 %s5040_s9, 4  ;;  %s4190_s11 = smov [#allocation26]   ;;  %s4510_s7 = int_to_ptr.hbm [resolvable:$true] %s1024_s7 }
  0xb8   : > { %s1000_s13 = sshll.u32 %s4190_s11, 4  ;;  %s3621_s12 = sshra.s32 %s4499_s18, 4  ;;  %s1001_s13 = int_to_ptr.vmem [resolvable:$true] %s1000_s13  ;;  %s3622_s12 = int_to_ptr.hbm [resolvable:$true] %s3621_s12 }
  0xb9   : > { %s3623_s15 = scalar_lea.hbm %s3622_s12, 1  ;;  %s3627_s26 = scalar_lea.hbm %s4320_s27, 1 }
  0xba   : > { %p3624_p7 = scmp.ne.s32.totalorder %s3622_s12, %s3623_s15  ;;  %p3628_p12 = scmp.lt.s32.totalorder %s3622_s12, %s4320_s27 }
  0xbb   : > { %p3629_p13 = scmp.lt.s32.totalorder %s3627_s26, %s3623_s15 }
  0xbc   : > { %p3625_p10 = pnand %p3624_p7, %p138_p5 }
  0xbd   : > { %p3630_p0 = por %p3629_p13, %p3628_p12 }
  0xbe   : > { %p3626_p11 = pneg %p3625_p10 }
  0xc0   : > { %p3631_p1 = pnand %p3630_p0, %p3626_p11 }
  0xc2   : > { %3634 = shalt.err (!%p3631_p1)
}
  0xc3   : > { %3159 = dma.hbm_to_vmem [thread:$0]  (%p138_p5), %s4499_s18, 16, %s1001_s13, [#allocation27]  }
  0xc4   : > { %s4191_s28 = smov [#allocation29]   ;;  %s3649_s10 = sshra.s32 %s4510_s7, 4  ;;  %s3650_s10 = int_to_ptr.hbm [resolvable:$true] %s3649_s10 }
  0xc5   : > { %s1026_s22 = sshll.u32 %s4191_s28, 4  ;;  %s3651_s11 = scalar_lea.hbm %s3650_s10, 32  ;;  %s1027_s22 = int_to_ptr.vmem [resolvable:$true] %s1026_s22 }
  0xc6   : > { %p3652_p2 = scmp.ne.s32.totalorder %s3650_s10, %s3651_s11  ;;  %s3655_s12 = scalar_lea.hbm %s5040_s9, 32 }
  0xc7   : > { %p3656_p7 = scmp.lt.s32.totalorder %s3650_s10, %s5040_s9  ;;  %p3657_p10 = scmp.lt.s32.totalorder %s3655_s12, %s3651_s11 }
  0xc8   : > { %p3653_p3 = pnand %p3652_p2, %p138_p5 }
  0xc9   : > { %p3658_p11 = por %p3657_p10, %p3656_p7 }
  0xca   : > { %p3654_p6 = pneg %p3653_p3 }
  0xcc   : > { %p3659_p12 = pnand %p3658_p11, %p3654_p6 }
  0xce   : > { %3662 = shalt.err (!%p3659_p12)
}
  0xcf   : > { %s4192_s15 = smov 128   ;;  %s4193_s18 = smov 8  }
  0xd0   : > { %3163 = dma.hbm_to_vmem [thread:$0]  (%p138_p5), %s4510_s7, 512, %s1027_s22, [#allocation30], %s4192_s15, %s4192_s15, %s4193_s18  }
  0xd1   : > { %s1050_s13 = sshll.u32 %s5043_s5, 4  ;;  %s4194_s26 = smov [#allocation32]   ;;  %s1051_s13 = int_to_ptr.hbm [resolvable:$true] %s1050_s13 }
  0xd2   : > { %s1052_s28 = sshll.u32 %s4194_s26, 4  ;;  %s1077_s10 = sshll.u32 %s4355_s20, 4  ;;  %s1053_s28 = int_to_ptr.vmem [resolvable:$true] %s1052_s28  ;;  %s1078_s10 = int_to_ptr.hbm [resolvable:$true] %s1077_s10 }
  0xd3   : > { %s3677_s11 = sshra.s32 %s1051_s13, 4  ;;  %s3683_s3 = scalar_lea.hbm %s5043_s5, 32  ;;  %s3678_s11 = int_to_ptr.hbm [resolvable:$true] %s3677_s11 }
  0xd4   : > { %s3679_s12 = scalar_lea.hbm %s3678_s11, 32  ;;  %p3684_p2 = scmp.lt.s32.totalorder %s3678_s11, %s5043_s5 }
  0xd5   : > { %p3680_p13 = scmp.ne.s32.totalorder %s3678_s11, %s3679_s12  ;;  %p3685_p3 = scmp.lt.s32.totalorder %s3683_s3, %s3679_s12 }
  0xd7   : > { %p3681_p0 = pnand %p3680_p13, %p138_p5  ;;  %p3686_p6 = por %p3685_p3, %p3684_p2 }
  0xd9   : > { %p3682_p1 = pneg %p3681_p0 }
  0xdb   : > { %p3687_p7 = pnand %p3686_p6, %p3682_p1 }
  0xdd   : > { %3690 = shalt.err (!%p3687_p7)
}
  0xde   : > { %3167 = dma.hbm_to_vmem [thread:$0]  (%p138_p5), %s1051_s13, 512, %s1053_s28, [#allocation33], %s4192_s15, %s4192_s15, %s4193_s18  }
  0xdf   : > { %s4195_s7 = smov [#allocation35]   ;;  %s833_s26 = sshll.u32 %s4240_s21, 4  ;;  %s4537_s26 = int_to_ptr.hbm [resolvable:$true] %s833_s26 }
  0xe0   : > { %s1079_s22 = sshll.u32 %s4195_s7, 4  ;;  %s3705_s4 = sshra.s32 %s1078_s10, 4  ;;  %s1080_s22 = int_to_ptr.vmem [resolvable:$true] %s1079_s22  ;;  %s3706_s4 = int_to_ptr.hbm [resolvable:$true] %s3705_s4 }
  0xe1   : > { %s3707_s3 = scalar_lea.hbm %s3706_s4, 1  ;;  %s3711_s11 = scalar_lea.hbm %s4355_s20, 1 }
  0xe2   : > { %p3708_p10 = scmp.ne.s32.totalorder %s3706_s4, %s3707_s3  ;;  %p3712_p13 = scmp.lt.s32.totalorder %s3706_s4, %s4355_s20 }
  0xe3   : > { %p3713_p0 = scmp.lt.s32.totalorder %s3711_s11, %s3707_s3 }
  0xe4   : > { %p3709_p11 = pnand %p3708_p10, %p138_p5 }
  0xe5   : > { %p3714_p1 = por %p3713_p0, %p3712_p13 }
  0xe6   : > { %p3710_p12 = pneg %p3709_p11 }
  0xe8   : > { %p3715_p2 = pnand %p3714_p1, %p3710_p12 }
  0xea   : > { %3718 = shalt.err (!%p3715_p2)
}
  0xeb   : > { %3171 = dma.hbm_to_vmem [thread:$0]  (%p138_p5), %s1078_s10, 16, %s1080_s22, [#allocation36]  }
  0xec   : > { %s857_s15 = sshll.u32 %s4250_s29, 4  ;;  %s4196_s18 = smov [#allocation7]   ;;  %s4546_s15 = int_to_ptr.hbm [resolvable:$true] %s857_s15 }
  0xed   : > { %s835_s13 = sshll.u32 %s4196_s18, 4  ;;  %s3733_s28 = sshra.s32 %s4537_s26, 4  ;;  %s836_s13 = int_to_ptr.vmem [resolvable:$true] %s835_s13  ;;  %s3734_s28 = int_to_ptr.hbm [resolvable:$true] %s3733_s28 }
  0xee   : > { %s3735_s4 = scalar_lea.hbm %s3734_s28, 1  ;;  %s3739_s12 = scalar_lea.hbm %s4240_s21, 1 }
  0xef   : > { %p3736_p3 = scmp.ne.s32.totalorder %s3734_s28, %s3735_s4  ;;  %p3740_p10 = scmp.lt.s32.totalorder %s3734_s28, %s4240_s21 }
  0xf0   : > { %p3741_p11 = scmp.lt.s32.totalorder %s3739_s12, %s3735_s4 }
  0xf1   : > { %p3737_p6 = pnand %p3736_p3, %p138_p5 }
  0xf2   : > { %p3742_p12 = por %p3741_p11, %p3740_p10 }
  0xf3   : > { %p3738_p7 = pneg %p3737_p6 }
  0xf5   : > { %p3743_p13 = pnand %p3742_p12, %p3738_p7 }
  0xf7   : > { %3746 = shalt.err (!%p3743_p13)
}
  0xf8   : > { %3133 = dma.hbm_to_vmem [thread:$0]  (%p138_p5), %s4537_s26, 16, %s836_s13, [#allocation6]  }
  0xf9   : > { %s4197_s10 = smov [#allocation10]   ;;  %s881_s22 = sshll.u32 %s5041_s8, 4  ;;  %s4557_s22 = int_to_ptr.hbm [resolvable:$true] %s881_s22 }
  0xfa   : > { %s859_s7 = sshll.u32 %s4197_s10, 4  ;;  %s3761_s3 = sshra.s32 %s4546_s15, 4  ;;  %s860_s7 = int_to_ptr.vmem [resolvable:$true] %s859_s7  ;;  %s3762_s3 = int_to_ptr.hbm [resolvable:$true] %s3761_s3 }
  0xfb   : > { %s3763_s11 = scalar_lea.hbm %s3762_s3, 1  ;;  %s3767_s18 = scalar_lea.hbm %s4250_s29, 1 }
  0xfc   : > { %p3764_p0 = scmp.ne.s32.totalorder %s3762_s3, %s3763_s11  ;;  %p3768_p3 = scmp.lt.s32.totalorder %s3762_s3, %s4250_s29 }
  0xfd   : > { %p3769_p6 = scmp.lt.s32.totalorder %s3767_s18, %s3763_s11 }
  0xfe   : > { %p3765_p1 = pnand %p3764_p0, %p138_p5 }
  0xff   : > { %p3770_p7 = por %p3769_p6, %p3768_p3 }
 0x100   : > { %p3766_p2 = pneg %p3765_p1 }
 0x102   : > { %p3771_p10 = pnand %p3770_p7, %p3766_p2 }
 0x104   : > { %3774 = shalt.err (!%p3771_p10)
}
 0x105   : > { %s5052_s26 = sld [smem:[#allocation55_spill]]  ;;  %s4198_s28 = smov [#allocation13]  }
 0x106   : > { %3137 = dma.hbm_to_vmem [thread:$0]  (%p138_p5), %s4546_s15, 16, %s860_s7, [#allocation9]  }
 0x107   : > { %s883_s4 = sshll.u32 %s4198_s28, 4  ;;  %s3789_s12 = sshra.s32 %s4557_s22, 4  ;;  %s884_s4 = int_to_ptr.vmem [resolvable:$true] %s883_s4  ;;  %s3790_s12 = int_to_ptr.hbm [resolvable:$true] %s3789_s12 }
 0x108   : > { %s3791_s10 = scalar_lea.hbm %s3790_s12, 1  ;;  %s3795_s3 = scalar_lea.hbm %s5041_s8, 1 }
 0x109   : > { %p3792_p11 = scmp.ne.s32.totalorder %s3790_s12, %s3791_s10  ;;  %p3796_p0 = scmp.lt.s32.totalorder %s3790_s12, %s5041_s8 }
 0x10a   : > { %p3797_p1 = scmp.lt.s32.totalorder %s3795_s3, %s3791_s10 }
 0x10b   : > { %s905_s13 = sshll.u32 %s5052_s26, 4  ;;  %p3793_p12 = pnand %p3792_p11, %p138_p5  ;;  %s4568_s13 = int_to_ptr.hbm [resolvable:$true] %s905_s13 }
 0x10c   : > { %p3798_p2 = por %p3797_p1, %p3796_p0 }
 0x10d   : > { %p3794_p13 = pneg %p3793_p12 }
 0x10f   : > { %p3799_p3 = pnand %p3798_p2, %p3794_p13 }
 0x111   : > { %3802 = shalt.err (!%p3799_p3)
}
 0x112   : > { %s5053_s15 = sld [smem:[#allocation56_spill]]  ;;  %s4199_s7 = smov [#allocation16]  }
 0x113   : > { %3141 = dma.hbm_to_vmem [thread:$0]  (%p138_p5), %s4557_s22, 16, %s884_s4, [#allocation12]  }
 0x114   : > { %s907_s11 = sshll.u32 %s4199_s7, 4  ;;  %s3817_s28 = sshra.s32 %s4568_s13, 4  ;;  %s908_s11 = int_to_ptr.vmem [resolvable:$true] %s907_s11  ;;  %s3818_s28 = int_to_ptr.hbm [resolvable:$true] %s3817_s28 }
 0x115   : > { %s3819_s12 = scalar_lea.hbm %s3818_s28, 8  ;;  %s3823_s10 = scalar_lea.hbm %s5052_s26, 8 }
 0x116   : > { %p3820_p6 = scmp.ne.s32.totalorder %s3818_s28, %s3819_s12  ;;  %p3824_p11 = scmp.lt.s32.totalorder %s3818_s28, %s5052_s26 }
 0x117   : > { %p3825_p12 = scmp.lt.s32.totalorder %s3823_s10, %s3819_s12 }
 0x118   : > { %s929_s18 = sshll.u32 %s5053_s15, 4  ;;  %p3821_p7 = pnand %p3820_p6, %p138_p5  ;;  %s4579_s18 = int_to_ptr.hbm [resolvable:$true] %s929_s18 }
 0x119   : > { %p3826_p13 = por %p3825_p12, %p3824_p11 }
 0x11a   : > { %p3822_p10 = pneg %p3821_p7 }
 0x11c   : > { %p3827_p0 = pnand %p3826_p13, %p3822_p10 }
 0x11e   : > { %3830 = shalt.err (!%p3827_p0)
}
 0x11f   : > { %s5054_s22 = sld [smem:[#allocation59_spill]]  ;;  %s4200_s3 = smov [#allocation19]  }
 0x120   : > { %3145 = dma.hbm_to_vmem [thread:$0]  (%p138_p5), %s4568_s13, 128, %s908_s11, [#allocation15]  }
 0x121   : > { %s931_s7 = sshll.u32 %s4200_s3, 4  ;;  %s3845_s28 = sshra.s32 %s4579_s18, 4  ;;  %s932_s7 = int_to_ptr.vmem [resolvable:$true] %s931_s7  ;;  %s3846_s28 = int_to_ptr.hbm [resolvable:$true] %s3845_s28 }
 0x122   : > { %s3847_s12 = scalar_lea.hbm %s3846_s28, 1  ;;  %s3851_s10 = scalar_lea.hbm %s5053_s15, 1 }
 0x123   : > { %p3848_p1 = scmp.ne.s32.totalorder %s3846_s28, %s3847_s12  ;;  %p3852_p6 = scmp.lt.s32.totalorder %s3846_s28, %s5053_s15 }
 0x124   : > { %p3853_p7 = scmp.lt.s32.totalorder %s3851_s10, %s3847_s12 }
 0x125   : > { %s956_s4 = sshll.u32 %s5054_s22, 4  ;;  %p3849_p2 = pnand %p3848_p1, %p138_p5  ;;  %s4590_s4 = int_to_ptr.hbm [resolvable:$true] %s956_s4 }
 0x126   : > { %p3854_p10 = por %p3853_p7, %p3852_p6 }
 0x127   : > { %p3850_p3 = pneg %p3849_p2 }
 0x129   : > { %p3855_p11 = pnand %p3854_p10, %p3850_p3 }
 0x12b   : > { %3858 = shalt.err (!%p3855_p11)
}
 0x12c   : > { %s5055_s13 = sld [smem:[#allocation63_spill]]  ;;  %s4201_s11 = smov [#allocation22]  }
 0x12d   : > { %3149 = dma.hbm_to_vmem [thread:$0]  (%p138_p5), %s4579_s18, 16, %s932_s7, [#allocation18]  }
 0x12e   : > { %s958_s3 = sshll.u32 %s4201_s11, 4  ;;  %s3873_s28 = sshra.s32 %s4590_s4, 4  ;;  %s959_s3 = int_to_ptr.vmem [resolvable:$true] %s958_s3  ;;  %s3874_s28 = int_to_ptr.hbm [resolvable:$true] %s3873_s28 }
 0x12f   : > { %s3875_s12 = scalar_lea.hbm %s3874_s28, 1  ;;  %s3879_s10 = scalar_lea.hbm %s5054_s22, 1 }
 0x130   : > { %p3876_p12 = scmp.ne.s32.totalorder %s3874_s28, %s3875_s12  ;;  %p3880_p1 = scmp.lt.s32.totalorder %s3874_s28, %s5054_s22 }
 0x131   : > { %p3881_p2 = scmp.lt.s32.totalorder %s3879_s10, %s3875_s12 }
 0x132   : > { %s986_s5 = sshll.u32 %s5055_s13, 4  ;;  %p3877_p13 = pnand %p3876_p12, %p138_p5  ;;  %s4601_s5 = int_to_ptr.hbm [resolvable:$true] %s986_s5 }
 0x133   : > { %p3882_p3 = por %p3881_p2, %p3880_p1 }
 0x134   : > { %p3878_p0 = pneg %p3877_p13 }
 0x136   : > { %p3883_p6 = pnand %p3882_p3, %p3878_p0 }
 0x138   : > { %3886 = shalt.err (!%p3883_p6)
}
 0x139   : > { %s5056_s18 = sld [smem:[#allocation65_spill]]  ;;  %s4202_s11 = smov [#allocation25]  }
 0x13a   : > { %3153 = dma.hbm_to_vmem [thread:$0]  (%p138_p5), %s4590_s4, 16, %s959_s3, [#allocation21]  }
 0x13b   : > { %s988_s6 = sshll.u32 %s4202_s11, 4  ;;  %s3901_s28 = sshra.s32 %s4601_s5, 4  ;;  %s989_s6 = int_to_ptr.vmem [resolvable:$true] %s988_s6  ;;  %s3902_s28 = int_to_ptr.hbm [resolvable:$true] %s3901_s28 }
 0x13c   : > { %s3903_s12 = scalar_lea.hbm %s3902_s28, 1  ;;  %s3907_s10 = scalar_lea.hbm %s5055_s13, 1 }
 0x13d   : > { %p3904_p7 = scmp.ne.s32.totalorder %s3902_s28, %s3903_s12  ;;  %p3908_p12 = scmp.lt.s32.totalorder %s3902_s28, %s5055_s13 }
 0x13e   : > { %p3909_p13 = scmp.lt.s32.totalorder %s3907_s10, %s3903_s12 }
 0x13f   : > { %s1013_s7 = sshll.u32 %s5056_s18, 4  ;;  %p3905_p10 = pnand %p3904_p7, %p138_p5  ;;  %s4612_s7 = int_to_ptr.hbm [resolvable:$true] %s1013_s7 }
 0x140   : > { %p3910_p0 = por %p3909_p13, %p3908_p12 }
 0x141   : > { %p3906_p11 = pneg %p3905_p10 }
 0x143   : > { %p3911_p1 = pnand %p3910_p0, %p3906_p11 }
 0x145   : > { %3914 = shalt.err (!%p3911_p1)
}
 0x146   : > { %s5057_s4 = sld [smem:[#allocation67_spill]]  ;;  %s4203_s3 = smov [#allocation28]  }
 0x147   : > { %3157 = dma.hbm_to_vmem [thread:$0]  (%p138_p5), %s4601_s5, 16, %s989_s6, [#allocation24]  }
 0x148   : > { %s1015_s11 = sshll.u32 %s4203_s3, 4  ;;  %s3929_s28 = sshra.s32 %s4612_s7, 4  ;;  %s1016_s11 = int_to_ptr.vmem [resolvable:$true] %s1015_s11  ;;  %s3930_s28 = int_to_ptr.hbm [resolvable:$true] %s3929_s28 }
 0x149   : > { %s3931_s12 = scalar_lea.hbm %s3930_s28, 1  ;;  %s3935_s10 = scalar_lea.hbm %s5056_s18, 1 }
 0x14a   : > { %p3932_p2 = scmp.ne.s32.totalorder %s3930_s28, %s3931_s12  ;;  %p3936_p7 = scmp.lt.s32.totalorder %s3930_s28, %s5056_s18 }
 0x14b   : > { %p3937_p10 = scmp.lt.s32.totalorder %s3935_s10, %s3931_s12 }
 0x14c   : > { %s1039_s8 = sshll.u32 %s5057_s4, 4  ;;  %p3933_p3 = pnand %p3932_p2, %p138_p5  ;;  %s4623_s8 = int_to_ptr.hbm [resolvable:$true] %s1039_s8 }
 0x14d   : > { %p3938_p11 = por %p3937_p10, %p3936_p7 }
 0x14e   : > { %p3934_p6 = pneg %p3933_p3 }
 0x150   : > { %p3939_p12 = pnand %p3938_p11, %p3934_p6 }
 0x152   : > { %3942 = shalt.err (!%p3939_p12)
}
 0x153   : > { %s5058_s5 = sld [smem:[#allocation69_spill]]  ;;  %s4204_s3 = smov [#allocation31]  }
 0x154   : > { %3161 = dma.hbm_to_vmem [thread:$0]  (%p138_p5), %s4612_s7, 16, %s1016_s11, [#allocation27]  }
 0x155   : > { %s1041_s9 = sshll.u32 %s4204_s3, 4  ;;  %s3957_s28 = sshra.s32 %s4623_s8, 4  ;;  %s1042_s9 = int_to_ptr.vmem [resolvable:$true] %s1041_s9  ;;  %s3958_s28 = int_to_ptr.hbm [resolvable:$true] %s3957_s28 }
 0x156   : > { %s3959_s12 = scalar_lea.hbm %s3958_s28, 1  ;;  %s3963_s10 = scalar_lea.hbm %s5057_s4, 1 }
 0x157   : > { %p3960_p13 = scmp.ne.s32.totalorder %s3958_s28, %s3959_s12  ;;  %p3964_p2 = scmp.lt.s32.totalorder %s3958_s28, %s5057_s4 }
 0x158   : > { %p3965_p3 = scmp.lt.s32.totalorder %s3963_s10, %s3959_s12 }
 0x159   : > { %s1065_s6 = sshll.u32 %s5058_s5, 4  ;;  %p3961_p0 = pnand %p3960_p13, %p138_p5  ;;  %s4634_s6 = int_to_ptr.hbm [resolvable:$true] %s1065_s6 }
 0x15a   : > { %p3966_p6 = por %p3965_p3, %p3964_p2 }
 0x15b   : > { %p3962_p1 = pneg %p3961_p0 }
 0x15d   : > { %p3967_p7 = pnand %p3966_p6, %p3962_p1 }
 0x15f   : > { %3970 = shalt.err (!%p3967_p7)
}
 0x160   : > { %3165 = dma.hbm_to_vmem [thread:$0]  (%p138_p5), %s4623_s8, 16, %s1042_s9, [#allocation30]  }
 0x161   : > { %s4205_s7 = smov [#allocation34]   ;;  %s1092_s3 = sshll.u32 %s4365_s30, 4  ;;  %s1093_s3 = int_to_ptr.hbm [resolvable:$true] %s1092_s3 }
 0x162   : > { %s1067_s11 = sshll.u32 %s4205_s7, 4  ;;  %s3985_s13 = sshra.s32 %s4634_s6, 4  ;;  %s1068_s11 = int_to_ptr.vmem [resolvable:$true] %s1067_s11  ;;  %s3986_s13 = int_to_ptr.hbm [resolvable:$true] %s3985_s13 }
 0x163   : > { %s3987_s28 = scalar_lea.hbm %s3986_s13, 1  ;;  %s3991_s12 = scalar_lea.hbm %s5058_s5, 1 }
 0x164   : > { %p3988_p10 = scmp.ne.s32.totalorder %s3986_s13, %s3987_s28  ;;  %p3992_p13 = scmp.lt.s32.totalorder %s3986_s13, %s5058_s5 }
 0x165   : > { %p3993_p0 = scmp.lt.s32.totalorder %s3991_s12, %s3987_s28 }
 0x166   : > { %p3989_p11 = pnand %p3988_p10, %p138_p5 }
 0x167   : > { %p3994_p1 = por %p3993_p0, %p3992_p13 }
 0x168   : > { %p3990_p12 = pneg %p3989_p11 }
 0x16a   : > { %p3995_p2 = pnand %p3994_p1, %p3990_p12 }
 0x16c   : > { %3998 = shalt.err (!%p3995_p2)
}
 0x16d   : > { %3169 = dma.hbm_to_vmem [thread:$0]  (%p138_p5), %s4634_s6, 16, %s1068_s11, [#allocation33]  }
 0x16e   : > { %s4206_s9 = smov [#allocation37]   ;;  %s4013_s10 = sshra.s32 %s1093_s3, 4  ;;  %s4014_s10 = int_to_ptr.hbm [resolvable:$true] %s4013_s10 }
 0x16f   : > { %s1094_s8 = sshll.u32 %s4206_s9, 4  ;;  %s4015_s7 = scalar_lea.hbm %s4014_s10, 1  ;;  %s1095_s8 = int_to_ptr.vmem [resolvable:$true] %s1094_s8 }
 0x170   : > { %p4016_p3 = scmp.ne.s32.totalorder %s4014_s10, %s4015_s7  ;;  %s4019_s13 = scalar_lea.hbm %s4365_s30, 1 }
 0x171   : > { %p4020_p10 = scmp.lt.s32.totalorder %s4014_s10, %s4365_s30  ;;  %p4021_p11 = scmp.lt.s32.totalorder %s4019_s13, %s4015_s7 }
 0x172   : > { %p4017_p6 = pnand %p4016_p3, %p138_p5 }
 0x173   : > { %p4022_p12 = por %p4021_p11, %p4020_p10 }
 0x174   : > { %p4018_p7 = pneg %p4017_p6 }
 0x176   : > { %p4023_p13 = pnand %p4022_p12, %p4018_p7 }
 0x178   : > { %4026 = shalt.err (!%p4023_p13)
}
 0x179   : > { %3173 = dma.hbm_to_vmem [thread:$0]  (%p138_p5), %s1093_s3, 16, %s1095_s8, [#allocation36]  }
 0x17a PF: > { %s5059_s6 = sld [smem:[#allocation51_spill]]  ;;  %p3246_p0 = scmp.lt.s32.totalorder %s4149_s19, 2 }
 0x17b   : > { %s1120_s11 = sand.u32 1, %s4145_s0   ;;  %s3100_s28 = sshll.u32 %s4149_s19, 3 }
 0x17c   : > { %s3026_s12 = sshll.u32 %s1120_s11, 3  ;;  %p4665_p1 = pnand %p3246_p0, %p4414_p4 }
 0x17d   : > { %s1124_s7 = scalar_lea.vmem [#allocation3], %s3026_s12  ;;  %s1121_s8 = scalar_lea.sflag [#allocation4], %s1120_s11 }
 0x17e   : > { %s1132_s13 = sshll.u32 %s1124_s7, 4  ;;  %p4045_p3 = pneg %p4665_p1  ;;  %s1133_s13 = int_to_ptr.vmem [resolvable:$true] %s1132_s13 }
 0x180   : > { %s1129_s9 = scalar_lea.hbm %s5059_s6, %s3100_s28  ;;  %s4048_s19 = scalar_lea.hbm %s5059_s6, 16 }
 0x181   : > { %s1130_s10 = sshll.u32 %s1129_s9, 4  ;;  %s1131_s10 = int_to_ptr.hbm [resolvable:$true] %s1130_s10 }
 0x182   : > { %s4041_s4 = sshra.s32 %s1131_s10, 4  ;;  %s4042_s4 = int_to_ptr.hbm [resolvable:$true] %s4041_s4 }
 0x183   : > { %s4043_s5 = scalar_lea.hbm %s4042_s4, 8  ;;  %p4049_p10 = scmp.lt.s32.totalorder %s4042_s4, %s5059_s6 }
 0x184   : > { %p4044_p2 = scmp.ne.s32.totalorder %s4042_s4, %s4043_s5  ;;  %p4050_p11 = scmp.lt.s32.totalorder %s4048_s19, %s4043_s5 }
 0x186   : > { %p4046_p6 = pnand %p4045_p3, %p4044_p2  ;;  %p4051_p12 = por %p4050_p11, %p4049_p10 }
 0x188   : > { %p4047_p7 = pneg %p4046_p6 }
 0x18a   : > { %p4052_p13 = pnand %p4051_p12, %p4047_p7 }
 0x18c   : > { %4055 = shalt.err (!%p4052_p13)
}
 0x18d   : > { %s4207_s16 = smov 64   ;;  %s4208_s28 = smov 4  }
 0x18e   : > { %3223 = dma.hbm_to_vmem [thread:$0]  (!%p4665_p1), %s1131_s10, 128, %s1133_s13, %s1121_s8, %s4207_s16, %s4207_s16, %s4208_s28  }
 0x18f   : > { %1152 = sbr.rel (%p4427_p9) target bundleno = 4727 (0x1277), region = 148  ;;  %s1154_s12 = sand.u32 (!%p4427_p9), 1, %s4141_s1  }
 0x190   : > { %s4678_s9 = sshll.u32 (!%p4427_p9), %s1154_s12, 3  ;;  %s1155_s7 = scalar_lea.sflag (!%p4427_p9), [#allocation4], %s1154_s12 }
 0x191   : > { %s1158_s4 = scalar_lea.vmem (!%p4427_p9), [#allocation3], %s4678_s9 }
 0x194   : > { %4088 = dma.done.wait (%p4423_p8), %s1155_s7, 128  }
 0x195   : > { %4090 = vsyncadd (%p4423_p8), %s1155_s7, 4294967168 }
 0x196   : > { %4092 = dma.done.wait (%p138_p5), [#allocation6], 144  }
 0x197   : > { %4094 = vsyncadd (%p138_p5), [#allocation6], 4294967152 }
 0x198   : > { %4096 = dma.done.wait (%p138_p5), [#allocation9], 144  }
 0x199   : > { %4098 = vsyncadd (%p138_p5), [#allocation9], 4294967152 }
 0x19a   : > { %4100 = dma.done.wait (%p138_p5), [#allocation12], 144  }
 0x19b   : > { %4102 = vsyncadd (%p138_p5), [#allocation12], 4294967152 }
 0x19c   : > { %4104 = dma.done.wait (%p138_p5), [#allocation15], 256  }
 0x19d   : > { %4106 = vsyncadd (%p138_p5), [#allocation15], 4294967040 }
 0x19e   : > { %4108 = dma.done.wait (%p138_p5), [#allocation18], 32  }
 0x19f   : > { %4110 = vsyncadd (%p138_p5), [#allocation18], 4294967264 }
 0x1a0   : > { %4112 = dma.done.wait (%p138_p5), [#allocation21], 32  }
 0x1a1   : > { %4114 = vsyncadd (%p138_p5), [#allocation21], 4294967264 }
 0x1a2   : > { %4116 = dma.done.wait (%p138_p5), [#allocation24], 32  }
 0x1a3   : > { %4118 = vsyncadd (%p138_p5), [#allocation24], 4294967264 }
 0x1a4   : > { %4120 = dma.done.wait (%p138_p5), [#allocation27], 32  }
 0x1a5   : > { %4122 = vsyncadd (%p138_p5), [#allocation27], 4294967264 }
 0x1a6   : > { %4124 = dma.done.wait (%p138_p5), [#allocation30], 528  }
 0x1a7   : > { %4126 = vsyncadd (%p138_p5), [#allocation30], 4294966768 }
 0x1a8   : > { %4128 = dma.done.wait (%p138_p5), [#allocation33], 528  }
 0x1a9   : > { %4130 = vsyncadd (%p138_p5), [#allocation33], 4294966768 }
 0x1aa   : > { %4132 = dma.done.wait (%p138_p5), [#allocation36], 32  }
 0x1ab   : > { %4134 = vsyncadd (%p138_p5), [#allocation36], 4294967264  ;;  %s5062_s23 = sld [smem:[#allocation50_spill]]  ;;  %s3053_s5 = sshll.u32 %s4399_s2, 1  ;;  %vm1403_vm0 = vcmask 64512   ;;  %v1398_v1 = vld [vmem:[#allocation5] sm:$0xff] }
 0x1ac   : > { %p1359_p4 = scmp.lt.s32.totalorder %s3053_s5, 3  ;;  %1425 = vmatpush.msra.mxu0 %v1398_v1  ;;  %v1433_v3 = vld [vmem:[#allocation8] sm:$0xff]  ;;  %v3363_v6 = vld [vmem:[#allocation7] ss:$0 sm:$0xff]  ;;  %vm1518_vm1 = vcmask 261120   ;;  %s5063_s3 = sld [smem:[#allocation52_spill]] }
 0x1ad   : > { %1453 = vmatpush.msra.mxu1 %v1433_v3  ;;  %v3364_v10 = vld [vmem:[#allocation10] ss:$0 sm:$0xff]  ;;  %v4747_v13 = vld [vmem:[#allocation14] sm:$0x1f]  ;;  %p1364_p5 = scmp.lt.s32.totalorder %s4399_s2, 1  ;;  %vm1608_vm3 = vcmask 130048  }
 0x1ae   : > { %s5082_s5 = smov (!%p1359_p4, %s3053_s5), 3  ;;  %v4793_v46 = vld [vmem:[%s1158_s4] sm:$0xff]   ;;  %vm1694_vm5 = vcmask 1040384   ;;  %vm1696_vm6 = vcmask 1041408   ;;  %vm1698_vm7 = vcmask 1042432   ;;  %vm1700_vm8 = vcmask 1043456  }
 0x1af   : > { %s3054_s10 = sshll.u32 %s5082_s5, 3  ;;  %s5084_s2 = smov (!%p1364_p5, %s4399_s2), 1  ;;  %v3103_v53 = vunpack.c.l.bf16 %v4793_v46  ;;  %v3104_v57 = vunpack.c.h.bf16 %v4793_v46  ;;  %vm1741_vm9 = vcmask 1044480   ;;  %vm1734_vm10 = vcmask 39936  }
 0x1b0   : > { %s3129_s8 = smul.u32 40, %s5084_s2  ;;  %s5068_s16 = sld [smem:[#allocation58_spill]] }
 0x1b1   : > { %s1362_s13 = scalar_lea.vmem %s5062_s23, %s3054_s10  ;;  %vm4807_vm2 = vcmp.gt.f32.partialorder %v3103_v53, 0.0  ;;  %vm4813_vm4 = vcmp.gt.f32.partialorder %v3104_v57, 0.0  ;;  %s5069_s28 = sld [smem:[#allocation62_spill]] }
 0x1b2   : > { %v4731_v2 = vld [vmem:[%s1362_s13] sm:$0xff]  ;;  %v4737_v4 = vld [vmem:[%s1362_s13 + $0x8] sm:$0xff]  ;;  %s1368_s19 = scalar_lea.vmem %s5063_s3, %s3129_s8  ;;  %s5071_s12 = sld [smem:[#allocation60_spill]] }
 0x1b3   : > { %3056 = vmatmul.msk.f32.vlgmr.msra.gmra.mxu0 %vm1403_vm0, %v4731_v2  ;;  %3058 = vmatmul.msk.f32.vlgmr.msra.gmra.mxu1 %vm1403_vm0, %v4731_v2  ;;  %v4759_v16 = vld [vmem:[%s1368_s19] sm:$0xff]   ;;  %v4761_v17 = vld [vmem:[%s1368_s19 + $0x8] sm:$0xff]   ;;  %v4763_v18 = vld [vmem:[%s1368_s19 + $0x10] sm:$0xff]   ;;  %s5072_s9 = sld [smem:[#allocation64_spill]] }
 0x1b4   : > { %v3107_v19 = vunpack.c.l.bf16 %v4759_v16  ;;  %v3111_v20 = vunpack.c.l.bf16 %v4761_v17  ;;  %v4767_v22 = vld [vmem:[%s1368_s19 + $0x18] sm:$0xff]   ;;  %v3108_v23 = vunpack.c.h.bf16 %v4759_v16  ;;  %v3112_v24 = vunpack.c.h.bf16 %v4761_v17  ;;  %v4772_v30 = vld [vmem:[%s1368_s19 + $0x20] sm:$0xff]   ;;  %s5073_s7 = sld [smem:[#allocation70_spill]] }
 0x1b5   : > { %v3115_v28 = vunpack.c.l.bf16 %v4763_v18  ;;  %v3116_v31 = vunpack.c.h.bf16 %v4763_v18  ;;  %v3119_v32 = vunpack.c.l.bf16 %v4767_v22  ;;  %v3120_v36 = vunpack.c.h.bf16 %v4767_v22  ;;  %s5074_s4 = sld [smem:[#allocation71_spill]] }
 0x1b6   : > { %v3123_v39 = vunpack.c.l.bf16 %v4772_v30  ;;  %v3124_v43 = vunpack.c.h.bf16 %v4772_v30  ;;  %s5075_s23 = sld [smem:[#allocation72_spill]] }
 0x1b7   : > { %s5070_s11 = smov %s5069_s28 }
 0x1bb   : > { %3057 = vmatmul.msk.f32.gmra.mxu0 %vm1403_vm0, %v4737_v4  ;;  %3059 = vmatmul.msk.f32.gmra.mxu1 %vm1403_vm0, %v4737_v4 }
 0x1bc   : > { %s1371_s5 = scalar_lea.vmem %s5075_s23, %s5084_s2 }
 0x230   : > { %v1427_v5 = vpop.f32.mrf.mxu0  ;;  %v1455_v9 = vpop.f32.mrf.mxu1 }
 0x231   : > { %v1428_v11 = vadd.f32 %v3363_v6, %v1427_v5  ;;  %v1456_v12 = vadd.f32 %v3364_v10, %v1455_v9 }
 0x238   : > { %v1430_v7 = vpop.f32.mrf.mxu0  ;;  %v1458_v14 = vpop.f32.mrf.mxu1 }
 0x239   : > { %v1431_v8 = vadd.f32 %v3363_v6, %v1430_v7  ;;  %v1459_v15 = vadd.f32 %v3364_v10, %v1458_v14 }
 0x23b   : > { %3064 = vmatpush.xpose.msk.msrb.mxu0 %vm1518_vm1, %v1431_v8  ;;  %3067 = vmatpush.xpose.msk.msrb.mxu1 %vm1518_vm1, %v1431_v8 }
 0x23f   : > { %3065 = vmatpush.xpose.msk.msrb.mxu0 %vm1518_vm1, %v1428_v11  ;;  %3068 = vmatpush.xpose.msk.msrb.mxu1 %vm1518_vm1, %v1428_v11 }
 0x242   : > { %3066 = vmatmul.msk.f32.vlgmr.msrb.gmra.mxu0 %vm1518_vm1, %v4747_v13  ;;  %3069 = vmatmul.msk.f32.vlgmr.msrb.gmra.mxu1 %vm1518_vm1, %v1456_v12 }
 0x24a   : > { %3070 = vmatmul.msk.f32.gmra.mxu1 %vm1518_vm1, %v1459_v15 }
 0x2bf   : > { %v1545_v21 = vpop.f32.mrf.mxu0  ;;  %v1596_v29 = vpop.f32.mrf.mxu1 }
 0x2c0   : > { %v1548_v25 = vperm.slane %v1545_v21, 0  ;;  %v1553_v26 = vperm.slane %v1545_v21, 1  ;;  %v1558_v27 = vperm.slane %v1545_v21, 2  ;;  %v1563_v35 = vperm.slane %v1545_v21, 3 }
 0x2c1   : > { %v1568_v42 = vperm.slane %v1545_v21, 4 }
 0x2c2   : > { %v1549_v33 = vmul.f32 %v3107_v19, %v1548_v25  ;;  %v1554_v34 = vmul.f32 %v3111_v20, %v1553_v26  ;;  %v1550_v37 = vmul.f32 %v3108_v23, %v1548_v25  ;;  %v1555_v38 = vmul.f32 %v3112_v24, %v1553_v26 }
 0x2c3   : > { %v1559_v41 = vmul.f32 %v3115_v28, %v1558_v27  ;;  %v1560_v45 = vmul.f32 %v3116_v31, %v1558_v27  ;;  %v1564_v48 = vmul.f32 %v3119_v32, %v1563_v35  ;;  %v1565_v50 = vmul.f32 %v3120_v36, %v1563_v35 }
 0x2c4   : > { %v1556_v40 = vadd.f32 %v1554_v34, %v1549_v33  ;;  %v1557_v44 = vadd.f32 %v1555_v38, %v1550_v37  ;;  %v1569_v52 = vmul.f32 %v3123_v39, %v1568_v42  ;;  %v1570_v55 = vmul.f32 %v3124_v43, %v1568_v42 }
 0x2c6   : > { %v1561_v47 = vadd.f32 %v1559_v41, %v1556_v40  ;;  %v1562_v49 = vadd.f32 %v1560_v45, %v1557_v44 }
 0x2c7   : > { %v1599_v58 = vpop.f32.mrf.mxu1 }
 0x2c8   : > { %v1566_v51 = vadd.f32 %v1564_v48, %v1561_v47  ;;  %v1567_v54 = vadd.f32 %v1565_v50, %v1562_v49 }
 0x2ca   : > { %v1571_v56 = vadd.f32 %v1569_v52, %v1566_v51  ;;  %v1572_v59 = vadd.f32 %v1570_v55, %v1567_v54 }
 0x2cc   : > { %v1597_v60 = vadd.f32 %v1596_v29, %v1571_v56  ;;  %v1600_v62 = vadd.f32 %v1599_v58, %v1572_v59 }
 0x2ce   : > { %v1602_v63 = vmul.f32 0.17677669, %v1597_v60  ;;  %v1603_v1 = vmul.f32 0.17677669, %v1600_v62 }
 0x2d0   : > { %v1606_v3 = vsel %vm4807_vm2, %v1602_v63, -1e+30  ;;  %v1607_v6 = vsel %vm4813_vm4, %v1603_v1, -1e+30 }
 0x2d1   : > { %v1609_v5 = vsel %vm1608_vm3, %v1606_v3, -inf  ;;  %v1610_v7 = vsel %vm1608_vm3, %v1607_v6, -inf }
 0x2d2   : > { %v1611_v8 = vmax.f32 %v1609_v5, %v1610_v7 }
 0x2d4   : > { %v1612_v9 = vrot.slane %v1611_v8, 4 }
 0x2d6   : > { %v1613_v10 = vmax.f32 %v1611_v8, %v1612_v9 }
 0x2d8   : > { %v1614_v11 = vrot.slane %v1613_v10, 2 }
 0x2da   : > { %v1615_v12 = vmax.f32 %v1613_v10, %v1614_v11 }
 0x2dc   : > { %v1616_v14 = vrot.slane %v1615_v12, 1 }
 0x2de   : > { %v1617_v15 = vmax.f32 %v1615_v12, %v1616_v14 }
 0x2e0   : > { %v1618_v21 = vsub.f32 %v1606_v3, %v1617_v15  ;;  %v1619_v25 = vsub.f32 %v1607_v6, %v1617_v15 }
 0x2e2   : > { %v1620_v26 = vmul.f32 1.442695, %v1618_v21  ;;  %v1622_v27 = vmul.f32 1.442695, %v1619_v25 }
 0x2e4   : > { %3379 = vpow2.f32 %v1620_v26 }
 0x2e5   : > { %3381 = vpow2.f32 %v1622_v27 }
 0x2ea   : > { %v3380_v29 = vpop.eup %3379 }
 0x2eb   : > { %v3382_v33 = vpop.eup %3381  ;;  %v1624_v34 = vsel %vm4807_vm2, %v3380_v29, 0.0 }
 0x2ec   : > { %v1625_v35 = vsel %vm4813_vm4, %v3382_v33, 0.0  ;;  %v1626_v37 = vsel %vm1608_vm3, %v1624_v34, 0.0 }
 0x2ed   : > { %v1627_v38 = vsel %vm1608_vm3, %v1625_v35, 0.0 }
 0x2ee   : > { %v1628_v40 = vadd.f32 %v1627_v38, %v1626_v37 }
 0x2f0   : > { %v1629_v41 = vrot.slane %v1628_v40, 4 }
 0x2f2   : > { %v1630_v42 = vadd.f32 %v1629_v41, %v1628_v40  ;;  %v1461_v40 = vld [vmem:[#allocation11] sm:$0xff] }
 0x2f3   : > { %1481 = vmatpush.msra.mxu2 %v1461_v40 }
 0x2f4   : > { %v1631_v44 = vrot.slane %v1630_v42, 2  ;;  %3060 = vmatmul.msk.f32.vlgmr.msra.gmra.mxu2 %vm1403_vm0, %v4731_v2 }
 0x2f5   : > { %3071 = vmatpush.msk.msrb.mxu2 %vm1741_vm9, %v4747_v13 }
 0x2f6   : > { %v1632_v45 = vadd.f32 %v1631_v44, %v1630_v42 }
 0x2f7   : > { %2023 = vmatpush.msra.mxu2 %v3104_v57  ;;  %v3366_v57 = vld [vmem:[#allocation17] ss:$0 sm:$0xff] }
 0x2f8   : > { %v1633_v47 = vrot.slane %v1632_v45, 1 }
 0x2f9   : > { %2024 = vmatpush.msra.mxu2 %v3103_v53 }
 0x2fa   : > { %v1634_v48 = vadd.f32 %v1633_v47, %v1632_v45 }
 0x2fc   : > { %v1635_v49 = vmax.f32 %v1634_v48, 1e-30  ;;  %3061 = vmatmul.msk.f32.gmra.mxu2 %vm1403_vm0, %v4737_v4 }
 0x2fe   : > { %3383 = vrcp.f32 %v1635_v49 }
 0x304   : > { %v3384_v50 = vpop.eup %3383 }
 0x305   : > { %v4829_v51 = vmul.f32 %v3384_v50, %v1624_v34  ;;  %v4831_v52 = vmul.f32 %v3384_v50, %v1625_v35 }
 0x307   : > { %v1640_v54 = vmul.f32 %v3108_v23, %v4831_v52  ;;  %v1651_v55 = vmul.f32 %v3112_v24, %v4831_v52  ;;  %v1662_v56 = vmul.f32 %v3116_v31, %v4831_v52  ;;  %v1673_v58 = vmul.f32 %v3120_v36, %v4831_v52 }
 0x308   : > { %v1684_v59 = vmul.f32 %v3124_v43, %v4831_v52  ;;  %v1639_v23 = vmul.f32 %v3107_v19, %v4829_v51  ;;  %v1650_v24 = vmul.f32 %v3111_v20, %v4829_v51  ;;  %v1661_v31 = vmul.f32 %v3115_v28, %v4829_v51 }
 0x309   : > { %v1642_v60 = vsel %vm1608_vm3, %v1640_v54, 0.0  ;;  %v1653_v36 = vsel %vm1608_vm3, %v1651_v55, 0.0  ;;  %v1664_v61 = vsel %vm1608_vm3, %v1662_v56, 0.0  ;;  %v1675_v43 = vsel %vm1608_vm3, %v1673_v58, 0.0 }
 0x30a   : > { %v1641_v62 = vsel %vm1608_vm3, %v1639_v23, 0.0  ;;  %v1652_v16 = vsel %vm1608_vm3, %v1650_v24, 0.0  ;;  %v1663_v19 = vsel %vm1608_vm3, %v1661_v31, 0.0  ;;  %v1672_v18 = vmul.f32 %v3119_v32, %v4829_v51  ;;  %v3365_v23 = vld [vmem:[#allocation13] ss:$0 sm:$0xff] }
 0x30b   : > { %v1643_v17 = vadd.f32 %v1642_v60, %v1641_v62  ;;  %v1654_v20 = vadd.f32 %v1653_v36, %v1652_v16  ;;  %v1665_v63 = vadd.f32 %v1664_v61, %v1663_v19  ;;  %v1686_v28 = vsel %vm1608_vm3, %v1684_v59, 0.0  ;;  %v1489_v59 = vld [vmem:[#allocation16] sm:$0xff] }
 0x30c   : > { %v1683_v0 = vmul.f32 %v3123_v39, %v4829_v51  ;;  %v1674_v6 = vsel %vm1608_vm3, %v1672_v18, 0.0  ;;  %1509 = vmatpush.msra.mxu3 %v1489_v59  ;;  %v3368_v59 = vld [vmem:[#allocation20] ss:$0 sm:$0xff] }
 0x30d   : > { %v1644_v1 = vrot.slane %v1643_v17, 4  ;;  %v1655_v3 = vrot.slane %v1654_v20, 4  ;;  %v1666_v5 = vrot.slane %v1665_v63, 4  ;;  %v1676_v7 = vadd.f32 %v1675_v43, %v1674_v6  ;;  %3062 = vmatmul.msk.f32.vlgmr.msra.gmra.mxu3 %vm1403_vm0, %v4731_v2 }
 0x30e   : > { %v1685_v8 = vsel %vm1608_vm3, %v1683_v0, 0.0 }
 0x30f   : > { %v1645_v9 = vadd.f32 %v1644_v1, %v1643_v17  ;;  %v1656_v10 = vadd.f32 %v1655_v3, %v1654_v20  ;;  %v1667_v11 = vadd.f32 %v1666_v5, %v1665_v63  ;;  %v1687_v12 = vadd.f32 %v1686_v28, %v1685_v8 }
 0x310   : > { %v1677_v22 = vrot.slane %v1676_v7, 4  ;;  %v4209_v1 = vmov 32.0  }
 0x311   : > { %v1646_v32 = vrot.slane %v1645_v9, 2  ;;  %v1657_v14 = vrot.slane %v1656_v10, 2  ;;  %v1668_v15 = vrot.slane %v1667_v11, 2  ;;  %v1688_v21 = vrot.slane %v1687_v12, 4 }
 0x312   : > { %v1678_v25 = vadd.f32 %v1677_v22, %v1676_v7  ;;  %3385 = vrcp.f32 %v4209_v1 }
 0x313   : > { %v1647_v30 = vadd.f32 %v1646_v32, %v1645_v9  ;;  %v1658_v39 = vadd.f32 %v1657_v14, %v1656_v10  ;;  %v1669_v26 = vadd.f32 %v1668_v15, %v1667_v11  ;;  %v1689_v27 = vadd.f32 %v1688_v21, %v1687_v12 }
 0x314   : > { %v1679_v29 = vrot.slane %v1678_v25, 2 }
 0x315   : > { %v1648_v33 = vrot.slane %v1647_v30, 1  ;;  %v1659_v34 = vrot.slane %v1658_v39, 1  ;;  %v1670_v35 = vrot.slane %v1669_v26, 1  ;;  %v1690_v37 = vrot.slane %v1689_v27, 2  ;;  %3063 = vmatmul.msk.f32.gmra.mxu3 %vm1403_vm0, %v4737_v4 }
 0x316   : > { %v1680_v38 = vadd.f32 %v1679_v29, %v1678_v25  ;;  %v1895_v29 = vld [vmem:[%s5068_s16] sm:$0xff] }
 0x317   : > { %v1649_v41 = vadd.f32 %v1648_v33, %v1647_v30  ;;  %v1660_v42 = vadd.f32 %v1659_v34, %v1658_v39  ;;  %v1671_v44 = vadd.f32 %v1670_v35, %v1669_v26  ;;  %v1691_v45 = vadd.f32 %v1690_v37, %v1689_v27  ;;  %v1898_v39 = vld [vmem:[%s5068_s16 + $0x18] sm:$0xff]  ;;  %v1897_v26 = vld [vmem:[%s5068_s16 + $0x10] sm:$0xff]  ;;  %v1896_v27 = vld [vmem:[%s5068_s16 + $0x8] sm:$0xff] }
 0x318   : > { %v1681_v47 = vrot.slane %v1680_v38, 1  ;;  %v3386_v3 = vpop.eup %3385  ;;  %1921 = vmatpush.msra.mxu0 %v1898_v39 }
 0x319   : > { %v1692_v48 = vrot.slane %v1691_v45, 1  ;;  %v1695_v49 = vsel %vm1694_vm5, %v1649_v41, %v1660_v42  ;;  %v1839_v5 = vmul.f32 32.0, %v3386_v3  ;;  %vm1843_vm11 = vweird.f32 %v3386_v3 }
 0x31a   : > { %v1682_v50 = vadd.f32 %v1681_v47, %v1680_v38  ;;  %v1697_v54 = vsel %vm1696_vm6, %v1695_v49, %v1671_v44  ;;  %1922 = vmatpush.msra.mxu0 %v1897_v26  ;;  %v2052_v26 = vlaneseq }
 0x31b   : > { %v1693_v55 = vadd.f32 %v1692_v48, %v1691_v45  ;;  %v1840_v6 = vsub.f32 1.0, %v1839_v5 }
 0x31c   : > { %v1699_v56 = vsel %vm1698_vm7, %v1697_v54, %v1682_v50  ;;  %1923 = vmatpush.msra.mxu0 %v1896_v27  ;;  %v3367_v54 = vld [vmem:[#allocation19] ss:$0 sm:$0xff]  ;;  %v4919_v27 = vshrl.u32 %v2052_v26, 7 }
 0x31d   : > { %v1701_v58 = vsel %vm1700_vm8, %v1699_v56, %v1693_v55  ;;  %v1841_v7 = vmul.f32 %v3386_v3, %v1840_v6 }
 0x31e   : > { %1702 = vxpose.xlu0.b32.start.end [1/1] (short) (narrow) %v1701_v58, 16  ;;  %1924 = vmatpush.msra.mxu0 %v1895_v29  ;;  %v4921_v29 = vand.u32 127, %v2052_v26  ;;  %v2245_v26 = vld [vmem:[%s5072_s9] sm:$0xff] }
 0x31f   : > { %v1842_v8 = vadd.f32 %v3386_v3, %v1841_v7 }
 0x320   : > { %vm2056_vm5 = vcmp.eq.s32.totalorder %v4919_v27, %v4921_v29 }
 0x321   : > { %v4893_v9 = vsel %vm1843_vm11, %v3386_v3, %v1842_v8 }
 0x32e   : > { %1767 = vxpose.xlu0.b32.start [1/2] (short) (narrow) %v4829_v51, 16 }
 0x336   : > { %1768 = vxpose.xlu0.b32.end [2/2] (short) (narrow) %v4831_v52, 16 }
 0x377   : > { %v1483_v51 = vpop.f32.mrf.mxu2 }
 0x378   : > { %v1484_v24 = vadd.f32 %v3365_v23, %v1483_v51 }
 0x37f   : > { %v1486_v52 = vpop.f32.mrf.mxu2 }
 0x380   : > { %v1487_v31 = vadd.f32 %v3365_v23, %v1486_v52 }
 0x382   : > { %1819 = vmatpush.msrb.mxu3 %v1487_v31 }
 0x384   : > { %1820 = vmatpush.msrb.mxu3 %v1484_v24 }
 0x390   : > { %v1511_v53 = vpop.f32.mrf.mxu3 }
 0x391   : > { %v1512_v43 = vadd.f32 %v3366_v57, %v1511_v53 }
 0x398   : > { %v1514_v4 = vpop.f32.mrf.mxu3 }
 0x399   : > { %v1515_v63 = vadd.f32 %v3366_v57, %v1514_v4  ;;  %v3369_v57 = vld [vmem:[#allocation22] ss:$0 sm:$0xff] }
 0x3c2   : > { %v1718_v13 = vpop.trf.xlu0 }
 0x3c3   : > { %3072 = vmatmul.msk.f32.vlgmr.msrb.gmra.mxu2 %vm1734_vm10, %v1718_v13 }
 0x3ca   : > { %v1719_v2 = vpop.trf.xlu0 }
 0x3cb   : > { %3073 = vmatmul.msk.f32.gmra.mxu2 %vm1734_vm10, %v1719_v2 }
 0x3d2   : > { %v1783_v60 = vpop.trf.xlu0 }
 0x3d3   : > { %3074 = vmatmul.msk.f32.vlgmr.msrb.gmra.mxu3 %vm1608_vm3, %v1783_v60 }
 0x3da   : > { %v1784_v46 = vpop.trf.xlu0 }
 0x3db   : > { %3075 = vmatmul.msk.f32.gmra.mxu3 %vm1608_vm3, %v1784_v46 }
 0x446   : > { %v1761_v36 = vpop.f32.mrf.mxu2 }
 0x44e   : > { %v1764_v17 = vpop.f32.mrf.mxu2 }
 0x456   : > { %v1822_v61 = vpop.f32.mrf.mxu3 }
 0x457   : > { %v1823_v62 = vadd.f32 %v1822_v61, %v1761_v36 }
 0x459   : > { %v1828_v16 = vadd.f32 %v1823_v62, %v1512_v43 }
 0x45b   : > { %v1832_v19 = vsel %vm1518_vm1, %v1828_v16, 0.0 }
 0x45c   : > { %1833 = vadd.xlane.f32.xlu1 %v1832_v19 }
 0x45e   : > { %v1825_v20 = vpop.f32.mrf.mxu3 }
 0x45f   : > { %v1826_v18 = vadd.f32 %v1825_v20, %v1764_v17 }
 0x461   : > { %v1829_v28 = vadd.f32 %v1826_v18, %v1515_v63 }
 0x463   : > { %v1835_v0 = vsel %vm1518_vm1, %v1829_v28, 0.0 }
 0x464   : > { %1836 = vadd.xlane.f32.xlu1 %v1835_v0 }
 0x4cf   : > { %v1834_v10 = vpop.xlane.xlu1 %1833 }
 0x4d0   : > { %v1845_v11 = vmul.f32 %v4893_v9, %v1834_v10 }
 0x4d2   : > { %v1847_v12 = vsub.f32 %v1828_v16, %v1845_v11 }
 0x4d4   : > { %v1849_v22 = vmul.f32 %v1847_v12, %v1847_v12 }
 0x4d6   : > { %v1851_v32 = vsel %vm1518_vm1, %v1849_v22, 0.0 }
 0x4d7   : > { %1852 = vadd.xlane.f32.xlu2 %v1851_v32  ;;  %v1837_v14 = vpop.xlane.xlu1 %1836 }
 0x4d8   : > { %v1846_v15 = vmul.f32 %v4893_v9, %v1837_v14  ;;  %v2187_v14 = vld [vmem:[%s5069_s28 + $0x18] sm:$0xff] }
 0x4da   : > { %v1848_v21 = vsub.f32 %v1829_v28, %v1846_v15  ;;  %v2186_v15 = vld [vmem:[%s5070_s11 + $0x10] sm:$0xff] }
 0x4dc   : > { %v1850_v25 = vmul.f32 %v1848_v21, %v1848_v21 }
 0x4de   : > { %v1854_v30 = vsel %vm1518_vm1, %v1850_v25, 0.0  ;;  %v2184_v25 = vld [vmem:[%s5070_s11] sm:$0xff] }
 0x4df   : > { %1855 = vadd.xlane.f32.xlu2 %v1854_v30 }
 0x54a   : > { %v1853_v33 = vpop.xlane.xlu2 %1852 }
 0x54b   : > { %v1857_v34 = vmul.f32 %v1853_v33, %v4893_v9 }
 0x54d   : > { %v1859_v35 = vadd.f32 1e-05, %v1857_v34 }
 0x54f   : > { %3387 = vrsqrt.f32 %v1859_v35  ;;  %vm1867_vm13 = vweird.f32 %v1859_v35 }
 0x552   : > { %v1856_v37 = vpop.xlane.xlu2 %1855 }
 0x553   : > { %v1858_v38 = vmul.f32 %v1856_v37, %v4893_v9  ;;  %v4210_v37 = vmov 1.0  }
 0x555   : > { %v3388_v40 = vpop.eup %3387  ;;  %v1860_v41 = vadd.f32 1e-05, %v1858_v38 }
 0x556   : > { %v1862_v42 = vmul.f32 %v3388_v40, %v1859_v35  ;;  %vm1868_vm12 = vweird.f32 %v3388_v40 }
 0x557   : > { %3389 = vrsqrt.f32 %v1860_v41  ;;  %vm1869_vm14 = vmor %vm1867_vm13, %vm1868_vm12  ;;  %vm1877_vm2 = vweird.f32 %v1860_v41 }
 0x558   : > { %v1863_v44 = vmul.f32 %v3388_v40, %v1862_v42  ;;  %v2156_v42 = vld [vmem:[%s5071_s12 + $0x18] sm:$0xff] }
 0x559   : > { %2176 = vmatpush.msrb.mxu2 %v2156_v42 }
 0x55a   : > { %v1864_v45 = vmul.f32 0.5, %v1863_v44  ;;  %v2155_v44 = vld [vmem:[%s5071_s12 + $0x10] sm:$0xff] }
 0x55b   : > { %2177 = vmatpush.msrb.mxu2 %v2155_v44 }
 0x55c   : > { %v1865_v47 = vsub.f32 1.5, %v1864_v45 }
 0x55d   : > { %v3390_v48 = vpop.eup %3389 }
 0x55e   : > { %v1866_v49 = vmul.f32 %v3388_v40, %v1865_v47  ;;  %v1872_v50 = vmul.f32 %v3390_v48, %v1860_v41  ;;  %vm1878_vm15 = vweird.f32 %v3390_v48  ;;  %v2154_v47 = vld [vmem:[%s5071_s12 + $0x8] sm:$0xff] }
 0x55f   : > { %vm1879_vm4 = vmor %vm1877_vm2, %vm1878_vm15  ;;  %2178 = vmatpush.msrb.mxu2 %v2154_v47  ;;  %v3371_v47 = vld [vmem:[#allocation25] ss:$0 sm:$0xff] }
 0x560   : > { %v1870_v55 = vsel %vm1869_vm14, %v3388_v40, %v1866_v49  ;;  %v1873_v56 = vmul.f32 %v3390_v48, %v1872_v50  ;;  %v2153_v49 = vld [vmem:[%s5071_s12] sm:$0xff] }
 0x561   : > { %v1881_v58 = vmul.f32 %v1870_v55, %v1847_v12  ;;  %2179 = vmatpush.msrb.mxu2 %v2153_v49 }
 0x562   : > { %v1874_v51 = vmul.f32 0.5, %v1873_v56 }
 0x563   : > { %v1886_v23 = vmul.f32 %v3367_v54, %v1881_v58 }
 0x564   : > { %v1875_v52 = vsub.f32 1.5, %v1874_v51 }
 0x565   : > { %v1891_v24 = vadd.f32 %v3368_v59, %v1886_v23 }
 0x566   : > { %v1876_v31 = vmul.f32 %v3390_v48, %v1875_v52 }
 0x567   : > { %v1893_v13 = vmax.f32 %v1891_v24, 0.0 }
 0x568   : > { %v1880_v2 = vsel %vm1879_vm4, %v3390_v48, %v1876_v31  ;;  %vm2276_vm4 = vcmask 31744  }
 0x569   : > { %3076 = vmatmul.msk.f32.vlgmr.msra.gmra.mxu0 %vm1518_vm1, %v1893_v13  ;;  %v1882_v60 = vmul.f32 %v1880_v2, %v1848_v21  ;;  %v2185_v21 = vld [vmem:[%s5070_s11 + $0x8] sm:$0xff] }
 0x56b   : > { %v1887_v46 = vmul.f32 %v3367_v54, %v1882_v60 }
 0x56d   : > { %v1892_v53 = vadd.f32 %v3368_v59, %v1887_v46 }
 0x56f   : > { %v1894_v4 = vmax.f32 %v1892_v53, 0.0 }
 0x571   : > { %3077 = vmatmul.msk.f32.gmra.mxu0 %vm1518_vm1, %v1894_v4  ;;  %2003 = vmatpush.msra.mxu1 %v1894_v4 }
 0x573   : > { %2004 = vmatpush.msra.mxu1 %v1893_v13 }
 0x5e6   : > { %v1926_v36 = vpop.f32.mrf.mxu0 }
 0x5e7   : > { %v1927_v61 = vadd.f32 %v3369_v57, %v1926_v36 }
 0x5e9   : > { %v1932_v43 = vsel %vm1403_vm0, %v1927_v61, -inf }
 0x5ea   : > { %1933 = vmax.xlane.f32.xlu1 %v1932_v43 }
 0x5ee   : > { %v1929_v62 = vpop.f32.mrf.mxu0 }
 0x5ef   : > { %v1930_v16 = vadd.f32 %v3369_v57, %v1929_v62 }
 0x5f1   : > { %v1935_v19 = vsel %vm1403_vm0, %v1930_v16, -inf }
 0x5f2   : > { %1936 = vmax.xlane.f32.xlu2 %v1935_v19 }
 0x65d   : > { %v1934_v17 = vpop.xlane.xlu1 %1933 }
 0x65e   : > { %v1938_v20 = vsub.f32 %v1927_v61, %v1934_v17 }
 0x660   : > { %v1940_v63 = vmul.f32 1.442695, %v1938_v20 }
 0x662   : > { %3391 = vpow2.f32 %v1940_v63 }
 0x665   : > { %v1937_v18 = vpop.xlane.xlu2 %1936 }
 0x666   : > { %v1939_v28 = vsub.f32 %v1930_v16, %v1937_v18 }
 0x668   : > { %v3392_v0 = vpop.eup %3391  ;;  %v1942_v1 = vmul.f32 1.442695, %v1939_v28 }
 0x669   : > { %v1944_v3 = vsel %vm1403_vm0, %v3392_v0, 0.0 }
 0x66a   : > { %3393 = vpow2.f32 %v1942_v1  ;;  %1945 = vadd.xlane.f32.xlu1 %v1944_v3 }
 0x670   : > { %v3394_v5 = vpop.eup %3393 }
 0x671   : > { %v1947_v6 = vsel %vm1403_vm0, %v3394_v5, 0.0 }
 0x672   : > { %1948 = vadd.xlane.f32.xlu2 %v1947_v6  ;;  %v3370_v6 = vld [vmem:[#allocation23] ss:$0 sm:$0xff] }
 0x6dd   : > { %v1946_v7 = vpop.xlane.xlu1 %1945 }
 0x6de   : > { %3395 = vrcp.f32 %v1946_v7 }
 0x6e4   : > { %v3396_v8 = vpop.eup %3395 }
 0x6e5   : > { %v1949_v10 = vpop.xlane.xlu2 %1948  ;;  %v1952_v11 = vmul.f32 %v3396_v8, %v3392_v0 }
 0x6e6   : > { %3397 = vrcp.f32 %v1949_v10 }
 0x6e7   : > { %1954 = vxpose.xlu0.b32.start [1/2] (short) (narrow) %v1952_v11, 8 }
 0x6ec   : > { %v3398_v12 = vpop.eup %3397 }
 0x6ed   : > { %v1953_v22 = vmul.f32 %v3398_v12, %v3394_v5 }
 0x6ef   : > { %2046 = vmatpush.msra.mxu3 %v1953_v22  ;;  %1955 = vxpose.xlu0.b32.end [2/2] (short) (narrow) %v1953_v22, 8 }
 0x6f1   : > { %2047 = vmatpush.msra.mxu3 %v1952_v11 }
 0x6f3   : > { %2203 = vmatpush.msrb.mxu3 %v2187_v14 }
 0x6f5   : > { %2204 = vmatpush.msrb.mxu3 %v2186_v15 }
 0x6f7   : > { %2205 = vmatpush.msrb.mxu3 %v2185_v21 }
 0x6f9   : > { %2206 = vmatpush.msrb.mxu3 %v2184_v25  ;;  %v2248_v25 = vld [vmem:[%s5072_s9 + $0x18] sm:$0xff] }
 0x78b   : > { %v1970_v32 = vpop.trf.xlu0 }
 0x78c   : > { %3078 = vmatmul.msk.f32.vlgmr.msra.gmra.mxu1 %vm1608_vm3, %v1970_v32  ;;  %3079 = vmatmul.msk.f32.vlgmr.msra.gmra.mxu2 %vm1608_vm3, %v1970_v32 }
 0x809   : > { %v2006_v30 = vpop.f32.mrf.mxu1 }
 0x80a   : > { %2148 = vmatpush.msrb.mxu1 %v2006_v30 }
 0x80f   : > { %v2026_v39 = vpop.f32.mrf.mxu2 }
 0x810   : > { %3080 = vmatmul.msk.f32.vlgmr.msra.gmra.mxu3 %vm1608_vm3, %v2026_v39  ;;  %v2246_v39 = vld [vmem:[%s5072_s9 + $0x8] sm:$0xff] }
 0x818   : > { %3085 = vmatmul.msk.f32.vlgmr.msrb.gmra.mxu3 %vm1518_vm1, %v2006_v30  ;;  %v2247_v30 = vld [vmem:[%s5072_s9 + $0x10] sm:$0xff] }
 0x893   : > { %v2049_v33 = vpop.f32.mrf.mxu3 }
 0x894   : > { %v2057_v34 = vsel %vm2056_vm5, 0.0, %v2049_v33 }
 0x895   : > { %3081 = vmatpush.xpose.msk.msrb.mxu0 %vm1403_vm0, %v2057_v34  ;;  %v2058_v35 = vsel %vm1403_vm0, %v2057_v34, 0.0 }
 0x896   : > { %2059 = vadd.xlane.f32.xlu1 %v2058_v35 }
 0x898   : > { %3082 = vmatmul.msk.f32.vlgmr.msrb.gmra.mxu0 %vm1403_vm0, %v4210_v37 }
 0x899   : > { %2268 = vmatpush.msra.mxu0 %v2248_v25 }
 0x89b   : > { %v2208_v10 = vpop.f32.mrf.mxu3  ;;  %2269 = vmatpush.msra.mxu0 %v2247_v30 }
 0x89d   : > { %2270 = vmatpush.msra.mxu0 %v2246_v39 }
 0x89f   : > { %2271 = vmatpush.msra.mxu0 %v2245_v26 }
 0x909   : > { %v2060_v38 = vpop.xlane.xlu1 %2059 }
 0x90a   : > { %3399 = vrsqrt.f32 %v2060_v38  ;;  %vm2094_vm3 = vcmp.eq.f32.partialorder %v2060_v38, inf  ;;  %v2097_v2 = vand.u32 2147483648, %v2060_v38  ;;  %vm2096_vm7 = vcmp.eq.f32.partialorder %v2060_v38, 0.0 }
 0x910   : > { %v3400_v40 = vpop.eup %3399 }
 0x911   : > { %v2088_v41 = vmul.f32 %v3400_v40, %v2060_v38 }
 0x913   : > { %v2089_v45 = vmul.f32 %v3400_v40, %v2088_v41 }
 0x915   : > { %v2084_v48 = vpop.f32.mrf.mxu0  ;;  %v2090_v50 = vmul.f32 0.5, %v2089_v45 }
 0x916   : > { %3401 = vrsqrt.f32 %v2084_v48  ;;  %vm2107_vm6 = vcmp.eq.f32.partialorder %v2084_v48, inf  ;;  %v2110_v60 = vand.u32 2147483648, %v2084_v48  ;;  %vm2109_vm9 = vcmp.eq.f32.partialorder %v2084_v48, 0.0 }
 0x917   : > { %v2091_v54 = vsub.f32 1.5, %v2090_v50  ;;  %v3372_v50 = vld [vmem:[#allocation26] ss:$0 sm:$0xff] }
 0x919   : > { %v2092_v58 = vmul.f32 %v3400_v40, %v2091_v54 }
 0x91b   : > { %v2093_v23 = vmul.f32 %v2092_v58, %v2060_v38  ;;  %v3373_v58 = vld [vmem:[#allocation28] ss:$0 sm:$0xff] }
 0x91c   : > { %v3402_v55 = vpop.eup %3401 }
 0x91d   : > { %v2101_v56 = vmul.f32 %v3402_v55, %v2084_v48  ;;  %v2095_v31 = vsel %vm2094_vm3, %v2060_v38, %v2093_v23  ;;  %vm2387_vm3 = vcmask 27648  }
 0x91e   : > { %v2098_v53 = vsel %vm2096_vm7, %v2097_v2, %v2095_v31 }
 0x91f   : > { %v2102_v59 = vmul.f32 %v3402_v55, %v2101_v56  ;;  %v2099_v36 = vadd.f32 1e-15, %v2098_v53 }
 0x921   : > { %v2103_v51 = vmul.f32 0.5, %v2102_v59 }
 0x923   : > { %v2104_v52 = vsub.f32 1.5, %v2103_v51 }
 0x925   : > { %v2105_v24 = vmul.f32 %v3402_v55, %v2104_v52 }
 0x927   : > { %v2106_v13 = vmul.f32 %v2105_v24, %v2084_v48 }
 0x929   : > { %v2108_v46 = vsel %vm2107_vm6, %v2084_v48, %v2106_v13 }
 0x92a   : > { %v2111_v4 = vsel %vm2109_vm9, %v2110_v60, %v2108_v46 }
 0x92b   : > { %v2112_v57 = vadd.f32 1e-15, %v2111_v4 }
 0x92d   : > { %v2113_v61 = vperm.slane %v2112_v57, 0  ;;  %v2519_v57 = vld [vmem:[#allocation32 + $0x18] sm:$0xff] }
 0x92f   : > { %v2114_v43 = vmul.f32 %v2113_v61, %v2099_v36  ;;  %v2518_v36 = vld [vmem:[#allocation32 + $0x10] sm:$0xff]  ;;  %v2517_v61 = vld [vmem:[#allocation32 + $0x8] sm:$0xff] }
 0x931   : > { %3403 = vrcp.f32 %v2114_v43  ;;  %v2126_v17 = vand.u32 2147483648, %v2114_v43  ;;  %v2124_v63 = vand.u32 2147483647, %v2114_v43  ;;  %vm2120_vm11 = vweird.f32 %v2114_v43 }
 0x933   : > { %v2127_v28 = vor.u32 1.1754944e-38, %v2126_v17  ;;  %vm2125_vm13 = vcmp.eq.f32.partialorder %v2124_v63, 8.507059e+37 }
 0x937   : > { %v3404_v62 = vpop.eup %3403 }
 0x938   : > { %v2116_v16 = vmul.f32 %v3404_v62, %v2114_v43  ;;  %vm2121_vm10 = vweird.f32 %v3404_v62  ;;  %v2516_v43 = vld [vmem:[#allocation32] sm:$0xff] }
 0x939   : > { %vm2122_vm12 = vmor %vm2120_vm11, %vm2121_vm10 }
 0x93a   : > { %v2117_v19 = vsub.f32 1.0, %v2116_v16 }
 0x93c   : > { %v2118_v20 = vmul.f32 %v3404_v62, %v2117_v19 }
 0x93e   : > { %v2119_v18 = vadd.f32 %v3404_v62, %v2118_v20 }
 0x940   : > { %v2123_v0 = vsel %vm2122_vm12, %v3404_v62, %v2119_v18  ;;  %vm2545_vm12 = vcmask 257024  }
 0x941   : > { %v2128_v1 = vsel %vm2125_vm13, %v2127_v28, %v2123_v0 }
 0x942   : > { %v2129_v3 = vmul.f32 %v2128_v1, %v2057_v34 }
 0x944   : > { %3083 = vmatmul.msk.f32.vlgmr.msrb.gmra.mxu1 %vm1403_vm0, %v2129_v3  ;;  %2358 = vmatpush.msra.mxu2 %v2129_v3 }
 0x9c1   : > { %v2150_v5 = vpop.f32.mrf.mxu1 }
 0x9c2   : > { %3084 = vmatmul.msk.f32.vlgmr.msrb.gmra.mxu2 %vm1518_vm1, %v2150_v5 }
 0xa45   : > { %v2181_v7 = vpop.f32.mrf.mxu2 }
 0xa46   : > { %v2182_v8 = vadd.f32 %v3370_v6, %v2181_v7 }
 0xa48   : > { %v2211_v11 = vadd.f32 %v2208_v10, %v2182_v8 }
 0xa4a   : > { %v2214_v12 = vsel %vm1518_vm1, %v2211_v11, 0.0 }
 0xa4b   : > { %2215 = vadd.xlane.f32.xlu2 %v2214_v12  ;;  %v2488_v12 = vld [vmem:[#allocation29 + $0x18] sm:$0xff] }
 0xa4c   : > { %2508 = vmatpush.msrb.mxu2 %v2488_v12 }
 0xabe   : > { %v2216_v22 = vpop.xlane.xlu2 %2215 }
 0xabf   : > { %v2217_v32 = vmul.f32 %v2216_v22, %v4893_v9  ;;  %v2487_v22 = vld [vmem:[#allocation29 + $0x10] sm:$0xff] }
 0xac0   : > { %2509 = vmatpush.msrb.mxu2 %v2487_v22 }
 0xac1   : > { %v2218_v14 = vsub.f32 %v2211_v11, %v2217_v32 }
 0xac3   : > { %v2219_v15 = vmul.f32 %v2218_v14, %v2218_v14 }
 0xac5   : > { %v2220_v21 = vsel %vm1518_vm1, %v2219_v15, 0.0 }
 0xac6   : > { %2221 = vadd.xlane.f32.xlu1 %v2220_v21 }
 0xb39   : > { %v2222_v33 = vpop.xlane.xlu1 %2221 }
 0xb3a   : > { %v2223_v34 = vmul.f32 %v2222_v33, %v4893_v9 }
 0xb3c   : > { %v2224_v35 = vadd.f32 1e-05, %v2223_v34 }
 0xb3e   : > { %3405 = vrsqrt.f32 %v2224_v35  ;;  %vm2231_vm15 = vweird.f32 %v2224_v35 }
 0xb44   : > { %v3406_v38 = vpop.eup %3405 }
 0xb45   : > { %v2226_v40 = vmul.f32 %v3406_v38, %v2224_v35  ;;  %vm2232_vm14 = vweird.f32 %v3406_v38 }
 0xb46   : > { %vm2233_vm2 = vmor %vm2231_vm15, %vm2232_vm14 }
 0xb47   : > { %v2227_v41 = vmul.f32 %v3406_v38, %v2226_v40 }
 0xb49   : > { %v2228_v42 = vmul.f32 0.5, %v2227_v41 }
 0xb4b   : > { %v2229_v44 = vsub.f32 1.5, %v2228_v42 }
 0xb4d   : > { %v2230_v45 = vmul.f32 %v3406_v38, %v2229_v44 }
 0xb4f   : > { %v2234_v48 = vsel %vm2233_vm2, %v3406_v38, %v2230_v45  ;;  %vm2640_vm2 = vcmask 3072  }
 0xb50   : > { %v2235_v49 = vmul.f32 %v2234_v48, %v2218_v14 }
 0xb52   : > { %v2239_v54 = vmul.f32 %v3371_v47, %v2235_v49 }
 0xb54   : > { %v2243_v55 = vadd.f32 %v3372_v50, %v2239_v54 }
 0xb56   : > { %v2244_v56 = vmax.f32 %v2243_v55, 0.0 }
 0xb58   : > { %3086 = vmatmul.msk.f32.vlgmr.msra.gmra.mxu0 %vm1518_vm1, %v2244_v56  ;;  %2338 = vmatpush.msra.mxu1 %v2244_v56  ;;  %v2485_v56 = vld [vmem:[#allocation29] sm:$0xff] }
 0xbd5   : > { %v2273_v59 = vpop.f32.mrf.mxu0 }
 0xbd6   : > { %v2274_v51 = vadd.f32 %v3373_v58, %v2273_v59  ;;  %v3374_v59 = vld [vmem:[#allocation31] ss:$0 sm:$0xff] }
 0xbd8   : > { %v2277_v23 = vsel %vm2276_vm4, %v2274_v51, -inf }
 0xbd9   : > { %2278 = vmax.xlane.f32.xlu2 %v2277_v23 }
 0xc4c   : > { %v2279_v52 = vpop.xlane.xlu2 %2278 }
 0xc4d   : > { %v2280_v24 = vsub.f32 %v2274_v51, %v2279_v52 }
 0xc4f   : > { %v2281_v31 = vmul.f32 1.442695, %v2280_v24 }
 0xc51   : > { %3407 = vpow2.f32 %v2281_v31 }
 0xc57   : > { %v3408_v13 = vpop.eup %3407 }
 0xc58   : > { %v2283_v2 = vsel %vm2276_vm4, %v3408_v13, 0.0 }
 0xc59   : > { %2284 = vadd.xlane.f32.xlu0 %v2283_v2 }
 0xccc   : > { %v2285_v60 = vpop.xlane.xlu0 %2284 }
 0xccd   : > { %3409 = vrcp.f32 %v2285_v60 }
 0xcd3   : > { %v3410_v46 = vpop.eup %3409 }
 0xcd4   : > { %v2287_v53 = vmul.f32 %v3410_v46, %v3408_v13 }
 0xcd6   : > { %2288 = vxpose.xlu1.b32.start.end [1/1] (short) (narrow) %v2287_v53, 8  ;;  %2381 = vmatpush.msra.mxu3 %v2287_v53 }
 0xcd8   : > { %2534 = vmatpush.msrb.mxu3 %v2519_v57  ;;  %v2579_v57 = vld [vmem:[%s5073_s7 + $0x10] sm:$0xff] }
 0xcda   : > { %2535 = vmatpush.msrb.mxu3 %v2518_v36  ;;  %v2578_v36 = vld [vmem:[%s5073_s7 + $0x8] sm:$0xff] }
 0xcdc   : > { %2536 = vmatpush.msrb.mxu3 %v2517_v61  ;;  %v2577_v61 = vld [vmem:[%s5073_s7] sm:$0xff] }
 0xcde   : > { %2537 = vmatpush.msrb.mxu3 %v2516_v43  ;;  %v2612_v43 = vld [vmem:[%s5074_s4 + $0x18] sm:$0xff] }
 0xd7a   : > { %v2304_v4 = vpop.trf.xlu1 }
 0xd7b   : > { %3088 = vmatmul.msk.f32.vlgmr.msra.gmra.mxu2 %vm1403_vm0, %v2304_v4  ;;  %3087 = vmatmul.msk.f32.vlgmr.msra.gmra.mxu1 %vm1403_vm0, %v2304_v4  ;;  %v2580_v4 = vld [vmem:[%s5073_s7 + $0x18] sm:$0xff] }
 0xdf8   : > { %v2340_v62 = vpop.f32.mrf.mxu1 }
 0xdf9   : > { %3092 = vmatpush.msk.msrb.mxu1 %vm1700_vm8, %v2340_v62 }
 0xdfb   : > { %2632 = vmatpush.msra.mxu1 %v2612_v43 }
 0xdfe   : > { %v2360_v16 = vpop.f32.mrf.mxu2 }
 0xdff   : > { %3089 = vmatmul.msk.f32.vlgmr.msra.gmra.mxu3 %vm1403_vm0, %v2360_v16 }
 0xe07   : > { %3095 = vmatmul.msk.f32.vlgmr.msrb.gmra.mxu3 %vm1518_vm1, %v2340_v62 }
 0xe82   : > { %v2383_v19 = vpop.f32.mrf.mxu3 }
 0xe83   : > { %v2386_v17 = vsel %vm2056_vm5, 0.0, %v2383_v19 }
 0xe84   : > { %3090 = vmatpush.xpose.msk.msrb.mxu0 %vm2276_vm4, %v2386_v17  ;;  %v2388_v20 = vsel %vm2387_vm3, %v2386_v17, 0.0 }
 0xe85   : > { %2389 = vadd.xlane.f32.xlu2 %v2388_v20 }
 0xe87   : > { %3091 = vmatmul.msk.f32.vlgmr.msrb.gmra.mxu0 %vm2276_vm4, %v4210_v37  ;;  %v2486_v37 = vld [vmem:[#allocation29 + $0x8] sm:$0xff] }
 0xe88   : > { %2510 = vmatpush.msrb.mxu2 %v2486_v37  ;;  %2600 = vmatpush.msra.mxu0 %v2580_v4  ;;  %v4211_v37 = vmov 4.0  }
 0xe8a   : > { %2511 = vmatpush.msrb.mxu2 %v2485_v56  ;;  %v2539_v52 = vpop.f32.mrf.mxu3  ;;  %2601 = vmatpush.msra.mxu0 %v2579_v57 }
 0xe8c   : > { %2602 = vmatpush.msra.mxu0 %v2578_v36 }
 0xe8e   : > { %2603 = vmatpush.msra.mxu0 %v2577_v61 }
 0xef8   : > { %v2390_v63 = vpop.xlane.xlu2 %2389 }
 0xef9   : > { %3411 = vrsqrt.f32 %v2390_v63  ;;  %vm2423_vm0 = vcmp.eq.f32.partialorder %v2390_v63, inf  ;;  %v2426_v21 = vand.u32 2147483648, %v2390_v63  ;;  %vm2425_vm5 = vcmp.eq.f32.partialorder %v2390_v63, 0.0 }
 0xeff   : > { %v3412_v18 = vpop.eup %3411 }
 0xf00   : > { %v2417_v28 = vmul.f32 %v3412_v18, %v2390_v63 }
 0xf02   : > { %v2418_v0 = vmul.f32 %v3412_v18, %v2417_v28 }
 0xf04   : > { %v2413_v1 = vpop.f32.mrf.mxu0  ;;  %v2419_v3 = vmul.f32 0.5, %v2418_v0 }
 0xf05   : > { %3413 = vrsqrt.f32 %v2413_v1  ;;  %vm2436_vm8 = vcmp.eq.f32.partialorder %v2413_v1, inf  ;;  %v2439_v25 = vand.u32 2147483648, %v2413_v1  ;;  %vm2438_vm6 = vcmp.eq.f32.partialorder %v2413_v1, 0.0 }
 0xf06   : > { %v2420_v5 = vsub.f32 1.5, %v2419_v3 }
 0xf08   : > { %v2421_v27 = vmul.f32 %v3412_v18, %v2420_v5 }
 0xf0a   : > { %v2422_v10 = vmul.f32 %v2421_v27, %v2390_v63 }
 0xf0b   : > { %v3414_v6 = vpop.eup %3413 }
 0xf0c   : > { %v2430_v7 = vmul.f32 %v3414_v6, %v2413_v1  ;;  %v2424_v14 = vsel %vm2423_vm0, %v2390_v63, %v2422_v10  ;;  %v2609_v10 = vld [vmem:[%s5074_s4] sm:$0xff] }
 0xf0d   : > { %v2427_v39 = vsel %vm2425_vm5, %v2426_v21, %v2424_v14 }
 0xf0e   : > { %v2431_v29 = vmul.f32 %v3414_v6, %v2430_v7  ;;  %v2428_v34 = vadd.f32 1e-15, %v2427_v39 }
 0xf10   : > { %v2432_v8 = vmul.f32 0.5, %v2431_v29  ;;  %v2611_v29 = vld [vmem:[%s5074_s4 + $0x10] sm:$0xff] }
 0xf11   : > { %2633 = vmatpush.msra.mxu1 %v2611_v29 }
 0xf12   : > { %v2433_v11 = vsub.f32 1.5, %v2432_v8  ;;  %v2610_v8 = vld [vmem:[%s5074_s4 + $0x8] sm:$0xff] }
 0xf13   : > { %2634 = vmatpush.msra.mxu1 %v2610_v8 }
 0xf14   : > { %v2434_v32 = vmul.f32 %v3414_v6, %v2433_v11  ;;  %v3376_v6 = vld [vmem:[#allocation35] ss:$0 sm:$0xff]  ;;  %v3377_v11 = vld [vmem:[#allocation37] ss:$0 sm:$0xff] }
 0xf15   : > { %2635 = vmatpush.msra.mxu1 %v2609_v10 }
 0xf16   : > { %v2435_v15 = vmul.f32 %v2434_v32, %v2413_v1 }
 0xf18   : > { %v2437_v30 = vsel %vm2436_vm8, %v2413_v1, %v2435_v15  ;;  %v3375_v1 = vld [vmem:[#allocation34] ss:$0 sm:$0xff]  ;;  %v3378_v15 = vld [vmem:[#allocation2] ss:$0 sm:$0xff]  ;;  %vm2675_vm8 = vcmask 0  }
 0xf19   : > { %v2440_v26 = vsel %vm2438_vm6, %v2439_v25, %v2437_v30 }
 0xf1a   : > { %v2441_v33 = vadd.f32 1e-15, %v2440_v26 }
 0xf1c   : > { %v2442_v35 = vperm.slane %v2441_v33, 0 }
 0xf1e   : > { %v2443_v38 = vmul.f32 %v2442_v35, %v2428_v34 }
 0xf20   : > { %3415 = vrcp.f32 %v2443_v38  ;;  %v2455_v44 = vand.u32 2147483648, %v2443_v38  ;;  %v2453_v47 = vand.u32 2147483647, %v2443_v38  ;;  %vm2449_vm9 = vweird.f32 %v2443_v38 }
 0xf22   : > { %v2456_v49 = vor.u32 1.1754944e-38, %v2455_v44  ;;  %vm2454_vm11 = vcmp.eq.f32.partialorder %v2453_v47, 8.507059e+37 }
 0xf26   : > { %v3416_v40 = vpop.eup %3415 }
 0xf27   : > { %v2445_v41 = vmul.f32 %v3416_v40, %v2443_v38  ;;  %vm2450_vm7 = vweird.f32 %v3416_v40 }
 0xf28   : > { %vm2451_vm10 = vmor %vm2449_vm9, %vm2450_vm7 }
 0xf29   : > { %v2446_v42 = vsub.f32 1.0, %v2445_v41 }
 0xf2b   : > { %v2447_v45 = vmul.f32 %v3416_v40, %v2446_v42 }
 0xf2d   : > { %v2448_v48 = vadd.f32 %v3416_v40, %v2447_v45 }
 0xf2f   : > { %v2452_v50 = vsel %vm2451_vm10, %v3416_v40, %v2448_v48 }
 0xf30   : > { %v2457_v54 = vsel %vm2454_vm11, %v2456_v49, %v2452_v50 }
 0xf31   : > { %v2458_v55 = vmul.f32 %v2457_v54, %v2386_v17 }
 0xf33   : > { %3093 = vmatmul.msk.f32.vlgmr.msrb.gmra.mxu1 %vm2276_vm4, %v2458_v55 }
 0xfb0   : > { %v2482_v58 = vpop.f32.mrf.mxu1 }
 0xfb1   : > { %3094 = vmatmul.msk.f32.vlgmr.msrb.gmra.mxu2 %vm1518_vm1, %v2482_v58 }
0x1034   : > { %v2513_v51 = vpop.f32.mrf.mxu2 }
0x1035   : > { %v2514_v23 = vadd.f32 %v3374_v59, %v2513_v51 }
0x1037   : > { %v2542_v24 = vadd.f32 %v2539_v52, %v2514_v23 }
0x1039   : > { %v2546_v31 = vsel %vm2545_vm12, %v2542_v24, 0.0 }
0x103a   : > { %2547 = vadd.xlane.f32.xlu2 %v2546_v31 }
0x10ad   : > { %v2548_v13 = vpop.xlane.xlu2 %2547 }
0x10ae   : > { %v2549_v2 = vmul.f32 %v2548_v13, %v4893_v9 }
0x10b0   : > { %v2550_v60 = vsub.f32 %v2542_v24, %v2549_v2 }
0x10b2   : > { %v2551_v46 = vmul.f32 %v2550_v60, %v2550_v60 }
0x10b4   : > { %v2552_v53 = vsel %vm2545_vm12, %v2551_v46, 0.0 }
0x10b5   : > { %2553 = vadd.xlane.f32.xlu2 %v2552_v53 }
0x1128   : > { %v2554_v62 = vpop.xlane.xlu2 %2553 }
0x1129   : > { %v2555_v16 = vmul.f32 %v2554_v62, %v4893_v9 }
0x112b   : > { %v2556_v19 = vadd.f32 1e-05, %v2555_v16 }
0x112d   : > { %3417 = vrsqrt.f32 %v2556_v19  ;;  %vm2563_vm14 = vweird.f32 %v2556_v19 }
0x112e   : > { %3419 = vrcp.f32 %v4211_v37 }
0x1133   : > { %v3418_v17 = vpop.eup %3417 }
0x1134   : > { %v2558_v20 = vmul.f32 %v3418_v17, %v2556_v19  ;;  %vm2564_vm13 = vweird.f32 %v3418_v17  ;;  %v3420_v14 = vpop.eup %3419 }
0x1135   : > { %vm2565_vm15 = vmor %vm2563_vm14, %vm2564_vm13  ;;  %v2649_v21 = vmul.f32 4.0, %v3420_v14  ;;  %vm2653_vm4 = vweird.f32 %v3420_v14 }
0x1136   : > { %v2559_v63 = vmul.f32 %v3418_v17, %v2558_v20 }
0x1137   : > { %v2650_v39 = vsub.f32 1.0, %v2649_v21 }
0x1138   : > { %v2560_v18 = vmul.f32 0.5, %v2559_v63 }
0x1139   : > { %v2651_v34 = vmul.f32 %v3420_v14, %v2650_v39 }
0x113a   : > { %v2561_v28 = vsub.f32 1.5, %v2560_v18 }
0x113b   : > { %v2652_v40 = vadd.f32 %v3420_v14, %v2651_v34 }
0x113c   : > { %v2562_v0 = vmul.f32 %v3418_v17, %v2561_v28 }
0x113d   : > { %v2654_v44 = vsel %vm2653_vm4, %v3420_v14, %v2652_v40 }
0x113e   : > { %v2566_v3 = vsel %vm2565_vm15, %v3418_v17, %v2562_v0 }
0x113f   : > { %v2567_v5 = vmul.f32 %v2566_v3, %v2550_v60 }
0x1141   : > { %v2571_v7 = vmul.f32 %v3375_v1, %v2567_v5 }
0x1143   : > { %v2575_v9 = vadd.f32 %v3376_v6, %v2571_v7 }
0x1145   : > { %v2576_v27 = vmax.f32 %v2575_v9, 0.0 }
0x1147   : > { %3096 = vmatmul.msk.f32.vlgmr.msra.gmra.mxu0 %vm1518_vm1, %v2576_v27 }
0x11c4   : > { %v2605_v12 = vpop.f32.mrf.mxu0 }
0x11c5   : > { %v2606_v22 = vadd.f32 %v3377_v11, %v2605_v12 }
0x11c7   : > { %v2608_v32 = vmax.f32 %v2606_v22, 0.0 }
0x11c9   : > { %3097 = vmatmul.msk.f32.vlgmr.msra.gmra.mxu1 %vm1518_vm1, %v2608_v32 }
0x1246   : > { %v2637_v25 = vpop.f32.mrf.mxu1 }
0x1247   : > { %v2638_v30 = vadd.f32 %v3378_v15, %v2637_v25 }
0x1249   : > { %v2641_v26 = vsel %vm2640_vm2, %v2638_v30, 0.0 }
0x124a   : > { %v2642_v33 = vrot.slane %v2641_v26, 4 }
0x124c   : > { %v2643_v35 = vadd.f32 %v2642_v33, %v2641_v26 }
0x124e   : > { %v2644_v38 = vrot.slane %v2643_v35, 2 }
0x1250   : > { %v2645_v41 = vadd.f32 %v2644_v38, %v2643_v35 }
0x1252   : > { %v2646_v42 = vrot.slane %v2645_v41, 1 }
0x1254   : > { %v2647_v45 = vadd.f32 %v2646_v42, %v2645_v41 }
0x1256   : > { %v2655_v47 = vmul.f32 %v2654_v44, %v2647_v45 }
0x1258   : > { %v2656_v48 = vsub.f32 0.0, %v2655_v47 }
0x125a   : > { %v2657_v49 = vmul.f32 1.442695, %v2656_v48 }
0x125c   : > { %3421 = vpow2.f32 %v2657_v49 }
0x1262   : > { %v3422_v50 = vpop.eup %3421 }
0x1263   : > { %v2659_v54 = vadd.f32 1.0, %v3422_v50 }
0x1265   : > { %3423 = vrcp.f32 %v2659_v54  ;;  %v2671_v59 = vand.u32 2147483648, %v2659_v54  ;;  %v2669_v23 = vand.u32 2147483647, %v2659_v54  ;;  %vm2665_vm3 = vweird.f32 %v2659_v54 }
0x1267   : > { %v2672_v24 = vor.u32 1.1754944e-38, %v2671_v59  ;;  %vm2670_vm5 = vcmp.eq.f32.partialorder %v2669_v23, 8.507059e+37 }
0x126b   : > { %v3424_v55 = vpop.eup %3423 }
0x126c   : > { %v2661_v56 = vmul.f32 %v3424_v55, %v2659_v54  ;;  %vm2666_vm1 = vweird.f32 %v3424_v55 }
0x126d   : > { %vm2667_vm0 = vmor %vm2665_vm3, %vm2666_vm1 }
0x126e   : > { %v2662_v58 = vsub.f32 1.0, %v2661_v56 }
0x1270   : > { %v2663_v51 = vmul.f32 %v3424_v55, %v2662_v58 }
0x1272   : > { %v2664_v52 = vadd.f32 %v3424_v55, %v2663_v51 }
0x1274   : > { %v2668_v31 = vsel %vm2667_vm0, %v3424_v55, %v2664_v52 }
0x1275   : > { %v2673_v13 = vsel %vm2670_vm5, %v2672_v24, %v2668_v31 }
0x1276   : > { %2676 = vst.msk [vmem:[%s1371_s5] sm:$0x1] %vm2675_vm8, %v2673_v13 }
0x1277 PF: > { %s5076_s19 = sld [smem:[#allocation73_spill]]  ;;  %s5078_s28 = smov %s4141_s1 }
0x1278   : > { %s5077_s10 = sld [smem:[#allocation74_spill]]  ;;  %s5079_s1 = smov %s4145_s0 }
0x127d   : > { %p88_p8 = scmp.ge.s32.totalorder %s5076_s19, 4  }
0x127e   : > { %s5080_s0 = smov %s5077_s10 }
0x127f   :  { %90 = sbr.rel (!%p88_p8) target bundleno = 76 (0x4c), region = 314 }
0x1284   :  { %2694 = vsyncpa [#allocation4], 1 }
0x1285   :  { %2696 = vsyncpa [#allocation4 + $0x1], 1 }
0x1286   :  { %2697 = vsyncpa [#allocation6], 1 }
0x1287   :  { %2698 = vsyncpa [#allocation9], 1 }
0x1288   :  { %2699 = vsyncpa [#allocation12], 1 }
0x1289   :  { %2700 = vsyncpa [#allocation15], 1 }
0x128a   :  { %2701 = vsyncpa [#allocation18], 1 }
0x128b   :  { %2702 = vsyncpa [#allocation21], 1 }
0x128c   :  { %2703 = vsyncpa [#allocation24], 1 }
0x128d   :  { %2704 = vsyncpa [#allocation27], 1 }
0x128e   :  { %2705 = vsyncpa [#allocation30], 1 }
0x128f   :  { %2706 = vsyncpa [#allocation33], 1 }
0x1290   :  { %2707 = vsyncpa [#allocation36], 1 }

</bundles_post_ra>
